<compile_context>
chip_gen: v7x
topology: tpu7x:2x2x1
jax: 0.10.0
libtpu: 0.0.40
codegen_flags: <defaults>
</compile_context>

<pallas_src>
import functools

import jax
import jax.numpy as jnp
from jax.experimental import pallas as pl
from jax.experimental.pallas import tpu as pltpu

LRELU_SLOPE = 0.2
BN_EPS = 1e-5
KSIZE = 4
LAYER_DEFS = ((6, 64), (64, 128), (128, 256), (256, 1))


def _round_up(x, m):
    return (x + m - 1) // m * m


def _device_kind():
    try:
        return jax.devices()[0].device_kind.lower()
    except Exception:
        return ""


def _vmem_limit_bytes():
    kind = _device_kind()
    if "v7" in kind:
        return 40 * 1024 * 1024          # v7x: 64 MiB physical per TC, leave headroom
    if "v5" in kind or "v6" in kind:
        return 64 * 1024 * 1024          # v5e/v6e: 128 MiB physical
    return 32 * 1024 * 1024              # unknown backend / interpret fallback


def _tn_cap():
    # v5e MXU is 128 wide; v6e/v7x MXUs are 256 wide.
    return 128 if "v5" in _device_kind() else 256


def _pick_tk(k_p, tm, tn, out_bytes, budget):
    """Largest lane-multiple tk dividing k_p whose working set (double-buffered
    bf16 LHS/RHS tiles + f32 accumulator + output tile) fits `budget` bytes."""
    tk = k_p
    while tk > 128:
        if k_p % tk == 0:
            need = (2 * (tm * tk + tk * tn) * 2      # bf16 LHS/RHS, double-buffered
                    + tm * tn * 4                    # f32 accumulator scratch
                    + 2 * tm * tn * out_bytes)       # output tile, double-buffered
            if need <= budget:
                return tk
        tk -= 128
    return 128


# ----------------------------------------------------------------------------
# Pallas kernel 1: tiled conv-as-matmul with fused epilogue
# ----------------------------------------------------------------------------
def _conv_matmul_kernel(p_ref, w_ref, b_ref, y_ref, *rest, mode, m_valid):
    """One (tm, tn) output tile of conv-as-matmul.

    mode: 'lrelu'    -> y = leaky_relu(acc + b)                 (bf16 out)
          'sigmoid'  -> y = sigmoid(acc + b)                    (f32 out)
          'bn_fused' -> y = leaky_relu(batchnorm(acc))          (bf16 out, n_m == 1)
          'bn_stats' -> y = acc (f32) + per-tile sum / sumsq    (n_m > 1 fallback)
    Bias is skipped in BN modes: BatchNorm with gamma=1/beta=0 cancels it.
    """
    if mode == "bn_stats":
        stats_ref, acc_ref = rest
    else:
        (acc_ref,) = rest

    # program_id / num_programs must stay at the kernel top level (never inside
    # a pl.when body) so they are always substituted by the grid environment.
    k = pl.program_id(2)
    k_last = pl.num_programs(2) - 1

    @pl.when(k == 0)
    def _init():
        if mode in ("lrelu", "sigmoid"):
            # Fold the bias into the accumulator init (frees the epilogue tail).
            acc_ref[...] = jnp.broadcast_to(b_ref[...], acc_ref.shape)
        else:
            acc_ref[...] = jnp.zeros_like(acc_ref)

    acc_ref[...] += jnp.dot(p_ref[...], w_ref[...],
                            preferred_element_type=jnp.float32)

    @pl.when(k == k_last)
    def _epilogue():
        acc = acc_ref[...]
        if mode == "lrelu":
            y_ref[...] = jnp.where(acc > 0, acc, LRELU_SLOPE * acc).astype(y_ref.dtype)
        elif mode == "sigmoid":
            y_ref[...] = jax.nn.sigmoid(acc).astype(y_ref.dtype)
        elif mode == "bn_fused":
            # Zero-padded rows contribute exactly 0 (no bias added), so plain
            # column sums over the tile are the full-batch statistics.
            inv_m = 1.0 / m_valid
            mean = jnp.sum(acc, axis=0, keepdims=True) * inv_m
            var = jnp.sum(acc * acc, axis=0, keepdims=True) * inv_m - mean * mean
            inv = jax.lax.rsqrt(jnp.maximum(var, 0.0) + BN_EPS)
            y = (acc - mean) * inv                      # gamma=1, beta=0
            y_ref[...] = jnp.where(y > 0, y, LRELU_SLOPE * y).astype(y_ref.dtype)
        else:  # "bn_stats": emit pre-activation + partial statistics
            y_ref[...] = acc.astype(y_ref.dtype)
            s = jnp.sum(acc, axis=0, keepdims=True)          # (1, tn)
            sq = jnp.sum(acc * acc, axis=0, keepdims=True)   # (1, tn)
            stats_ref[...] = jnp.concatenate([s, sq], axis=0)[None]   # (1, 2, tn)


# ----------------------------------------------------------------------------
# Pallas kernel 2: BatchNorm apply + LeakyReLU (only used when n_m > 1)
# ----------------------------------------------------------------------------
def _bn_lrelu_kernel(y_ref, mean_ref, inv_ref, o_ref):
    y = (y_ref[...] - mean_ref[...]) * inv_ref[...]   # gamma=1, beta=0
    o_ref[...] = jnp.where(y > 0, y, LRELU_SLOPE * y).astype(o_ref.dtype)


def _bn_lrelu_apply(y, mean_row, inv_row):
    M_p, Cout_p = y.shape
    # Mem-bound elementwise kernel: pick its tiles independently of the matmul.
    tm = min(M_p, 1024)
    while M_p % tm:
        tm -= 8
    return pl.pallas_call(
        _bn_lrelu_kernel,
        out_shape=jax.ShapeDtypeStruct((M_p, Cout_p), jnp.bfloat16),
        grid=(M_p // tm,),
        in_specs=[
            pl.BlockSpec((tm, Cout_p), lambda i: (i, 0)),
            pl.BlockSpec((1, Cout_p), lambda i: (0, 0)),
            pl.BlockSpec((1, Cout_p), lambda i: (0, 0)),
        ],
        out_specs=pl.BlockSpec((tm, Cout_p), lambda i: (i, 0)),
        compiler_params=pltpu.CompilerParams(
            dimension_semantics=("parallel",),
            vmem_limit_bytes=_vmem_limit_bytes()),
    )(y, mean_row, inv_row)


# ----------------------------------------------------------------------------
# Glue: im2col patch extraction (pure reshape/slice work, bf16)
# ----------------------------------------------------------------------------
# TODO(synk): build patch tiles in-kernel (memory_space=pl.ANY + manual DMA of
# the 4 shifted row slabs) to remove the KH*KW HBM read amplification of
# im2col at realistic PatchGAN resolutions.
def _im2col(x_nhwc, k, stride, pad):
    x = jnp.pad(x_nhwc, ((0, 0), (pad, pad), (pad, pad), (0, 0)))
    N, H, W, C = x.shape
    OH = (H - k) // stride + 1
    OW = (W - k) // stride + 1
    cols = []
    for i in range(k):
        for j in range(k):
            cols.append(x[:, i:i + stride * OH:stride, j:j + stride * OW:stride, :])
    p = jnp.stack(cols, axis=3)            # (N, OH, OW, k*k, C), order (kh, kw)
    p = p.reshape(N * OH * OW, k * k * C)  # column order: (kh, kw, cin)
    return p, (N, OH, OW)


# ----------------------------------------------------------------------------
# One PatchGAN layer
# ----------------------------------------------------------------------------
def conv_layer(x_nhwc, w_mat, b_row, cout, *, stride, mode):
    """conv(k=4, pad=1) [+ BN] + activation.  w_mat: (K_p, Cout_p) bf16."""
    patches, (N, OH, OW) = _im2col(x_nhwc, KSIZE, stride, 1)
    M, K = patches.shape
    K_p, Cout_p = w_mat.shape

    # ---- tile selection ----------------------------------------------------
    if M <= 512:
        tm = _round_up(M, 16)            # single M tile (16-row align for bf16)
        M_p = tm
    else:
        tm = 512                         # big tiles; n_m >= 2 -> megacore on v7x
        M_p = _round_up(M, tm)
    n_m = M_p // tm

    cap = _tn_cap()
    tn = cap if Cout_p % cap == 0 else 128
    n_n = Cout_p // tn

    fuse_bn = (mode == "bn") and (n_m == 1)
    kern_mode = ("bn_fused" if fuse_bn else "bn_stats") if mode == "bn" else mode
    # bf16 activations between layers; f32 only for the unfused BN
    # pre-activation and the final sigmoid output.
    y_dtype = jnp.float32 if kern_mode in ("bn_stats", "sigmoid") else jnp.bfloat16

    vmem_limit = _vmem_limit_bytes()
    tk = _pick_tk(K_p, tm, tn, jnp.dtype(y_dtype).itemsize, vmem_limit // 2)
    n_k = K_p // tk

    p_pad = jnp.pad(patches, ((0, M_p - M), (0, K_p - K))).astype(jnp.bfloat16)

    out_shapes = [jax.ShapeDtypeStruct((M_p, Cout_p), y_dtype)]
    out_specs = [pl.BlockSpec((tm, tn), lambda i, j, k: (i, j))]
    if kern_mode == "bn_stats":
        out_shapes.append(jax.ShapeDtypeStruct((n_m, 2, Cout_p), jnp.float32))
        out_specs.append(pl.BlockSpec((1, 2, tn), lambda i, j, k: (i, 0, j)))

    kern = functools.partial(_conv_matmul_kernel, mode=kern_mode, m_valid=M)
    result = pl.pallas_call(
        kern,
        out_shape=tuple(out_shapes) if len(out_shapes) > 1 else out_shapes[0],
        grid=(n_m, n_n, n_k),
        in_specs=[
            pl.BlockSpec((tm, tk), lambda i, j, k: (i, k)),
            pl.BlockSpec((tk, tn), lambda i, j, k: (k, j)),
            pl.BlockSpec((1, tn), lambda i, j, k: (0, j)),
        ],
        out_specs=tuple(out_specs) if len(out_specs) > 1 else out_specs[0],
        scratch_shapes=[pltpu.VMEM((tm, tn), jnp.float32)],
        compiler_params=pltpu.CompilerParams(
            dimension_semantics=("parallel", "parallel", "arbitrary"),
            vmem_limit_bytes=vmem_limit),
        cost_estimate=pl.CostEstimate(
            flops=2 * M_p * K_p * Cout_p,
            transcendentals=M_p * Cout_p if kern_mode == "sigmoid" else 0,
            bytes_accessed=(M_p * K_p * 2 + K_p * Cout_p * 2
                            + M_p * Cout_p * jnp.dtype(y_dtype).itemsize)),
    )(p_pad, w_mat, b_row)

    if kern_mode == "bn_stats":
        y_full, stats = result
        s = jnp.sum(stats[:, 0, :], axis=0)              # (Cout_p,)
        sq = jnp.sum(stats[:, 1, :], axis=0)
        mean = s / M
        var = jnp.maximum(sq / M - mean * mean, 0.0)     # biased variance
        inv = jax.lax.rsqrt(var + BN_EPS)
        y_full = _bn_lrelu_apply(y_full, mean.reshape(1, Cout_p),
                                 inv.reshape(1, Cout_p))
    else:
        y_full = result

    out = y_full[:M, :cout]                              # drop lane/row padding
    return out.reshape(N, OH, OW, cout)


# ----------------------------------------------------------------------------
# Full forward pass
# ----------------------------------------------------------------------------
# TODO(synk): at these tiny final-layer sizes (M=8 / M=2), layers 3 and 4 could
# be merged into one pallas_call to save the Cout=1 padded-weight traffic.
def patchgan_forward(x_nchw, params_mat):
    x = jnp.transpose(x_nchw, (0, 2, 3, 1)).astype(jnp.bfloat16)  # NCHW -> NHWC
    modes = ("lrelu", "bn", "bn", "sigmoid")
    strides = (2, 2, 2, 1)
    for (w, b), (_, cout), mode, s in zip(params_mat, LAYER_DEFS, modes, strides):
        x = conv_layer(x, w, b, cout, stride=s, mode=mode)
    return jnp.transpose(x, (0, 3, 1, 2)).astype(jnp.float32)     # NHWC -> NCHW


# ----------------------------------------------------------------------------
# Deterministic parameter init (synthetic; shapes from nn.Conv2d defs)
# ----------------------------------------------------------------------------
def init_params(key):
    params_mat = []   # padded (K_p, Cout_p) bf16 matmul form for the kernel
    params_oihw = []  # (Cout, Cin, KH, KW) f32 PyTorch form for the reference
    for idx, (cin, cout) in enumerate(LAYER_DEFS):
        kw_key, kb_key = jax.random.split(jax.random.fold_in(key, idx))
        w_oihw = jax.random.normal(kw_key, (cout, cin, KSIZE, KSIZE), jnp.float32) * 0.05
        b = jax.random.normal(kb_key, (cout,), jnp.float32) * 0.05
        k = KSIZE * KSIZE * cin
        k_p, cout_p = _round_up(k, 128), _round_up(cout, 128)
        # OIHW -> (KH, KW, Cin, Cout) -> (KH*KW*Cin, Cout), matching im2col order,
        # zero-padded to lane multiples of 128.
        w_mat = jnp.transpose(w_oihw, (2, 3, 1, 0)).reshape(k, cout)
        w_mat = jnp.pad(w_mat, ((0, k_p - k), (0, cout_p - cout))).astype(jnp.bfloat16)
        b_row = jnp.pad(b, (0, cout_p - cout)).reshape(1, cout_p)
        params_mat.append((w_mat, b_row))
        params_oihw.append((w_oihw, b))
    return params_mat, params_oihw


# ----------------------------------------------------------------------------
# Pure-JAX reference (mirrors the kernel's bf16 operand / activation dtypes)
# ----------------------------------------------------------------------------
def reference_forward(x_nchw, params_oihw):
    def q(a):  # bf16 round-trip, mirroring operand / inter-layer quantization
        return a.astype(jnp.bfloat16).astype(jnp.float32)

    def conv(x, w, b, stride):
        y = jax.lax.conv_general_dilated(
            q(x), q(w), (stride, stride), [(1, 1), (1, 1)],
            dimension_numbers=("NCHW", "OIHW", "NCHW"),
            preferred_element_type=jnp.float32,
            precision=jax.lax.Precision.HIGHEST)
        return y + b[None, :, None, None]

    def bn(x):
        mean = jnp.mean(x, axis=(0, 2, 3), keepdims=True)
        var = jnp.mean((x - mean) ** 2, axis=(0, 2, 3), keepdims=True)
        return (x - mean) * jax.lax.rsqrt(var + BN_EPS)

    def lrelu(x):
        return jnp.where(x > 0, x, LRELU_SLOPE * x)

    (w1, b1), (w2, b2), (w3, b3), (w4, b4) = params_oihw
    x = q(lrelu(conv(x_nchw, w1, b1, 2)))
    x = q(lrelu(bn(conv(x, w2, b2, 2))))
    x = q(lrelu(bn(conv(x, w3, b3, 2))))
    x = jax.nn.sigmoid(conv(x, w4, b4, 1))
    return x


if __name__ == "__main__":
    key = jax.random.PRNGKey(0)
    pkey, xkey = jax.random.split(key)
    params_mat, params_oihw = init_params(pkey)

    # Small input consistent with Conv2d(6, ...): batch=2, C=6, 16x16 spatial.
    x = jax.random.normal(xkey, (2, 6, 16, 16), jnp.float32)

    forward = jax.jit(patchgan_forward)
    out = jax.block_until_ready(forward(x, params_mat))
    assert out.shape == (2, 1, 1, 1), out.shape

    ref = jax.block_until_ready(reference_forward(x, params_oihw))
    assert jnp.allclose(out, ref, rtol=2e-3, atol=2e-3), (out, ref)

    print("KERNEL_OK")
</pallas_src>

<mosaic_0001>
module attributes {stable_mosaic.version = 11 : i64} {
  func.func @_conv_matmul_kernel(%arg0: i32, %arg1: i32, %arg2: i32, %arg3: memref<128x128xbf16, #tpu.memory_space<vmem>>, %arg4: memref<128x128xbf16, #tpu.memory_space<vmem>>, %arg5: memref<1x128xf32, #tpu.memory_space<vmem>>, %arg6: memref<128x128xbf16, #tpu.memory_space<vmem>>, %arg7: memref<128x128xf32, #tpu.memory_space<vmem>>) attributes {dimension_semantics = [#tpu.dimension_semantics<parallel>, #tpu.dimension_semantics<parallel>, #tpu.dimension_semantics<arbitrary>], iteration_bounds = array<i64: 1, 1, 1>, scalar_prefetch = 0 : i64, scratch_operands = 1 : i64, tpu.core_type = #tpu.core_type<tc>, window_params = [{transform_indices = @transform_0, window_bounds = array<i64: 128, 128>}, {transform_indices = @transform_1, window_bounds = array<i64: 128, 128>}, {transform_indices = @transform_2, window_bounds = array<i64: 1, 128>}, {transform_indices = @transform_3, window_bounds = array<i64: 128, 128>}]} {
    %c0_i32 = arith.constant 0 : i32
    %0 = arith.cmpi eq, %arg2, %c0_i32 : i32
    %1 = arith.extui %0 : i1 to i32
    %c0_i32_0 = arith.constant 0 : i32
    %2 = arith.cmpi ne, %1, %c0_i32_0 : i32
    scf.if %2 {
      %c0_10 = arith.constant 0 : index
      %c0_11 = arith.constant 0 : index
      %12 = vector.load %arg5[%c0_10, %c0_11] : memref<1x128xf32, #tpu.memory_space<vmem>>, vector<1x128xf32>
      %13 = vector.shape_cast %12 : vector<1x128xf32> to vector<1x128xf32>
      %14 = vector.broadcast %13 : vector<1x128xf32> to vector<128x128xf32>
      %c0_12 = arith.constant 0 : index
      %c0_13 = arith.constant 0 : index
      %15 = vector.load %arg7[%c0_12, %c0_13] : memref<128x128xf32, #tpu.memory_space<vmem>>, vector<128x128xf32>
      tpu.vector_store %arg7[%c0_12, %c0_13], %14 {strides = array<i32>} : memref<128x128xf32, #tpu.memory_space<vmem>>, vector<128x128xf32>,
    } else {
    }
    %c0 = arith.constant 0 : index
    %c0_1 = arith.constant 0 : index
    %3 = vector.load %arg7[%c0, %c0_1] : memref<128x128xf32, #tpu.memory_space<vmem>>, vector<128x128xf32>
    %c0_2 = arith.constant 0 : index
    %c0_3 = arith.constant 0 : index
    %4 = vector.load %arg3[%c0_2, %c0_3] : memref<128x128xbf16, #tpu.memory_space<vmem>>, vector<128x128xbf16>
    %c0_4 = arith.constant 0 : index
    %c0_5 = arith.constant 0 : index
    %5 = vector.load %arg4[%c0_4, %c0_5] : memref<128x128xbf16, #tpu.memory_space<vmem>>, vector<128x128xbf16>
    %cst = arith.constant dense<0.000000e+00> : vector<128x128xf32>
    %6 = tpu.matmul %4, %5, %cst {dimension_numbers = #tpu.dot_dimension_numbers<[1], [0], [0], [1], [0, 0, 1, 1], [], []>} : vector<128x128xbf16>, vector<128x128xbf16>, vector<128x128xf32> -> vector<128x128xf32>
    %7 = arith.addf %3, %6 : vector<128x128xf32>
    %c0_6 = arith.constant 0 : index
    %c0_7 = arith.constant 0 : index
    %8 = vector.load %arg7[%c0_6, %c0_7] : memref<128x128xf32, #tpu.memory_space<vmem>>, vector<128x128xf32>
    tpu.vector_store %arg7[%c0_6, %c0_7], %7 {strides = array<i32>} : memref<128x128xf32, #tpu.memory_space<vmem>>, vector<128x128xf32>,
    %c0_i32_8 = arith.constant 0 : i32
    %9 = arith.cmpi eq, %arg2, %c0_i32_8 : i32
    %10 = arith.extui %9 : i1 to i32
    %c0_i32_9 = arith.constant 0 : i32
    %11 = arith.cmpi ne, %10, %c0_i32_9 : i32
    scf.if %11 {
      %c0_10 = arith.constant 0 : index
      %c0_11 = arith.constant 0 : index
      %12 = vector.load %arg7[%c0_10, %c0_11] : memref<128x128xf32, #tpu.memory_space<vmem>>, vector<128x128xf32>
      %cst_12 = arith.constant 0.000000e+00 : f32
      %13 = vector.broadcast %cst_12 : f32 to vector<128x128xf32>
      %14 = arith.cmpf ogt, %12, %13 : vector<128x128xf32>
      %cst_13 = arith.constant 2.000000e-01 : f32
      %15 = vector.broadcast %cst_13 : f32 to vector<128x128xf32>
      %16 = arith.mulf %15, %12 : vector<128x128xf32>
      %17 = arith.select %14, %12, %16 : vector<128x128xi1>, vector<128x128xf32>
      %18 = arith.truncf %17 : vector<128x128xf32> to vector<128x128xbf16>
      %c0_14 = arith.constant 0 : index
      %c0_15 = arith.constant 0 : index
      %19 = vector.load %arg6[%c0_14, %c0_15] : memref<128x128xbf16, #tpu.memory_space<vmem>>, vector<128x128xbf16>
      tpu.vector_store %arg6[%c0_14, %c0_15], %18 {strides = array<i32>} : memref<128x128xbf16, #tpu.memory_space<vmem>>, vector<128x128xbf16>,
    } else {
    }
    return
  }
  func.func @transform_0(%arg0: i32, %arg1: i32, %arg2: i32) -> (i32, i32) {
    %c0_i32 = arith.constant 0 : i32
    return %arg0, %arg2 : i32, i32
  }
  func.func @transform_1(%arg0: i32, %arg1: i32, %arg2: i32) -> (i32, i32) {
    %c0_i32 = arith.constant 0 : i32
    return %arg2, %arg1 : i32, i32
  }
  func.func @transform_2(%arg0: i32, %arg1: i32, %arg2: i32) -> (i32, i32) {
    %c0_i32 = arith.constant 0 : i32
    %c0_i32_0 = arith.constant 0 : i32
    return %c0_i32, %arg1 : i32, i32
  }
  func.func @transform_3(%arg0: i32, %arg1: i32, %arg2: i32) -> (i32, i32) {
    %c0_i32 = arith.constant 0 : i32
    return %arg0, %arg1 : i32, i32
  }
}

module attributes {stable_mosaic.version = 11 : i64} {
  func.func @_conv_matmul_kernel(%arg0: i32, %arg1: i32, %arg2: i32, %arg3: memref<32x1024xbf16, #tpu.memory_space<vmem>>, %arg4: memref<1024x128xbf16, #tpu.memory_space<vmem>>, %arg5: memref<1x128xf32, #tpu.memory_space<vmem>>, %arg6: memref<32x128xbf16, #tpu.memory_space<vmem>>, %arg7: memref<32x128xf32, #tpu.memory_space<vmem>>) attributes {dimension_semantics = [#tpu.dimension_semantics<parallel>, #tpu.dimension_semantics<parallel>, #tpu.dimension_semantics<arbitrary>], iteration_bounds = array<i64: 1, 1, 1>, scalar_prefetch = 0 : i64, scratch_operands = 1 : i64, tpu.core_type = #tpu.core_type<tc>, window_params = [{transform_indices = @transform_0, window_bounds = array<i64: 32, 1024>}, {transform_indices = @transform_1, window_bounds = array<i64: 1024, 128>}, {transform_indices = @transform_2, window_bounds = array<i64: 1, 128>}, {transform_indices = @transform_3, window_bounds = array<i64: 32, 128>}]} {
    %c0_i32 = arith.constant 0 : i32
    %0 = arith.cmpi eq, %arg2, %c0_i32 : i32
    %1 = arith.extui %0 : i1 to i32
    %c0_i32_0 = arith.constant 0 : i32
    %2 = arith.cmpi ne, %1, %c0_i32_0 : i32
    scf.if %2 {
      %cst_10 = arith.constant 0.000000e+00 : f32
      %12 = vector.broadcast %cst_10 : f32 to vector<32x128xf32>
      %c0_11 = arith.constant 0 : index
      %c0_12 = arith.constant 0 : index
      %13 = vector.load %arg7[%c0_11, %c0_12] : memref<32x128xf32, #tpu.memory_space<vmem>>, vector<32x128xf32>
      tpu.vector_store %arg7[%c0_11, %c0_12], %12 {strides = array<i32>} : memref<32x128xf32, #tpu.memory_space<vmem>>, vector<32x128xf32>,
    } else {
    }
    %c0 = arith.constant 0 : index
    %c0_1 = arith.constant 0 : index
    %3 = vector.load %arg7[%c0, %c0_1] : memref<32x128xf32, #tpu.memory_space<vmem>>, vector<32x128xf32>
    %c0_2 = arith.constant 0 : index
    %c0_3 = arith.constant 0 : index
    %4 = vector.load %arg3[%c0_2, %c0_3] : memref<32x1024xbf16, #tpu.memory_space<vmem>>, vector<32x1024xbf16>
    %c0_4 = arith.constant 0 : index
    %c0_5 = arith.constant 0 : index
    %5 = vector.load %arg4[%c0_4, %c0_5] : memref<1024x128xbf16, #tpu.memory_space<vmem>>, vector<1024x128xbf16>
    %cst = arith.constant dense<0.000000e+00> : vector<32x128xf32>
    %6 = tpu.matmul %4, %5, %cst {dimension_numbers = #tpu.dot_dimension_numbers<[1], [0], [0], [1], [0, 0, 1, 1], [], []>} : vector<32x1024xbf16>, vector<1024x128xbf16>, vector<32x128xf32> -> vector<32x128xf32>
    %7 = arith.addf %3, %6 : vector<32x128xf32>
    %c0_6 = arith.constant 0 : index
    %c0_7 = arith.constant 0 : index
    %8 = vector.load %arg7[%c0_6, %c0_7] : memref<32x128xf32, #tpu.memory_space<vmem>>, vector<32x128xf32>
    tpu.vector_store %arg7[%c0_6, %c0_7], %7 {strides = array<i32>} : memref<32x128xf32, #tpu.memory_space<vmem>>, vector<32x128xf32>,
    %c0_i32_8 = arith.constant 0 : i32
    %9 = arith.cmpi eq, %arg2, %c0_i32_8 : i32
    %10 = arith.extui %9 : i1 to i32
    %c0_i32_9 = arith.constant 0 : i32
    %11 = arith.cmpi ne, %10, %c0_i32_9 : i32
    scf.if %11 {
      %c0_10 = arith.constant 0 : index
      %c0_11 = arith.constant 0 : index
      %12 = vector.load %arg7[%c0_10, %c0_11] : memref<32x128xf32, #tpu.memory_space<vmem>>, vector<32x128xf32>
      %cst_12 = arith.constant dense<0.000000e+00> : vector<128xf32>
      %13 = vector.multi_reduction <add>, %12, %cst_12 [0] : vector<32x128xf32> to vector<128xf32>
      %14 = vector.shape_cast %13 : vector<128xf32> to vector<1x128xf32>
      %cst_13 = arith.constant 3.125000e-02 : f32
      %15 = vector.broadcast %cst_13 : f32 to vector<1x128xf32>
      %16 = arith.mulf %14, %15 : vector<1x128xf32>
      %17 = arith.mulf %12, %12 : vector<32x128xf32>
      %cst_14 = arith.constant dense<0.000000e+00> : vector<128xf32>
      %18 = vector.multi_reduction <add>, %17, %cst_14 [0] : vector<32x128xf32> to vector<128xf32>
      %19 = vector.shape_cast %18 : vector<128xf32> to vector<1x128xf32>
      %cst_15 = arith.constant 3.125000e-02 : f32
      %20 = vector.broadcast %cst_15 : f32 to vector<1x128xf32>
      %21 = arith.mulf %19, %20 : vector<1x128xf32>
      %22 = arith.mulf %16, %16 : vector<1x128xf32>
      %23 = arith.subf %21, %22 : vector<1x128xf32>
      %cst_16 = arith.constant 0.000000e+00 : f32
      %24 = vector.broadcast %cst_16 : f32 to vector<1x128xf32>
      %25 = arith.maximumf %23, %24 : vector<1x128xf32>
      %cst_17 = arith.constant 9.99999974E-6 : f32
      %26 = vector.broadcast %cst_17 : f32 to vector<1x128xf32>
      %27 = arith.addf %25, %26 : vector<1x128xf32>
      %28 = math.rsqrt %27 : vector<1x128xf32>
      %29 = vector.broadcast %16 : vector<1x128xf32> to vector<32x128xf32>
      %30 = arith.subf %12, %29 : vector<32x128xf32>
      %31 = vector.broadcast %28 : vector<1x128xf32> to vector<32x128xf32>
      %32 = arith.mulf %30, %31 : vector<32x128xf32>
      %cst_18 = arith.constant 0.000000e+00 : f32
      %33 = vector.broadcast %cst_18 : f32 to vector<32x128xf32>
      %34 = arith.cmpf ogt, %32, %33 : vector<32x128xf32>
      %cst_19 = arith.constant 2.000000e-01 : f32
      %35 = vector.broadcast %cst_19 : f32 to vector<32x128xf32>
      %36 = arith.mulf %35, %32 : vector<32x128xf32>
      %37 = arith.select %34, %32, %36 : vector<32x128xi1>, vector<32x128xf32>
      %38 = arith.truncf %37 : vector<32x128xf32> to vector<32x128xbf16>
      %c0_20 = arith.constant 0 : index
      %c0_21 = arith.constant 0 : index
      %39 = vector.load %arg6[%c0_20, %c0_21] : memref<32x128xbf16, #tpu.memory_space<vmem>>, vector<32x128xbf16>
      tpu.vector_store %arg6[%c0_20, %c0_21], %38 {strides = array<i32>} : memref<32x128xbf16, #tpu.memory_space<vmem>>, vector<32x128xbf16>,
    } else {
    }
    return
  }
  func.func @transform_0(%arg0: i32, %arg1: i32, %arg2: i32) -> (i32, i32) {
    %c0_i32 = arith.constant 0 : i32
    return %arg0, %arg2 : i32, i32
  }
  func.func @transform_1(%arg0: i32, %arg1: i32, %arg2: i32) -> (i32, i32) {
    %c0_i32 = arith.constant 0 : i32
    return %arg2, %arg1 : i32, i32
  }
  func.func @transform_2(%arg0: i32, %arg1: i32, %arg2: i32) -> (i32, i32) {
    %c0_i32 = arith.constant 0 : i32
    %c0_i32_0 = arith.constant 0 : i32
    return %c0_i32, %arg1 : i32, i32
  }
  func.func @transform_3(%arg0: i32, %arg1: i32, %arg2: i32) -> (i32, i32) {
    %c0_i32 = arith.constant 0 : i32
    return %arg0, %arg1 : i32, i32
  }
}

module attributes {stable_mosaic.version = 11 : i64} {
  func.func @_conv_matmul_kernel(%arg0: i32, %arg1: i32, %arg2: i32, %arg3: memref<16x2048xbf16, #tpu.memory_space<vmem>>, %arg4: memref<2048x256xbf16, #tpu.memory_space<vmem>>, %arg5: memref<1x256xf32, #tpu.memory_space<vmem>>, %arg6: memref<16x256xbf16, #tpu.memory_space<vmem>>, %arg7: memref<16x256xf32, #tpu.memory_space<vmem>>) attributes {dimension_semantics = [#tpu.dimension_semantics<parallel>, #tpu.dimension_semantics<parallel>, #tpu.dimension_semantics<arbitrary>], iteration_bounds = array<i64: 1, 1, 1>, scalar_prefetch = 0 : i64, scratch_operands = 1 : i64, tpu.core_type = #tpu.core_type<tc>, window_params = [{transform_indices = @transform_0, window_bounds = array<i64: 16, 2048>}, {transform_indices = @transform_1, window_bounds = array<i64: 2048, 256>}, {transform_indices = @transform_2, window_bounds = array<i64: 1, 256>}, {transform_indices = @transform_3, window_bounds = array<i64: 16, 256>}]} {
    %c0_i32 = arith.constant 0 : i32
    %0 = arith.cmpi eq, %arg2, %c0_i32 : i32
    %1 = arith.extui %0 : i1 to i32
    %c0_i32_0 = arith.constant 0 : i32
    %2 = arith.cmpi ne, %1, %c0_i32_0 : i32
    scf.if %2 {
      %cst_10 = arith.constant 0.000000e+00 : f32
      %12 = vector.broadcast %cst_10 : f32 to vector<16x256xf32>
      %c0_11 = arith.constant 0 : index
      %c0_12 = arith.constant 0 : index
      %13 = vector.load %arg7[%c0_11, %c0_12] : memref<16x256xf32, #tpu.memory_space<vmem>>, vector<16x256xf32>
      tpu.vector_store %arg7[%c0_11, %c0_12], %12 {strides = array<i32>} : memref<16x256xf32, #tpu.memory_space<vmem>>, vector<16x256xf32>,
    } else {
    }
    %c0 = arith.constant 0 : index
    %c0_1 = arith.constant 0 : index
    %3 = vector.load %arg7[%c0, %c0_1] : memref<16x256xf32, #tpu.memory_space<vmem>>, vector<16x256xf32>
    %c0_2 = arith.constant 0 : index
    %c0_3 = arith.constant 0 : index
    %4 = vector.load %arg3[%c0_2, %c0_3] : memref<16x2048xbf16, #tpu.memory_space<vmem>>, vector<16x2048xbf16>
    %c0_4 = arith.constant 0 : index
    %c0_5 = arith.constant 0 : index
    %5 = vector.load %arg4[%c0_4, %c0_5] : memref<2048x256xbf16, #tpu.memory_space<vmem>>, vector<2048x256xbf16>
    %cst = arith.constant dense<0.000000e+00> : vector<16x256xf32>
    %6 = tpu.matmul %4, %5, %cst {dimension_numbers = #tpu.dot_dimension_numbers<[1], [0], [0], [1], [0, 0, 1, 1], [], []>} : vector<16x2048xbf16>, vector<2048x256xbf16>, vector<16x256xf32> -> vector<16x256xf32>
    %7 = arith.addf %3, %6 : vector<16x256xf32>
    %c0_6 = arith.constant 0 : index
    %c0_7 = arith.constant 0 : index
    %8 = vector.load %arg7[%c0_6, %c0_7] : memref<16x256xf32, #tpu.memory_space<vmem>>, vector<16x256xf32>
    tpu.vector_store %arg7[%c0_6, %c0_7], %7 {strides = array<i32>} : memref<16x256xf32, #tpu.memory_space<vmem>>, vector<16x256xf32>,
    %c0_i32_8 = arith.constant 0 : i32
    %9 = arith.cmpi eq, %arg2, %c0_i32_8 : i32
    %10 = arith.extui %9 : i1 to i32
    %c0_i32_9 = arith.constant 0 : i32
    %11 = arith.cmpi ne, %10, %c0_i32_9 : i32
    scf.if %11 {
      %c0_10 = arith.constant 0 : index
      %c0_11 = arith.constant 0 : index
      %12 = vector.load %arg7[%c0_10, %c0_11] : memref<16x256xf32, #tpu.memory_space<vmem>>, vector<16x256xf32>
      %cst_12 = arith.constant dense<0.000000e+00> : vector<256xf32>
      %13 = vector.multi_reduction <add>, %12, %cst_12 [0] : vector<16x256xf32> to vector<256xf32>
      %14 = vector.shape_cast %13 : vector<256xf32> to vector<1x256xf32>
      %cst_13 = arith.constant 1.250000e-01 : f32
      %15 = vector.broadcast %cst_13 : f32 to vector<1x256xf32>
      %16 = arith.mulf %14, %15 : vector<1x256xf32>
      %17 = arith.mulf %12, %12 : vector<16x256xf32>
      %cst_14 = arith.constant dense<0.000000e+00> : vector<256xf32>
      %18 = vector.multi_reduction <add>, %17, %cst_14 [0] : vector<16x256xf32> to vector<256xf32>
      %19 = vector.shape_cast %18 : vector<256xf32> to vector<1x256xf32>
      %cst_15 = arith.constant 1.250000e-01 : f32
      %20 = vector.broadcast %cst_15 : f32 to vector<1x256xf32>
      %21 = arith.mulf %19, %20 : vector<1x256xf32>
      %22 = arith.mulf %16, %16 : vector<1x256xf32>
      %23 = arith.subf %21, %22 : vector<1x256xf32>
      %cst_16 = arith.constant 0.000000e+00 : f32
      %24 = vector.broadcast %cst_16 : f32 to vector<1x256xf32>
      %25 = arith.maximumf %23, %24 : vector<1x256xf32>
      %cst_17 = arith.constant 9.99999974E-6 : f32
      %26 = vector.broadcast %cst_17 : f32 to vector<1x256xf32>
      %27 = arith.addf %25, %26 : vector<1x256xf32>
      %28 = math.rsqrt %27 : vector<1x256xf32>
      %29 = vector.broadcast %16 : vector<1x256xf32> to vector<16x256xf32>
      %30 = arith.subf %12, %29 : vector<16x256xf32>
      %31 = vector.broadcast %28 : vector<1x256xf32> to vector<16x256xf32>
      %32 = arith.mulf %30, %31 : vector<16x256xf32>
      %cst_18 = arith.constant 0.000000e+00 : f32
      %33 = vector.broadcast %cst_18 : f32 to vector<16x256xf32>
      %34 = arith.cmpf ogt, %32, %33 : vector<16x256xf32>
      %cst_19 = arith.constant 2.000000e-01 : f32
      %35 = vector.broadcast %cst_19 : f32 to vector<16x256xf32>
      %36 = arith.mulf %35, %32 : vector<16x256xf32>
      %37 = arith.select %34, %32, %36 : vector<16x256xi1>, vector<16x256xf32>
      %38 = arith.truncf %37 : vector<16x256xf32> to vector<16x256xbf16>
      %c0_20 = arith.constant 0 : index
      %c0_21 = arith.constant 0 : index
      %39 = vector.load %arg6[%c0_20, %c0_21] : memref<16x256xbf16, #tpu.memory_space<vmem>>, vector<16x256xbf16>
      tpu.vector_store %arg6[%c0_20, %c0_21], %38 {strides = array<i32>} : memref<16x256xbf16, #tpu.memory_space<vmem>>, vector<16x256xbf16>,
    } else {
    }
    return
  }
  func.func @transform_0(%arg0: i32, %arg1: i32, %arg2: i32) -> (i32, i32) {
    %c0_i32 = arith.constant 0 : i32
    return %arg0, %arg2 : i32, i32
  }
  func.func @transform_1(%arg0: i32, %arg1: i32, %arg2: i32) -> (i32, i32) {
    %c0_i32 = arith.constant 0 : i32
    return %arg2, %arg1 : i32, i32
  }
  func.func @transform_2(%arg0: i32, %arg1: i32, %arg2: i32) -> (i32, i32) {
    %c0_i32 = arith.constant 0 : i32
    %c0_i32_0 = arith.constant 0 : i32
    return %c0_i32, %arg1 : i32, i32
  }
  func.func @transform_3(%arg0: i32, %arg1: i32, %arg2: i32) -> (i32, i32) {
    %c0_i32 = arith.constant 0 : i32
    return %arg0, %arg1 : i32, i32
  }
}

module attributes {stable_mosaic.version = 11 : i64} {
  func.func @_conv_matmul_kernel(%arg0: i32, %arg1: i32, %arg2: i32, %arg3: memref<16x4096xbf16, #tpu.memory_space<vmem>>, %arg4: memref<4096x128xbf16, #tpu.memory_space<vmem>>, %arg5: memref<1x128xf32, #tpu.memory_space<vmem>>, %arg6: memref<16x128xf32, #tpu.memory_space<vmem>>, %arg7: memref<16x128xf32, #tpu.memory_space<vmem>>) attributes {dimension_semantics = [#tpu.dimension_semantics<parallel>, #tpu.dimension_semantics<parallel>, #tpu.dimension_semantics<arbitrary>], iteration_bounds = array<i64: 1, 1, 1>, scalar_prefetch = 0 : i64, scratch_operands = 1 : i64, tpu.core_type = #tpu.core_type<tc>, window_params = [{transform_indices = @transform_0, window_bounds = array<i64: 16, 4096>}, {transform_indices = @transform_1, window_bounds = array<i64: 4096, 128>}, {transform_indices = @transform_2, window_bounds = array<i64: 1, 128>}, {transform_indices = @transform_3, window_bounds = array<i64: 16, 128>}]} {
    %c0_i32 = arith.constant 0 : i32
    %0 = arith.cmpi eq, %arg2, %c0_i32 : i32
    %1 = arith.extui %0 : i1 to i32
    %c0_i32_0 = arith.constant 0 : i32
    %2 = arith.cmpi ne, %1, %c0_i32_0 : i32
    scf.if %2 {
      %c0_10 = arith.constant 0 : index
      %c0_11 = arith.constant 0 : index
      %12 = vector.load %arg5[%c0_10, %c0_11] : memref<1x128xf32, #tpu.memory_space<vmem>>, vector<1x128xf32>
      %13 = vector.shape_cast %12 : vector<1x128xf32> to vector<1x128xf32>
      %14 = vector.broadcast %13 : vector<1x128xf32> to vector<16x128xf32>
      %c0_12 = arith.constant 0 : index
      %c0_13 = arith.constant 0 : index
      %15 = vector.load %arg7[%c0_12, %c0_13] : memref<16x128xf32, #tpu.memory_space<vmem>>, vector<16x128xf32>
      tpu.vector_store %arg7[%c0_12, %c0_13], %14 {strides = array<i32>} : memref<16x128xf32, #tpu.memory_space<vmem>>, vector<16x128xf32>,
    } else {
    }
    %c0 = arith.constant 0 : index
    %c0_1 = arith.constant 0 : index
    %3 = vector.load %arg7[%c0, %c0_1] : memref<16x128xf32, #tpu.memory_space<vmem>>, vector<16x128xf32>
    %c0_2 = arith.constant 0 : index
    %c0_3 = arith.constant 0 : index
    %4 = vector.load %arg3[%c0_2, %c0_3] : memref<16x4096xbf16, #tpu.memory_space<vmem>>, vector<16x4096xbf16>
    %c0_4 = arith.constant 0 : index
    %c0_5 = arith.constant 0 : index
    %5 = vector.load %arg4[%c0_4, %c0_5] : memref<4096x128xbf16, #tpu.memory_space<vmem>>, vector<4096x128xbf16>
    %cst = arith.constant dense<0.000000e+00> : vector<16x128xf32>
    %6 = tpu.matmul %4, %5, %cst {dimension_numbers = #tpu.dot_dimension_numbers<[1], [0], [0], [1], [0, 0, 1, 1], [], []>} : vector<16x4096xbf16>, vector<4096x128xbf16>, vector<16x128xf32> -> vector<16x128xf32>
    %7 = arith.addf %3, %6 : vector<16x128xf32>
    %c0_6 = arith.constant 0 : index
    %c0_7 = arith.constant 0 : index
    %8 = vector.load %arg7[%c0_6, %c0_7] : memref<16x128xf32, #tpu.memory_space<vmem>>, vector<16x128xf32>
    tpu.vector_store %arg7[%c0_6, %c0_7], %7 {strides = array<i32>} : memref<16x128xf32, #tpu.memory_space<vmem>>, vector<16x128xf32>,
    %c0_i32_8 = arith.constant 0 : i32
    %9 = arith.cmpi eq, %arg2, %c0_i32_8 : i32
    %10 = arith.extui %9 : i1 to i32
    %c0_i32_9 = arith.constant 0 : i32
    %11 = arith.cmpi ne, %10, %c0_i32_9 : i32
    scf.if %11 {
      %c0_10 = arith.constant 0 : index
      %c0_11 = arith.constant 0 : index
      %12 = vector.load %arg7[%c0_10, %c0_11] : memref<16x128xf32, #tpu.memory_space<vmem>>, vector<16x128xf32>
      %13 = arith.negf %12 : vector<16x128xf32>
      %14 = math.exp %13 : vector<16x128xf32>
      %cst_12 = arith.constant 1.000000e+00 : f32
      %15 = vector.broadcast %cst_12 : f32 to vector<16x128xf32>
      %16 = arith.addf %15, %14 : vector<16x128xf32>
      %17 = arith.divf %15, %16 : vector<16x128xf32>
      %c0_13 = arith.constant 0 : index
      %c0_14 = arith.constant 0 : index
      %18 = vector.load %arg6[%c0_13, %c0_14] : memref<16x128xf32, #tpu.memory_space<vmem>>, vector<16x128xf32>
      tpu.vector_store %arg6[%c0_13, %c0_14], %17 {strides = array<i32>} : memref<16x128xf32, #tpu.memory_space<vmem>>, vector<16x128xf32>,
    } else {
    }
    return
  }
  func.func @transform_0(%arg0: i32, %arg1: i32, %arg2: i32) -> (i32, i32) {
    %c0_i32 = arith.constant 0 : i32
    return %arg0, %arg2 : i32, i32
  }
  func.func @transform_1(%arg0: i32, %arg1: i32, %arg2: i32) -> (i32, i32) {
    %c0_i32 = arith.constant 0 : i32
    return %arg2, %arg1 : i32, i32
  }
  func.func @transform_2(%arg0: i32, %arg1: i32, %arg2: i32) -> (i32, i32) {
    %c0_i32 = arith.constant 0 : i32
    %c0_i32_0 = arith.constant 0 : i32
    return %c0_i32, %arg1 : i32, i32
  }
  func.func @transform_3(%arg0: i32, %arg1: i32, %arg2: i32) -> (i32, i32) {
    %c0_i32 = arith.constant 0 : i32
    return %arg0, %arg1 : i32, i32
  }
}

</mosaic_0001>

<bundles_post_ra>
// kernel: patchgan_forward.4
= control target key start
LH: loop header
LB: loop body
LE: loop exit
PB: predicated region body
PF: predicated region fallthrough
CT: control target
= control target key end

     0   :  { %s759_s1 = inlined_call_operand.vmem [shape: bf16[128,128], index: 1, kind: input, shape index: {}]   ;;  %s760_s0 = inlined_call_operand.vmem [shape: bf16[128,128], index: 0, kind: input, shape index: {}]   ;;  %s761_s2 = inlined_call_operand.vmem [shape: f32[1,128], index: 2, kind: input, shape index: {}]   ;;  %s762_s3 = inlined_call_operand.vmem [shape: bf16[128,128], index: 3, kind: output, shape index: {}]  }
   0x1   :  { %v626_v0 = vld [vmem:[%s759_s1] sm:$0xff]   ;;  %v627_v1 = vld [vmem:[%s759_s1 + $0x8] sm:$0xff]   ;;  %v628_v2 = vld [vmem:[%s759_s1 + $0x10] sm:$0xff]  }
   0x2   :  { %578 = vmatprep.subr.bf16.mxu0 %v626_v0  ;;  %610 = vmatprep.subr.bf16.mxu1 %v626_v0  ;;  %v629_v3 = vld [vmem:[%s759_s1 + $0x18] sm:$0xff]   ;;  %v634_v4 = vld [vmem:[%s760_s0] sm:$0xff]   ;;  %v631_v7 = vld [vmem:[%s759_s1 + $0x28] sm:$0xff]  }
   0x3   :  { %579 = vmatpush3.bf16.msra.mxu0 %v626_v0  ;;  %618 = vmatpush3.bf16.msra.mxu1 %v626_v0  ;;  %v635_v5 = vld [vmem:[%s760_s0 + $0x20] sm:$0xff]   ;;  %v632_v8 = vld [vmem:[%s759_s1 + $0x30] sm:$0xff]   ;;  %v633_v9 = vld [vmem:[%s759_s1 + $0x38] sm:$0xff]  }
   0x4   :  { %580 = vmatprep.subr.bf16.mxu0 %v627_v1  ;;  %611 = vmatprep.subr.bf16.mxu1 %v627_v1  ;;  %v630_v6 = vld [vmem:[%s759_s1 + $0x20] sm:$0xff]   ;;  %v636_v10 = vld [vmem:[%s760_s0 + $0x8] sm:$0xff]   ;;  %v638_v12 = vld [vmem:[%s760_s0 + $0x10] sm:$0xff]  }
   0x5   :  { %594 = vmatprep.mubr.bf16.mxu0 %v634_v4  ;;  %602 = vmatprep.mubr.bf16.mxu1 %v635_v5  ;;  %v637_v11 = vld [vmem:[%s760_s0 + $0x28] sm:$0xff]   ;;  %v639_v13 = vld [vmem:[%s760_s0 + $0x30] sm:$0xff]   ;;  %v640_v14 = vld [vmem:[%s760_s0 + $0x18] sm:$0xff]  }
   0x6   :  { %v641_v15 = vld [vmem:[%s760_s0 + $0x38] sm:$0xff]   ;;  %v713_v16 = vld [vmem:[%s761_s2] ss:$0 sm:$0xff] }
   0x7   :  { %581 = vmatpush3.bf16.msra.mxu0 %v627_v1  ;;  %619 = vmatpush3.bf16.msra.mxu1 %v627_v1 }
   0x8   :  { %582 = vmatprep.subr.bf16.mxu0 %v628_v2  ;;  %612 = vmatprep.subr.bf16.mxu1 %v628_v2 }
   0xb   :  { %583 = vmatpush3.bf16.msra.mxu0 %v628_v2  ;;  %620 = vmatpush3.bf16.msra.mxu1 %v628_v2 }
   0xc   :  { %584 = vmatprep.subr.bf16.mxu0 %v629_v3  ;;  %613 = vmatprep.subr.bf16.mxu1 %v629_v3 }
   0xf   :  { %585 = vmatpush3.bf16.msra.mxu0 %v629_v3  ;;  %621 = vmatpush3.bf16.msra.mxu1 %v629_v3 }
  0x10   :  { %586 = vmatprep.subr.bf16.mxu0 %v630_v6  ;;  %614 = vmatprep.subr.bf16.mxu1 %v630_v6 }
  0x13   :  { %587 = vmatpush3.bf16.msra.mxu0 %v630_v6  ;;  %622 = vmatpush3.bf16.msra.mxu1 %v630_v6 }
  0x14   :  { %588 = vmatprep.subr.bf16.mxu0 %v631_v7  ;;  %615 = vmatprep.subr.bf16.mxu1 %v631_v7 }
  0x17   :  { %589 = vmatpush3.bf16.msra.mxu0 %v631_v7  ;;  %623 = vmatpush3.bf16.msra.mxu1 %v631_v7 }
  0x18   :  { %590 = vmatprep.subr.bf16.mxu0 %v632_v8  ;;  %616 = vmatprep.subr.bf16.mxu1 %v632_v8 }
  0x1b   :  { %591 = vmatpush3.bf16.msra.mxu0 %v632_v8  ;;  %624 = vmatpush3.bf16.msra.mxu1 %v632_v8 }
  0x1c   :  { %592 = vmatprep.subr.bf16.mxu0 %v633_v9  ;;  %617 = vmatprep.subr.bf16.mxu1 %v633_v9 }
  0x1f   :  { %593 = vmatpush3.bf16.msra.mxu0 %v633_v9  ;;  %625 = vmatpush3.bf16.msra.mxu1 %v633_v9 }
  0x22   :  { %595 = vmatmul.mubr.bf16.vlgmr.msra.gmra.mrb[0].mxu0 %v636_v10  ;;  %603 = vmatmul.mubr.bf16.vlgmr.msra.gmra.mrb[0].mxu1 %v637_v11 }
  0x23   :  { %598 = vmatprep.mubr.bf16.mxu0 %v638_v12  ;;  %606 = vmatprep.mubr.bf16.mxu1 %v639_v13 }
  0x2a   :  { %599 = vmatmul.mubr.bf16.gmra.mrb[4].mxu0 %v640_v14  ;;  %607 = vmatmul.mubr.bf16.gmra.mrb[4].mxu1 %v641_v15 }
  0xf5   :  { %v596_v17 = vpop.f32.mrb[0].mxu0  ;;  %v604_v18 = vpop.f32.mrb[0].mxu1 }
  0xf6   :  { %v285_v19 = vadd.f32 %v596_v17, %v713_v16  ;;  %v293_v20 = vadd.f32 %v604_v18, %v713_v16  ;;  %v220_v21 = vpop.f32.mrb[1].mxu0  ;;  %v252_v22 = vpop.f32.mrb[1].mxu1 }
  0xf7   :  { %v283_v23 = vadd.f32 %v713_v16, %v220_v21  ;;  %v291_v24 = vadd.f32 %v713_v16, %v252_v22  ;;  %v597_v25 = vpop.f32.mrb[2].mxu0  ;;  %v605_v26 = vpop.f32.mrb[2].mxu1 }
  0xf8   :  { %vm336_vm0 = vcmp.gt.f32.partialorder %v285_v19, 0.0  ;;  %v352_v27 = vmul.f32 0.2, %v285_v19  ;;  %vm344_vm1 = vcmp.gt.f32.partialorder %v293_v20, 0.0  ;;  %v360_v28 = vmul.f32 0.2, %v293_v20 }
  0xf9   :  { %vm334_vm2 = vcmp.gt.f32.partialorder %v283_v23, 0.0  ;;  %v350_v29 = vmul.f32 0.2, %v283_v23  ;;  %vm342_vm3 = vcmp.gt.f32.partialorder %v291_v24, 0.0  ;;  %v358_v30 = vmul.f32 0.2, %v291_v24 }
  0xfa   :  { %v286_v31 = vadd.f32 %v597_v25, %v713_v16  ;;  %v294_v32 = vadd.f32 %v605_v26, %v713_v16  ;;  %v223_v33 = vpop.f32.mrb[3].mxu0  ;;  %v255_v34 = vpop.f32.mrb[3].mxu1  ;;  %v368_v35 = vsel %vm336_vm0, %v285_v19, %v352_v27  ;;  %v376_v36 = vsel %vm344_vm1, %v293_v20, %v360_v28 }
  0xfb   :  { %v284_v37 = vadd.f32 %v713_v16, %v223_v33  ;;  %v292_v38 = vadd.f32 %v713_v16, %v255_v34  ;;  %v366_v43 = vsel %vm334_vm2, %v283_v23, %v350_v29  ;;  %v374_v44 = vsel %vm342_vm3, %v291_v24, %v358_v30 }
  0xfc   :  { %vm337_vm4 = vcmp.gt.f32.partialorder %v286_v31, 0.0  ;;  %v353_v39 = vmul.f32 0.2, %v286_v31  ;;  %vm345_vm5 = vcmp.gt.f32.partialorder %v294_v32, 0.0  ;;  %v361_v40 = vmul.f32 0.2, %v294_v32 }
  0xfd   :  { %vm335_vm6 = vcmp.gt.f32.partialorder %v284_v37, 0.0  ;;  %v351_v41 = vmul.f32 0.2, %v284_v37  ;;  %vm343_vm7 = vcmp.gt.f32.partialorder %v292_v38, 0.0  ;;  %v359_v42 = vmul.f32 0.2, %v292_v38 }
  0xfe   :  { %v369_v45 = vsel %vm337_vm4, %v286_v31, %v353_v39  ;;  %v377_v46 = vsel %vm345_vm5, %v294_v32, %v361_v40  ;;  %v600_v47 = vpop.f32.mrb[4].mxu0  ;;  %v608_v48 = vpop.f32.mrb[4].mxu1 }
  0xff   :  { %v523_v49 = vpack.c.bf16 %v369_v45, %v368_v35  ;;  %v543_v50 = vpack.c.bf16 %v377_v46, %v376_v36  ;;  %v367_v51 = vsel %vm335_vm6, %v284_v37, %v351_v41  ;;  %v375_v52 = vsel %vm343_vm7, %v292_v38, %v359_v42  ;;  %v236_v53 = vpop.f32.mrb[5].mxu0  ;;  %v268_v54 = vpop.f32.mrb[5].mxu1 }
 0x100   :  { %v518_v55 = vpack.c.bf16 %v367_v51, %v366_v43  ;;  %v538_v56 = vpack.c.bf16 %v375_v52, %v374_v44  ;;  %v289_v57 = vadd.f32 %v600_v47, %v713_v16  ;;  %v297_v58 = vadd.f32 %v608_v48, %v713_v16  ;;  %v601_v59 = vpop.f32.mrb[6].mxu0  ;;  %v609_v60 = vpop.f32.mrb[6].mxu1 }
 0x101   :  { %555 = vst [vmem:[%s762_s3 + $0x8] sm:$0xff] %v523_v49   ;;  %559 = vst [vmem:[%s762_s3 + $0x28] sm:$0xff] %v543_v50   ;;  %v287_v61 = vadd.f32 %v713_v16, %v236_v53  ;;  %v295_v62 = vadd.f32 %v713_v16, %v268_v54  ;;  %v290_v63 = vadd.f32 %v601_v59, %v713_v16  ;;  %v239_v1 = vpop.f32.mrb[7].mxu0  ;;  %v271_v2 = vpop.f32.mrb[7].mxu1 }
 0x102   :  { %v298_v0 = vadd.f32 %v609_v60, %v713_v16  ;;  %519 = vst [vmem:[%s762_s3] sm:$0xff] %v518_v55   ;;  %558 = vst [vmem:[%s762_s3 + $0x20] sm:$0xff] %v538_v56   ;;  %v356_v3 = vmul.f32 0.2, %v289_v57  ;;  %vm340_vm8 = vcmp.gt.f32.partialorder %v289_v57, 0.0  ;;  %v364_v4 = vmul.f32 0.2, %v297_v58 }
 0x103   :  { %vm348_vm9 = vcmp.gt.f32.partialorder %v297_v58, 0.0  ;;  %vm338_vm10 = vcmp.gt.f32.partialorder %v287_v61, 0.0  ;;  %vm341_vm11 = vcmp.gt.f32.partialorder %v290_v63, 0.0  ;;  %v357_v5 = vmul.f32 0.2, %v290_v63 }
 0x104   :  { %v354_v6 = vmul.f32 0.2, %v287_v61  ;;  %vm346_vm12 = vcmp.gt.f32.partialorder %v295_v62, 0.0  ;;  %vm349_vm13 = vcmp.gt.f32.partialorder %v298_v0, 0.0  ;;  %v365_v7 = vmul.f32 0.2, %v298_v0 }
 0x105   :  { %v372_v8 = vsel %vm340_vm8, %v289_v57, %v356_v3  ;;  %v373_v9 = vsel %vm341_vm11, %v290_v63, %v357_v5  ;;  %v288_v10 = vadd.f32 %v713_v16, %v239_v1  ;;  %v296_v11 = vadd.f32 %v713_v16, %v271_v2 }
 0x106   :  { %v380_v12 = vsel %vm348_vm9, %v297_v58, %v364_v4  ;;  %v362_v13 = vmul.f32 0.2, %v295_v62  ;;  %v533_v14 = vpack.c.bf16 %v373_v9, %v372_v8  ;;  %v381_v15 = vsel %vm349_vm13, %v298_v0, %v365_v7 }
 0x107   :  { %v553_v17 = vpack.c.bf16 %v381_v15, %v380_v12  ;;  %vm339_vm14 = vcmp.gt.f32.partialorder %v288_v10, 0.0  ;;  %v355_v18 = vmul.f32 0.2, %v288_v10  ;;  %vm347_vm15 = vcmp.gt.f32.partialorder %v296_v11, 0.0 }
 0x108   :  { %557 = vst [vmem:[%s762_s3 + $0x18] sm:$0xff] %v533_v14   ;;  %v363_v19 = vmul.f32 0.2, %v296_v11  ;;  %v370_v20 = vsel %vm338_vm10, %v287_v61, %v354_v6  ;;  %v378_v21 = vsel %vm346_vm12, %v295_v62, %v362_v13 }
 0x109   :  { %561 = vst [vmem:[%s762_s3 + $0x38] sm:$0xff] %v553_v17   ;;  %v371_v16 = vsel %vm339_vm14, %v288_v10, %v355_v18 }
 0x10a   :  { %v528_v22 = vpack.c.bf16 %v371_v16, %v370_v20  ;;  %v379_v23 = vsel %vm347_vm15, %v296_v11, %v363_v19 }
 0x10b   :  { %v548_v24 = vpack.c.bf16 %v379_v23, %v378_v21 }
 0x10c   :  { %556 = vst [vmem:[%s762_s3 + $0x10] sm:$0xff] %v528_v22  }
 0x10d   :  { %560 = vst [vmem:[%s762_s3 + $0x30] sm:$0xff] %v548_v24  }

// kernel: patchgan_forward.5
= control target key start
LH: loop header
LB: loop body
LE: loop exit
PB: predicated region body
PF: predicated region fallthrough
CT: control target
= control target key end

     0   :  { %s1462_s1 = inlined_call_operand.vmem [shape: bf16[1024,128], index: 1, kind: input, shape index: {}]   ;;  %s1463_s2 = inlined_call_operand.vmem [shape: f32[1,128], index: 2, kind: input, shape index: {}]   ;;  %s1464_s0 = inlined_call_operand.vmem [shape: bf16[32,1024], index: 0, kind: input, shape index: {}]   ;;  %s1465_s3 = inlined_call_operand.vmem [shape: bf16[32,128], index: 3, kind: output, shape index: {}]  }
   0x1   :  { %v1130_v0 = vld [vmem:[%s1462_s1 + $0x40] sm:$0xff]   ;;  %v1134_v4 = vld [vmem:[%s1462_s1 + $0x48] sm:$0xff]   ;;  %v1138_v8 = vld [vmem:[%s1462_s1 + $0x50] sm:$0xff]  }
   0x2   :  { %v1131_v1 = vld [vmem:[%s1462_s1 + $0xc0] sm:$0xff]   ;;  %1018 = vmatprep.subr.bf16.mxu0 %v1130_v0  ;;  %v1135_v5 = vld [vmem:[%s1462_s1 + $0xc8] sm:$0xff]   ;;  %v1139_v9 = vld [vmem:[%s1462_s1 + $0xd0] sm:$0xff]  }
   0x3   :  { %v1132_v2 = vld [vmem:[%s1462_s1] sm:$0xff]   ;;  %1046 = vmatprep.subr.bf16.mxu1 %v1131_v1  ;;  %v1136_v6 = vld [vmem:[%s1462_s1 + $0x8] sm:$0xff]   ;;  %v1140_v10 = vld [vmem:[%s1462_s1 + $0x10] sm:$0xff]  }
   0x4   :  { %v1133_v3 = vld [vmem:[%s1462_s1 + $0x80] sm:$0xff]   ;;  %1019 = vmatpush3.bf16.msra.mxu0 %v1132_v2  ;;  %v1137_v7 = vld [vmem:[%s1462_s1 + $0x88] sm:$0xff]   ;;  %v1141_v11 = vld [vmem:[%s1462_s1 + $0x90] sm:$0xff]  }
   0x5   :  { %1047 = vmatpush3.bf16.msra.mxu1 %v1133_v3  ;;  %1020 = vmatprep.subr.bf16.mxu0 %v1134_v4  ;;  %v1142_v12 = vld [vmem:[%s1462_s1 + $0x58] sm:$0xff]   ;;  %v1146_v16 = vld [vmem:[%s1462_s1 + $0x60] sm:$0xff]   ;;  %v1150_v20 = vld [vmem:[%s1462_s1 + $0x68] sm:$0xff]  }
   0x6   :  { %1048 = vmatprep.subr.bf16.mxu1 %v1135_v5  ;;  %v1143_v13 = vld [vmem:[%s1462_s1 + $0xd8] sm:$0xff]   ;;  %v1147_v17 = vld [vmem:[%s1462_s1 + $0xe0] sm:$0xff]   ;;  %v1151_v21 = vld [vmem:[%s1462_s1 + $0xe8] sm:$0xff]  }
   0x7   :  { %v1144_v14 = vld [vmem:[%s1462_s1 + $0x18] sm:$0xff]   ;;  %v1148_v18 = vld [vmem:[%s1462_s1 + $0x20] sm:$0xff]   ;;  %v1152_v22 = vld [vmem:[%s1462_s1 + $0x28] sm:$0xff]  }
   0x8   :  { %1021 = vmatpush3.bf16.msra.mxu0 %v1136_v6  ;;  %v1145_v15 = vld [vmem:[%s1462_s1 + $0x98] sm:$0xff]   ;;  %v1149_v19 = vld [vmem:[%s1462_s1 + $0xa0] sm:$0xff]   ;;  %v1153_v23 = vld [vmem:[%s1462_s1 + $0xa8] sm:$0xff]  }
   0x9   :  { %1049 = vmatpush3.bf16.msra.mxu1 %v1137_v7  ;;  %1022 = vmatprep.subr.bf16.mxu0 %v1138_v8  ;;  %v1154_v24 = vld [vmem:[%s1462_s1 + $0x70] sm:$0xff]   ;;  %v1158_v28 = vld [vmem:[%s1462_s1 + $0x78] sm:$0xff]   ;;  %v27_v32 = vld [vmem:[%s1464_s0] sm:$0xff] }
   0xa   :  { %1050 = vmatprep.subr.bf16.mxu1 %v1139_v9  ;;  %v1155_v25 = vld [vmem:[%s1462_s1 + $0xf0] sm:$0xff]   ;;  %v1159_v29 = vld [vmem:[%s1462_s1 + $0xf8] sm:$0xff]   ;;  %v31_v33 = vld [vmem:[%s1464_s0 + $0x20] sm:$0xff] }
   0xb   :  { %v1156_v26 = vld [vmem:[%s1462_s1 + $0x30] sm:$0xff]   ;;  %v1160_v30 = vld [vmem:[%s1462_s1 + $0x38] sm:$0xff]   ;;  %v28_v34 = vld [vmem:[%s1464_s0 + $0x8] sm:$0xff]  ;;  %v919_v35 = vcombine.low %v27_v32, %v31_v33  ;;  %v920_v36 = vcombine.high %v27_v32, %v31_v33 }
   0xc   :  { %1023 = vmatpush3.bf16.msra.mxu0 %v1140_v10  ;;  %v1157_v27 = vld [vmem:[%s1462_s1 + $0xb0] sm:$0xff]   ;;  %v1161_v31 = vld [vmem:[%s1462_s1 + $0xb8] sm:$0xff]   ;;  %v32_v37 = vld [vmem:[%s1464_s0 + $0x28] sm:$0xff] }
   0xd   :  { %1051 = vmatpush3.bf16.msra.mxu1 %v1141_v11  ;;  %1024 = vmatprep.subr.bf16.mxu0 %v1142_v12  ;;  %v921_v38 = vcombine.low %v28_v34, %v32_v37  ;;  %v922_v39 = vcombine.high %v28_v34, %v32_v37  ;;  %v1162_v40 = vld [vmem:[%s1462_s1 + $0x140] sm:$0xff]   ;;  %v1166_v44 = vld [vmem:[%s1462_s1 + $0x148] sm:$0xff]   ;;  %v1170_v48 = vld [vmem:[%s1462_s1 + $0x150] sm:$0xff]  }
   0xe   :  { %1052 = vmatprep.subr.bf16.mxu1 %v1143_v13  ;;  %667 = vmatprep.mubr.bf16.mxu0 %v920_v36  ;;  %v1163_v41 = vld [vmem:[%s1462_s1 + $0x1c0] sm:$0xff]   ;;  %v1167_v45 = vld [vmem:[%s1462_s1 + $0x1c8] sm:$0xff]   ;;  %v1171_v49 = vld [vmem:[%s1462_s1 + $0x1d0] sm:$0xff]  }
   0xf   :  { %716 = vmatprep.mubr.bf16.mxu1 %v922_v39  ;;  %v1164_v42 = vld [vmem:[%s1462_s1 + $0x100] sm:$0xff]   ;;  %v1168_v46 = vld [vmem:[%s1462_s1 + $0x108] sm:$0xff]   ;;  %v1172_v50 = vld [vmem:[%s1462_s1 + $0x110] sm:$0xff]  }
  0x10   :  { %1025 = vmatpush3.bf16.msra.mxu0 %v1144_v14  ;;  %v1165_v43 = vld [vmem:[%s1462_s1 + $0x180] sm:$0xff]   ;;  %v1169_v47 = vld [vmem:[%s1462_s1 + $0x188] sm:$0xff]   ;;  %v1173_v51 = vld [vmem:[%s1462_s1 + $0x190] sm:$0xff]  }
  0x11   :  { %1053 = vmatpush3.bf16.msra.mxu1 %v1145_v15  ;;  %1026 = vmatprep.subr.bf16.mxu0 %v1146_v16  ;;  %v1174_v52 = vld [vmem:[%s1462_s1 + $0x158] sm:$0xff]   ;;  %v1178_v56 = vld [vmem:[%s1462_s1 + $0x160] sm:$0xff]   ;;  %v36_v63 = vld [vmem:[%s1464_s0 + $0x48] sm:$0xff] }
  0x12   :  { %1054 = vmatprep.subr.bf16.mxu1 %v1147_v17  ;;  %v1175_v53 = vld [vmem:[%s1462_s1 + $0x1d8] sm:$0xff]   ;;  %v1179_v57 = vld [vmem:[%s1462_s1 + $0x1e0] sm:$0xff]   ;;  %v40_v0 = vld [vmem:[%s1464_s0 + $0x68] sm:$0xff] }
  0x13   :  { %v1176_v54 = vld [vmem:[%s1462_s1 + $0x118] sm:$0xff]   ;;  %v1180_v58 = vld [vmem:[%s1462_s1 + $0x120] sm:$0xff]   ;;  %v930_v2 = vcombine.high %v36_v63, %v40_v0  ;;  %v1182_v3 = vld [vmem:[%s1462_s1 + $0x168] sm:$0xff]   ;;  %v929_v4 = vcombine.low %v36_v63, %v40_v0 }
  0x14   :  { %1027 = vmatpush3.bf16.msra.mxu0 %v1148_v18  ;;  %v1177_v55 = vld [vmem:[%s1462_s1 + $0x198] sm:$0xff]   ;;  %v1181_v59 = vld [vmem:[%s1462_s1 + $0x1a0] sm:$0xff]   ;;  %v1183_v5 = vld [vmem:[%s1462_s1 + $0x1e8] sm:$0xff]  }
  0x15   :  { %1055 = vmatpush3.bf16.msra.mxu1 %v1149_v19  ;;  %1028 = vmatprep.subr.bf16.mxu0 %v1150_v20  ;;  %v35_v60 = vld [vmem:[%s1464_s0 + $0x40] sm:$0xff]  ;;  %v1184_v6 = vld [vmem:[%s1462_s1 + $0x128] sm:$0xff]   ;;  %v1186_v8 = vld [vmem:[%s1462_s1 + $0x170] sm:$0xff]  }
  0x16   :  { %1056 = vmatprep.subr.bf16.mxu1 %v1151_v21  ;;  %v39_v61 = vld [vmem:[%s1464_s0 + $0x60] sm:$0xff]  ;;  %v1185_v7 = vld [vmem:[%s1462_s1 + $0x1a8] sm:$0xff]   ;;  %v1187_v9 = vld [vmem:[%s1462_s1 + $0x1f0] sm:$0xff]  }
  0x17   :  { %v928_v62 = vcombine.high %v35_v60, %v39_v61  ;;  %v927_v1 = vcombine.low %v35_v60, %v39_v61  ;;  %v1188_v10 = vld [vmem:[%s1462_s1 + $0x130] sm:$0xff]   ;;  %v1190_v12 = vld [vmem:[%s1462_s1 + $0x178] sm:$0xff]  }
  0x18   :  { %1029 = vmatpush3.bf16.msra.mxu0 %v1152_v22  ;;  %v1189_v11 = vld [vmem:[%s1462_s1 + $0x1b0] sm:$0xff]   ;;  %v1191_v13 = vld [vmem:[%s1462_s1 + $0x1f8] sm:$0xff]  }
  0x19   :  { %1057 = vmatpush3.bf16.msra.mxu1 %v1153_v23  ;;  %1030 = vmatprep.subr.bf16.mxu0 %v1154_v24  ;;  %v1192_v14 = vld [vmem:[%s1462_s1 + $0x138] sm:$0xff]   ;;  %v29_v16 = vld [vmem:[%s1464_s0 + $0x10] sm:$0xff] }
  0x1a   :  { %1058 = vmatprep.subr.bf16.mxu1 %v1155_v25  ;;  %v1193_v15 = vld [vmem:[%s1462_s1 + $0x1b8] sm:$0xff]   ;;  %v33_v17 = vld [vmem:[%s1464_s0 + $0x30] sm:$0xff] }
  0x1b   :  { %v30_v18 = vld [vmem:[%s1464_s0 + $0x18] sm:$0xff]  ;;  %v923_v20 = vcombine.low %v29_v16, %v33_v17  ;;  %v924_v21 = vcombine.high %v29_v16, %v33_v17  ;;  %v37_v24 = vld [vmem:[%s1464_s0 + $0x50] sm:$0xff] }
  0x1c   :  { %1031 = vmatpush3.bf16.msra.mxu0 %v1156_v26  ;;  %v34_v19 = vld [vmem:[%s1464_s0 + $0x38] sm:$0xff]  ;;  %v41_v25 = vld [vmem:[%s1464_s0 + $0x70] sm:$0xff] }
  0x1d   :  { %1059 = vmatpush3.bf16.msra.mxu1 %v1157_v27  ;;  %1032 = vmatprep.subr.bf16.mxu0 %v1158_v28  ;;  %v925_v22 = vcombine.low %v30_v18, %v34_v19  ;;  %v926_v23 = vcombine.high %v30_v18, %v34_v19  ;;  %v38_v26 = vld [vmem:[%s1464_s0 + $0x58] sm:$0xff]  ;;  %v932_v27 = vcombine.high %v37_v24, %v41_v25 }
  0x1e   :  { %1060 = vmatprep.subr.bf16.mxu1 %v1159_v29  ;;  %v42_v28 = vld [vmem:[%s1464_s0 + $0x78] sm:$0xff] }
  0x1f   :  { %v934_v29 = vcombine.high %v38_v26, %v42_v28 }
  0x20   :  { %1033 = vmatpush3.bf16.msra.mxu0 %v1160_v30  ;;  %v931_v30 = vcombine.low %v37_v24, %v41_v25 }
  0x21   :  { %1061 = vmatpush3.bf16.msra.mxu1 %v1161_v31  ;;  %1074 = vmatprep.subr.bf16.mxu0 %v1162_v40  ;;  %v933_v31 = vcombine.low %v38_v26, %v42_v28 }
  0x22   :  { %1102 = vmatprep.subr.bf16.mxu1 %v1163_v41 }
  0x23   :  { %668 = vmatmul.mubr.bf16.vlgmr.msra.gmra.mrb[0].mxu0 %v919_v35 }
  0x24   :  { %717 = vmatmul.mubr.bf16.vlgmr.msra.gmra.mrb[0].mxu1 %v921_v38  ;;  %1075 = vmatpush3.bf16.msra.mxu0 %v1164_v42 }
  0x25   :  { %1103 = vmatpush3.bf16.msra.mxu1 %v1165_v43  ;;  %1076 = vmatprep.subr.bf16.mxu0 %v1166_v44 }
  0x26   :  { %1104 = vmatprep.subr.bf16.mxu1 %v1167_v45  ;;  %675 = vmatprep.mubr.bf16.mxu0 %v928_v62 }
  0x27   :  { %724 = vmatprep.mubr.bf16.mxu1 %v930_v2 }
  0x28   :  { %1077 = vmatpush3.bf16.msra.mxu0 %v1168_v46 }
  0x29   :  { %1105 = vmatpush3.bf16.msra.mxu1 %v1169_v47  ;;  %1078 = vmatprep.subr.bf16.mxu0 %v1170_v48 }
  0x2a   :  { %1106 = vmatprep.subr.bf16.mxu1 %v1171_v49 }
  0x2b   :  { %676 = vmatmul.mubr.bf16.gmra.mrb[4].mxu0 %v927_v1 }
  0x2c   :  { %1079 = vmatpush3.bf16.msra.mxu0 %v1172_v50  ;;  %725 = vmatmul.mubr.bf16.gmra.mrb[4].mxu1 %v929_v4 }
  0x2d   :  { %1107 = vmatpush3.bf16.msra.mxu1 %v1173_v51  ;;  %1080 = vmatprep.subr.bf16.mxu0 %v1174_v52 }
  0x2e   :  { %1108 = vmatprep.subr.bf16.mxu1 %v1175_v53  ;;  %765 = vmatprep.mubr.bf16.mxu0 %v924_v21 }
  0x2f   :  { %814 = vmatprep.mubr.bf16.mxu1 %v926_v23 }
  0x30   :  { %1081 = vmatpush3.bf16.msra.mxu0 %v1176_v54 }
  0x31   :  { %1109 = vmatpush3.bf16.msra.mxu1 %v1177_v55  ;;  %1082 = vmatprep.subr.bf16.mxu0 %v1178_v56 }
  0x32   :  { %1110 = vmatprep.subr.bf16.mxu1 %v1179_v57 }
  0x34   :  { %1083 = vmatpush3.bf16.msra.mxu0 %v1180_v58 }
  0x35   :  { %1111 = vmatpush3.bf16.msra.mxu1 %v1181_v59  ;;  %1084 = vmatprep.subr.bf16.mxu0 %v1182_v3 }
  0x36   :  { %1112 = vmatprep.subr.bf16.mxu1 %v1183_v5 }
  0x38   :  { %1085 = vmatpush3.bf16.msra.mxu0 %v1184_v6 }
  0x39   :  { %1113 = vmatpush3.bf16.msra.mxu1 %v1185_v7  ;;  %1086 = vmatprep.subr.bf16.mxu0 %v1186_v8 }
  0x3a   :  { %1114 = vmatprep.subr.bf16.mxu1 %v1187_v9 }
  0x3c   :  { %1087 = vmatpush3.bf16.msra.mxu0 %v1188_v10 }
  0x3d   :  { %1115 = vmatpush3.bf16.msra.mxu1 %v1189_v11  ;;  %1088 = vmatprep.subr.bf16.mxu0 %v1190_v12 }
  0x3e   :  { %1116 = vmatprep.subr.bf16.mxu1 %v1191_v13 }
  0x40   :  { %1089 = vmatpush3.bf16.msra.mxu0 %v1192_v14 }
  0x41   :  { %1117 = vmatpush3.bf16.msra.mxu1 %v1193_v15 }
  0x43   :  { %766 = vmatmul.mubr.bf16.vlgmr.msra.gmra.mrb[8].mxu0 %v923_v20 }
  0x44   :  { %815 = vmatmul.mubr.bf16.vlgmr.msra.gmra.mrb[8].mxu1 %v925_v22  ;;  %773 = vmatprep.mubr.bf16.mxu0 %v932_v27 }
  0x45   :  { %822 = vmatprep.mubr.bf16.mxu1 %v934_v29 }
  0x4b   :  { %774 = vmatmul.mubr.bf16.gmra.mrb[12].mxu0 %v931_v30 }
  0x4c   :  { %823 = vmatmul.mubr.bf16.gmra.mrb[12].mxu1 %v933_v31 }
  0xf6   :  { %v1034_v32 = vpop.f32.mrb[0].mxu0 }
  0xf7   :  { %v1062_v33 = vpop.f32.mrb[0].mxu1  ;;  %v1035_v34 = vpop.f32.mrb[1].mxu0 }
  0xf8   :  { %v1036_v35 = vadd.f32 %v1035_v34, %v1034_v32  ;;  %v1063_v36 = vpop.f32.mrb[1].mxu1  ;;  %v1037_v37 = vpop.f32.mrb[2].mxu0 }
  0xf9   :  { %v1064_v38 = vadd.f32 %v1063_v36, %v1062_v33  ;;  %v1065_v39 = vpop.f32.mrb[2].mxu1  ;;  %v1038_v40 = vpop.f32.mrb[3].mxu0 }
  0xfa   :  { %v1039_v41 = vadd.f32 %v1038_v40, %v1037_v37  ;;  %v1066_v42 = vpop.f32.mrb[3].mxu1 }
  0xfb   :  { %v719_v43 = vadd.f32 %v1064_v38, %v1036_v35  ;;  %v1067_v44 = vadd.f32 %v1066_v42, %v1065_v39 }
  0xfd   :  { %v722_v45 = vadd.f32 %v1067_v44, %v1039_v41 }
  0xfe   :  { %v1040_v46 = vpop.f32.mrb[4].mxu0 }
  0xff   :  { %v1068_v47 = vpop.f32.mrb[4].mxu1  ;;  %v1041_v48 = vpop.f32.mrb[5].mxu0 }
 0x100   :  { %v1042_v49 = vadd.f32 %v1041_v48, %v1040_v46  ;;  %v1069_v50 = vpop.f32.mrb[5].mxu1  ;;  %v1043_v51 = vpop.f32.mrb[6].mxu0 }
 0x101   :  { %v1070_v52 = vadd.f32 %v1069_v50, %v1068_v47  ;;  %v1071_v53 = vpop.f32.mrb[6].mxu1  ;;  %v1044_v54 = vpop.f32.mrb[7].mxu0 }
 0x102   :  { %v1045_v55 = vadd.f32 %v1044_v54, %v1043_v51  ;;  %v1072_v56 = vpop.f32.mrb[7].mxu1 }
 0x103   :  { %v727_v57 = vadd.f32 %v1070_v52, %v1042_v49  ;;  %v1073_v58 = vadd.f32 %v1072_v56, %v1071_v53 }
 0x105   :  { %v730_v59 = vadd.f32 %v1073_v58, %v1045_v55 }
 0x116   :  { %v1090_v60 = vpop.f32.mrb[8].mxu0 }
 0x117   :  { %v1118_v61 = vpop.f32.mrb[8].mxu1  ;;  %v1091_v62 = vpop.f32.mrb[9].mxu0 }
 0x118   :  { %v1119_v63 = vpop.f32.mrb[9].mxu1  ;;  %v1092_v0 = vadd.f32 %v1091_v62, %v1090_v60  ;;  %v1093_v2 = vpop.f32.mrb[10].mxu0 }
 0x119   :  { %v1120_v1 = vadd.f32 %v1119_v63, %v1118_v61  ;;  %v1121_v3 = vpop.f32.mrb[10].mxu1  ;;  %v1094_v4 = vpop.f32.mrb[11].mxu0 }
 0x11a   :  { %v1122_v5 = vpop.f32.mrb[11].mxu1  ;;  %v768_v6 = vadd.f32 %v1092_v0, %v719_v43  ;;  %v1095_v7 = vadd.f32 %v1094_v4, %v1093_v2 }
 0x11b   :  { %v1123_v8 = vadd.f32 %v1122_v5, %v1121_v3 }
 0x11c   :  { %v817_v9 = vadd.f32 %v1120_v1, %v768_v6  ;;  %v771_v10 = vadd.f32 %v1095_v7, %v722_v45 }
 0x11e   :  { %v820_v11 = vadd.f32 %v1123_v8, %v771_v10  ;;  %v1096_v12 = vpop.f32.mrb[12].mxu0  ;;  %v856_v14 = vmul.f32 %v817_v9, %v817_v9 }
 0x11f   :  { %v1124_v13 = vpop.f32.mrb[12].mxu1  ;;  %v1097_v15 = vpop.f32.mrb[13].mxu0 }
 0x120   :  { %v1125_v16 = vpop.f32.mrb[13].mxu1  ;;  %v846_v17 = vadd.f32 %v820_v11, %v817_v9  ;;  %v857_v18 = vmul.f32 %v820_v11, %v820_v11  ;;  %v1098_v19 = vadd.f32 %v1097_v15, %v1096_v12  ;;  %v1099_v21 = vpop.f32.mrb[14].mxu0 }
 0x121   :  { %v1126_v20 = vadd.f32 %v1125_v16, %v1124_v13  ;;  %v1127_v22 = vpop.f32.mrb[14].mxu1  ;;  %v1100_v23 = vpop.f32.mrb[15].mxu0 }
 0x122   :  { %v1128_v24 = vpop.f32.mrb[15].mxu1  ;;  %v860_v25 = vadd.f32 %v857_v18, %v856_v14  ;;  %v776_v26 = vadd.f32 %v1098_v19, %v727_v57  ;;  %v1101_v27 = vadd.f32 %v1100_v23, %v1099_v21 }
 0x123   :  { %v1129_v28 = vadd.f32 %v1128_v24, %v1127_v22 }
 0x124   :  { %v825_v29 = vadd.f32 %v1126_v20, %v776_v26  ;;  %v779_v30 = vadd.f32 %v1101_v27, %v730_v59 }
 0x126   :  { %v847_v31 = vadd.f32 %v846_v17, %v825_v29  ;;  %v858_v32 = vmul.f32 %v825_v29, %v825_v29  ;;  %v828_v33 = vadd.f32 %v1129_v28, %v779_v30 }
 0x128   :  { %v861_v34 = vadd.f32 %v860_v25, %v858_v32  ;;  %v848_v35 = vadd.f32 %v847_v31, %v828_v33  ;;  %v859_v36 = vmul.f32 %v828_v33, %v828_v33 }
 0x12a   :  { %v849_v37 = vrot.slane %v848_v35, 4  ;;  %v862_v38 = vadd.f32 %v861_v34, %v859_v36 }
 0x12c   :  { %v850_v39 = vadd.f32 %v849_v37, %v848_v35  ;;  %v863_v40 = vrot.slane %v862_v38, 4 }
 0x12e   :  { %v851_v41 = vrot.slane %v850_v39, 2  ;;  %v864_v42 = vadd.f32 %v863_v40, %v862_v38 }
 0x130   :  { %v852_v43 = vadd.f32 %v851_v41, %v850_v39  ;;  %v865_v44 = vrot.slane %v864_v42, 2 }
 0x132   :  { %v853_v45 = vrot.slane %v852_v43, 1  ;;  %v866_v46 = vadd.f32 %v865_v44, %v864_v42 }
 0x134   :  { %v854_v47 = vadd.f32 %v853_v45, %v852_v43  ;;  %v867_v48 = vrot.slane %v866_v46, 1 }
 0x136   :  { %v855_v49 = vmul.f32 0.03125, %v854_v47  ;;  %v868_v50 = vadd.f32 %v867_v48, %v866_v46 }
 0x138   :  { %v869_v51 = vmul.f32 0.03125, %v868_v50  ;;  %v870_v52 = vmul.f32 %v855_v49, %v855_v49  ;;  %v875_v53 = vsub.f32 %v817_v9, %v855_v49  ;;  %v876_v54 = vsub.f32 %v820_v11, %v855_v49 }
 0x139   :  { %v877_v55 = vsub.f32 %v825_v29, %v855_v49  ;;  %v878_v56 = vsub.f32 %v828_v33, %v855_v49 }
 0x13a   :  { %v871_v57 = vsub.f32 %v869_v51, %v870_v52 }
 0x13c   :  { %v872_v58 = vmax.f32 %v871_v57, 0.0 }
 0x13e   :  { %v873_v59 = vadd.f32 1e-05, %v872_v58 }
 0x140   :  { %1194 = vrsqrt.f32 %v873_v59 }
 0x14a   :  { %v1195_v60 = vpop.eup %1194 }
 0x14b   :  { %v879_v61 = vmul.f32 %v1195_v60, %v875_v53  ;;  %v880_v62 = vmul.f32 %v1195_v60, %v876_v54  ;;  %v881_v63 = vmul.f32 %v1195_v60, %v877_v55  ;;  %v882_v0 = vmul.f32 %v1195_v60, %v878_v56 }
 0x14d   :  { %vm883_vm0 = vcmp.gt.f32.partialorder %v879_v61, 0.0  ;;  %vm884_vm1 = vcmp.gt.f32.partialorder %v880_v62, 0.0  ;;  %vm885_vm2 = vcmp.gt.f32.partialorder %v881_v63, 0.0  ;;  %vm886_vm3 = vcmp.gt.f32.partialorder %v882_v0, 0.0 }
 0x14e   :  { %v887_v1 = vmul.f32 0.2, %v879_v61  ;;  %v888_v2 = vmul.f32 0.2, %v880_v62  ;;  %v889_v3 = vmul.f32 0.2, %v881_v63 }
 0x14f   :  { %v890_v4 = vmul.f32 0.2, %v882_v0 }
 0x150   :  { %v891_v5 = vsel %vm883_vm0, %v879_v61, %v887_v1  ;;  %v892_v6 = vsel %vm884_vm1, %v880_v62, %v888_v2  ;;  %v893_v7 = vsel %vm885_vm2, %v881_v63, %v889_v3 }
 0x151   :  { %v894_v8 = vsel %vm886_vm3, %v882_v0, %v890_v4  ;;  %v1010_v9 = vpack.c.bf16 %v892_v6, %v891_v5 }
 0x152   :  { %v1015_v10 = vpack.c.bf16 %v894_v8, %v893_v7 }
 0x153   :  { %1011 = vst [vmem:[%s1465_s3] sm:$0xff] %v1010_v9  }
 0x154   :  { %1017 = vst [vmem:[%s1465_s3 + $0x8] sm:$0xff] %v1015_v10  }

// kernel: patchgan_forward.6
= control target key start
LH: loop header
LB: loop body
LE: loop exit
PB: predicated region body
PF: predicated region fallthrough
CT: control target
= control target key end

     0   :  { %s3689_s1 = inlined_call_operand.vmem [shape: bf16[2048,256], index: 1, kind: input, shape index: {}]   ;;  %s3690_s2 = inlined_call_operand.vmem [shape: f32[1,256], index: 2, kind: input, shape index: {}]   ;;  %s3691_s0 = inlined_call_operand.vmem [shape: bf16[16,2048], index: 0, kind: input, shape index: {}]   ;;  %s3692_s3 = inlined_call_operand.vmem [shape: bf16[16,256], index: 3, kind: output, shape index: {}]  }
   0x1   :  { %v2405_v0 = vld [vmem:[%s3689_s1 + $0x4] ss:$8 sps:$4 sm:$0xff]   ;;  %v2409_v2 = vld [vmem:[%s3689_s1] ss:$8 sps:$4 sm:$0xff]   ;;  %v2411_v4 = vld [vmem:[%s3689_s1 + $0x14] ss:$8 sps:$4 sm:$0xff]  }
   0x2   :  { %v2407_v1 = vld [vmem:[%s3689_s1 + $0x404] ss:$8 sps:$4 sm:$0xff]   ;;  %1658 = vmatprep.subr.bf16.mxu1 %v2405_v0  ;;  %v2410_v3 = vld [vmem:[%s3689_s1 + $0x400] ss:$8 sps:$4 sm:$0xff]   ;;  %v2413_v5 = vld [vmem:[%s3689_s1 + $0x414] ss:$8 sps:$4 sm:$0xff]  }
   0x3   :  { %1830 = vmatprep.subr.bf16.mxu0 %v2407_v1  ;;  %1659 = vmatpush1.bf16.msra.mxu1 %v2409_v2  ;;  %v2415_v6 = vld [vmem:[%s3689_s1 + $0x10] ss:$8 sps:$4 sm:$0xff]   ;;  %v2417_v8 = vld [vmem:[%s3689_s1 + $0x24] ss:$8 sps:$4 sm:$0xff]   ;;  %v2421_v10 = vld [vmem:[%s3689_s1 + $0x20] ss:$8 sps:$4 sm:$0xff]  }
   0x4   :  { %1831 = vmatpush1.bf16.msra.mxu0 %v2410_v3  ;;  %1660 = vmatprep.subr.bf16.mxu1 %v2411_v4  ;;  %v2416_v7 = vld [vmem:[%s3689_s1 + $0x410] ss:$8 sps:$4 sm:$0xff]   ;;  %v2419_v9 = vld [vmem:[%s3689_s1 + $0x424] ss:$8 sps:$4 sm:$0xff]   ;;  %v2422_v11 = vld [vmem:[%s3689_s1 + $0x420] ss:$8 sps:$4 sm:$0xff]  }
   0x5   :  { %1832 = vmatprep.subr.bf16.mxu0 %v2413_v5  ;;  %v2423_v12 = vld [vmem:[%s3689_s1 + $0x34] ss:$8 sps:$4 sm:$0xff]   ;;  %v2427_v14 = vld [vmem:[%s3689_s1 + $0x30] ss:$8 sps:$4 sm:$0xff]   ;;  %v2429_v16 = vld [vmem:[%s3689_s1 + $0x44] ss:$8 sps:$4 sm:$0xff]  }
   0x6   :  { %v2425_v13 = vld [vmem:[%s3689_s1 + $0x434] ss:$8 sps:$4 sm:$0xff]   ;;  %v2428_v15 = vld [vmem:[%s3689_s1 + $0x430] ss:$8 sps:$4 sm:$0xff]   ;;  %v2431_v17 = vld [vmem:[%s3689_s1 + $0x444] ss:$8 sps:$4 sm:$0xff]  }
   0x7   :  { %1661 = vmatpush1.bf16.msra.mxu1 %v2415_v6  ;;  %v2433_v18 = vld [vmem:[%s3689_s1 + $0x40] ss:$8 sps:$4 sm:$0xff]   ;;  %v2435_v20 = vld [vmem:[%s3689_s1 + $0x54] ss:$8 sps:$4 sm:$0xff]   ;;  %v2439_v22 = vld [vmem:[%s3689_s1 + $0x50] ss:$8 sps:$4 sm:$0xff]  }
   0x8   :  { %1833 = vmatpush1.bf16.msra.mxu0 %v2416_v7  ;;  %1662 = vmatprep.subr.bf16.mxu1 %v2417_v8  ;;  %v2434_v19 = vld [vmem:[%s3689_s1 + $0x440] ss:$8 sps:$4 sm:$0xff]   ;;  %v2437_v21 = vld [vmem:[%s3689_s1 + $0x454] ss:$8 sps:$4 sm:$0xff]   ;;  %v2440_v23 = vld [vmem:[%s3689_s1 + $0x450] ss:$8 sps:$4 sm:$0xff]  }
   0x9   :  { %1834 = vmatprep.subr.bf16.mxu0 %v2419_v9  ;;  %v2441_v24 = vld [vmem:[%s3689_s1 + $0x64] ss:$8 sps:$4 sm:$0xff]   ;;  %v2445_v26 = vld [vmem:[%s3689_s1 + $0x60] ss:$8 sps:$4 sm:$0xff]   ;;  %v2447_v28 = vld [vmem:[%s3689_s1 + $0x74] ss:$8 sps:$4 sm:$0xff]  }
   0xa   :  { %v2443_v25 = vld [vmem:[%s3689_s1 + $0x464] ss:$8 sps:$4 sm:$0xff]   ;;  %v2446_v27 = vld [vmem:[%s3689_s1 + $0x460] ss:$8 sps:$4 sm:$0xff]   ;;  %v2449_v29 = vld [vmem:[%s3689_s1 + $0x474] ss:$8 sps:$4 sm:$0xff]  }
   0xb   :  { %1663 = vmatpush1.bf16.msra.mxu1 %v2421_v10  ;;  %v2451_v30 = vld [vmem:[%s3689_s1 + $0x70] ss:$8 sps:$4 sm:$0xff]   ;;  %v2453_v32 = vld [vmem:[%s3689_s1 + $0x84] ss:$8 sps:$4 sm:$0xff]   ;;  %v2457_v34 = vld [vmem:[%s3689_s1 + $0x80] ss:$8 sps:$4 sm:$0xff]  }
   0xc   :  { %1835 = vmatpush1.bf16.msra.mxu0 %v2422_v11  ;;  %1664 = vmatprep.subr.bf16.mxu1 %v2423_v12  ;;  %v2452_v31 = vld [vmem:[%s3689_s1 + $0x470] ss:$8 sps:$4 sm:$0xff]   ;;  %v2455_v33 = vld [vmem:[%s3689_s1 + $0x484] ss:$8 sps:$4 sm:$0xff]   ;;  %v2458_v35 = vld [vmem:[%s3689_s1 + $0x480] ss:$8 sps:$4 sm:$0xff]  }
   0xd   :  { %1836 = vmatprep.subr.bf16.mxu0 %v2425_v13  ;;  %v2459_v36 = vld [vmem:[%s3689_s1 + $0x94] ss:$8 sps:$4 sm:$0xff]   ;;  %v2463_v38 = vld [vmem:[%s3689_s1 + $0x90] ss:$8 sps:$4 sm:$0xff]   ;;  %v2465_v40 = vld [vmem:[%s3689_s1 + $0xa4] ss:$8 sps:$4 sm:$0xff]  }
   0xe   :  { %v2461_v37 = vld [vmem:[%s3689_s1 + $0x494] ss:$8 sps:$4 sm:$0xff]   ;;  %v2464_v39 = vld [vmem:[%s3689_s1 + $0x490] ss:$8 sps:$4 sm:$0xff]   ;;  %v2467_v41 = vld [vmem:[%s3689_s1 + $0x4a4] ss:$8 sps:$4 sm:$0xff]  }
   0xf   :  { %1665 = vmatpush1.bf16.msra.mxu1 %v2427_v14  ;;  %v2469_v42 = vld [vmem:[%s3689_s1 + $0xa0] ss:$8 sps:$4 sm:$0xff]   ;;  %v2471_v44 = vld [vmem:[%s3689_s1 + $0xb4] ss:$8 sps:$4 sm:$0xff]   ;;  %v2475_v46 = vld [vmem:[%s3689_s1 + $0xb0] ss:$8 sps:$4 sm:$0xff]  }
  0x10   :  { %1837 = vmatpush1.bf16.msra.mxu0 %v2428_v15  ;;  %1666 = vmatprep.subr.bf16.mxu1 %v2429_v16  ;;  %v2470_v43 = vld [vmem:[%s3689_s1 + $0x4a0] ss:$8 sps:$4 sm:$0xff]   ;;  %v2473_v45 = vld [vmem:[%s3689_s1 + $0x4b4] ss:$8 sps:$4 sm:$0xff]   ;;  %v2476_v47 = vld [vmem:[%s3689_s1 + $0x4b0] ss:$8 sps:$4 sm:$0xff]  }
  0x11   :  { %1838 = vmatprep.subr.bf16.mxu0 %v2431_v17  ;;  %v26_v48 = vld [vmem:[%s3691_s0] sm:$0xff]  ;;  %v2483_v58 = vld [vmem:[%s3689_s1 + $0xd4] ss:$8 sps:$4 sm:$0xff]   ;;  %v2487_v60 = vld [vmem:[%s3689_s1 + $0xd0] ss:$8 sps:$4 sm:$0xff]  }
  0x12   :  { %v34_v49 = vld [vmem:[%s3691_s0 + $0x40] sm:$0xff]  ;;  %v2485_v59 = vld [vmem:[%s3689_s1 + $0x4d4] ss:$8 sps:$4 sm:$0xff]   ;;  %v2488_v61 = vld [vmem:[%s3689_s1 + $0x4d0] ss:$8 sps:$4 sm:$0xff]  }
  0x13   :  { %1667 = vmatpush1.bf16.msra.mxu1 %v2433_v18  ;;  %v2477_v50 = vld [vmem:[%s3689_s1 + $0xc4] ss:$8 sps:$4 sm:$0xff]   ;;  %v2102_v52 = vcombine.high %v26_v48, %v34_v49  ;;  %v2481_v56 = vld [vmem:[%s3689_s1 + $0xc0] ss:$8 sps:$4 sm:$0xff]   ;;  %v2495_v2 = vld [vmem:[%s3689_s1 + $0xf4] ss:$8 sps:$4 sm:$0xff]   ;;  %v2101_v8 = vcombine.low %v26_v48, %v34_v49 }
  0x14   :  { %1839 = vmatpush1.bf16.msra.mxu0 %v2434_v19  ;;  %1668 = vmatprep.subr.bf16.mxu1 %v2435_v20  ;;  %v2479_v51 = vld [vmem:[%s3689_s1 + $0x4c4] ss:$8 sps:$4 sm:$0xff]   ;;  %v2482_v57 = vld [vmem:[%s3689_s1 + $0x4c0] ss:$8 sps:$4 sm:$0xff]   ;;  %v2497_v3 = vld [vmem:[%s3689_s1 + $0x4f4] ss:$8 sps:$4 sm:$0xff]  }
  0x15   :  { %1840 = vmatprep.subr.bf16.mxu0 %v2437_v21  ;;  %v30_v53 = vld [vmem:[%s3691_s0 + $0x20] sm:$0xff]  ;;  %1690 = vmatprep.mubr.bf16.mxu1 %v2102_v52  ;;  %v2499_v4 = vld [vmem:[%s3689_s1 + $0xf0] ss:$8 sps:$4 sm:$0xff]   ;;  %v2509_v12 = vld [vmem:[%s3689_s1 + $0x114] ss:$8 sps:$4 sm:$0xff]  }
  0x16   :  { %v38_v54 = vld [vmem:[%s3691_s0 + $0x60] sm:$0xff]  ;;  %v2500_v5 = vld [vmem:[%s3689_s1 + $0x4f0] ss:$8 sps:$4 sm:$0xff]   ;;  %v2512_v13 = vld [vmem:[%s3689_s1 + $0x514] ss:$8 sps:$4 sm:$0xff]  }
  0x17   :  { %1669 = vmatpush1.bf16.msra.mxu1 %v2439_v22  ;;  %v2110_v55 = vcombine.high %v30_v53, %v38_v54  ;;  %v2489_v62 = vld [vmem:[%s3689_s1 + $0xe4] ss:$8 sps:$4 sm:$0xff]   ;;  %v2493_v0 = vld [vmem:[%s3689_s1 + $0xe0] ss:$8 sps:$4 sm:$0xff]   ;;  %v2109_v10 = vcombine.low %v30_v53, %v38_v54  ;;  %v2507_v14 = vld [vmem:[%s3689_s1 + $0x110] ss:$8 sps:$4 sm:$0xff]  }
  0x18   :  { %1841 = vmatpush1.bf16.msra.mxu0 %v2440_v23  ;;  %1670 = vmatprep.subr.bf16.mxu1 %v2441_v24  ;;  %v2491_v63 = vld [vmem:[%s3689_s1 + $0x4e4] ss:$8 sps:$4 sm:$0xff]   ;;  %v2494_v1 = vld [vmem:[%s3689_s1 + $0x4e0] ss:$8 sps:$4 sm:$0xff]   ;;  %v2510_v15 = vld [vmem:[%s3689_s1 + $0x510] ss:$8 sps:$4 sm:$0xff]  }
  0x19   :  { %1842 = vmatprep.subr.bf16.mxu0 %v2443_v25  ;;  %1862 = vmatprep.mubr.bf16.mxu0 %v2110_v55  ;;  %v2503_v6 = vld [vmem:[%s3689_s1 + $0x104] ss:$8 sps:$4 sm:$0xff]   ;;  %v2501_v9 = vld [vmem:[%s3689_s1 + $0x100] ss:$8 sps:$4 sm:$0xff]   ;;  %v2521_v20 = vld [vmem:[%s3689_s1 + $0x134] ss:$8 sps:$4 sm:$0xff]  }
  0x1a   :  { %v2506_v7 = vld [vmem:[%s3689_s1 + $0x504] ss:$8 sps:$4 sm:$0xff]   ;;  %v2504_v11 = vld [vmem:[%s3689_s1 + $0x500] ss:$8 sps:$4 sm:$0xff]   ;;  %v2524_v21 = vld [vmem:[%s3689_s1 + $0x534] ss:$8 sps:$4 sm:$0xff]  }
  0x1b   :  { %1671 = vmatpush1.bf16.msra.mxu1 %v2445_v26  ;;  %v2515_v16 = vld [vmem:[%s3689_s1 + $0x124] ss:$8 sps:$4 sm:$0xff]   ;;  %v2513_v18 = vld [vmem:[%s3689_s1 + $0x120] ss:$8 sps:$4 sm:$0xff]   ;;  %v2519_v22 = vld [vmem:[%s3689_s1 + $0x130] ss:$8 sps:$4 sm:$0xff]  }
  0x1c   :  { %1843 = vmatpush1.bf16.msra.mxu0 %v2446_v27  ;;  %1672 = vmatprep.subr.bf16.mxu1 %v2447_v28  ;;  %v2518_v17 = vld [vmem:[%s3689_s1 + $0x524] ss:$8 sps:$4 sm:$0xff]   ;;  %v2516_v19 = vld [vmem:[%s3689_s1 + $0x520] ss:$8 sps:$4 sm:$0xff]   ;;  %v2522_v23 = vld [vmem:[%s3689_s1 + $0x530] ss:$8 sps:$4 sm:$0xff]  }
  0x1d   :  { %1844 = vmatprep.subr.bf16.mxu0 %v2449_v29  ;;  %v2527_v24 = vld [vmem:[%s3689_s1 + $0x144] ss:$8 sps:$4 sm:$0xff]   ;;  %v2525_v26 = vld [vmem:[%s3689_s1 + $0x140] ss:$8 sps:$4 sm:$0xff]   ;;  %v2533_v28 = vld [vmem:[%s3689_s1 + $0x154] ss:$8 sps:$4 sm:$0xff]  }
  0x1e   :  { %v2530_v25 = vld [vmem:[%s3689_s1 + $0x544] ss:$8 sps:$4 sm:$0xff]   ;;  %v2528_v27 = vld [vmem:[%s3689_s1 + $0x540] ss:$8 sps:$4 sm:$0xff]   ;;  %v2536_v29 = vld [vmem:[%s3689_s1 + $0x554] ss:$8 sps:$4 sm:$0xff]  }
  0x1f   :  { %1673 = vmatpush1.bf16.msra.mxu1 %v2451_v30  ;;  %v2531_v30 = vld [vmem:[%s3689_s1 + $0x150] ss:$8 sps:$4 sm:$0xff]   ;;  %v2549_v48 = vld [vmem:[%s3689_s1 + $0x180] ss:$8 sps:$4 sm:$0xff]   ;;  %v2563_v54 = vld [vmem:[%s3689_s1 + $0x1a4] ss:$8 sps:$4 sm:$0xff]  }
  0x20   :  { %1845 = vmatpush1.bf16.msra.mxu0 %v2452_v31  ;;  %1674 = vmatprep.subr.bf16.mxu1 %v2453_v32  ;;  %v2534_v31 = vld [vmem:[%s3689_s1 + $0x550] ss:$8 sps:$4 sm:$0xff]   ;;  %v2539_v32 = vld [vmem:[%s3689_s1 + $0x164] ss:$8 sps:$4 sm:$0xff]   ;;  %v2552_v49 = vld [vmem:[%s3689_s1 + $0x580] ss:$8 sps:$4 sm:$0xff]  }
  0x21   :  { %1846 = vmatprep.subr.bf16.mxu0 %v2455_v33  ;;  %v2542_v33 = vld [vmem:[%s3689_s1 + $0x564] ss:$8 sps:$4 sm:$0xff]   ;;  %v2555_v52 = vld [vmem:[%s3689_s1 + $0x190] ss:$8 sps:$4 sm:$0xff]  }
  0x22   :  { %v2558_v53 = vld [vmem:[%s3689_s1 + $0x590] ss:$8 sps:$4 sm:$0xff]   ;;  %v2566_v55 = vld [vmem:[%s3689_s1 + $0x5a4] ss:$8 sps:$4 sm:$0xff]  }
  0x23   :  { %1675 = vmatpush1.bf16.msra.mxu1 %v2457_v34  ;;  %v2537_v34 = vld [vmem:[%s3689_s1 + $0x160] ss:$8 sps:$4 sm:$0xff]  }
  0x24   :  { %1847 = vmatpush1.bf16.msra.mxu0 %v2458_v35  ;;  %1676 = vmatprep.subr.bf16.mxu1 %v2459_v36  ;;  %v2540_v35 = vld [vmem:[%s3689_s1 + $0x560] ss:$8 sps:$4 sm:$0xff]  }
  0x25   :  { %1848 = vmatprep.subr.bf16.mxu0 %v2461_v37  ;;  %v3104_v36 = vld [vmem:[%s3691_s0 + $0x8] sm:$0xff] }
  0x26   :  { %v3109_v37 = vld [vmem:[%s3691_s0 + $0x48] sm:$0xff] }
  0x27   :  { %1677 = vmatpush1.bf16.msra.mxu1 %v2463_v38  ;;  %v2545_v38 = vld [vmem:[%s3689_s1 + $0x174] ss:$8 sps:$4 sm:$0xff]  }
  0x28   :  { %1849 = vmatpush1.bf16.msra.mxu0 %v2464_v39  ;;  %1678 = vmatprep.subr.bf16.mxu1 %v2465_v40  ;;  %v2548_v39 = vld [vmem:[%s3689_s1 + $0x574] ss:$8 sps:$4 sm:$0xff]   ;;  %v2104_v40 = vcombine.high %v3104_v36, %v3109_v37 }
  0x29   :  { %1850 = vmatprep.subr.bf16.mxu0 %v2467_v41  ;;  %v3122_v41 = vld [vmem:[%s3691_s0 + $0x28] sm:$0xff] }
  0x2b   :  { %1679 = vmatpush1.bf16.msra.mxu1 %v2469_v42  ;;  %v3127_v42 = vld [vmem:[%s3691_s0 + $0x68] sm:$0xff] }
  0x2c   :  { %1851 = vmatpush1.bf16.msra.mxu0 %v2470_v43  ;;  %1680 = vmatprep.subr.bf16.mxu1 %v2471_v44  ;;  %v2112_v43 = vcombine.high %v3122_v41, %v3127_v42  ;;  %v2543_v44 = vld [vmem:[%s3689_s1 + $0x170] ss:$8 sps:$4 sm:$0xff]  }
  0x2d   :  { %1852 = vmatprep.subr.bf16.mxu0 %v2473_v45  ;;  %v2546_v45 = vld [vmem:[%s3689_s1 + $0x570] ss:$8 sps:$4 sm:$0xff]  }
  0x2f   :  { %1681 = vmatpush1.bf16.msra.mxu1 %v2475_v46  ;;  %v2551_v46 = vld [vmem:[%s3689_s1 + $0x184] ss:$8 sps:$4 sm:$0xff]  }
  0x30   :  { %1853 = vmatpush1.bf16.msra.mxu0 %v2476_v47  ;;  %1682 = vmatprep.subr.bf16.mxu1 %v2477_v50  ;;  %v2554_v47 = vld [vmem:[%s3689_s1 + $0x584] ss:$8 sps:$4 sm:$0xff]   ;;  %v2557_v50 = vld [vmem:[%s3689_s1 + $0x194] ss:$8 sps:$4 sm:$0xff]  }
  0x31   :  { %1854 = vmatprep.subr.bf16.mxu0 %v2479_v51  ;;  %v2560_v51 = vld [vmem:[%s3689_s1 + $0x594] ss:$8 sps:$4 sm:$0xff]  }
  0x33   :  { %1683 = vmatpush1.bf16.msra.mxu1 %v2481_v56  ;;  %v2561_v56 = vld [vmem:[%s3689_s1 + $0x1a0] ss:$8 sps:$4 sm:$0xff]  }
  0x34   :  { %1855 = vmatpush1.bf16.msra.mxu0 %v2482_v57  ;;  %1684 = vmatprep.subr.bf16.mxu1 %v2483_v58  ;;  %v2564_v57 = vld [vmem:[%s3689_s1 + $0x5a0] ss:$8 sps:$4 sm:$0xff]   ;;  %v2569_v58 = vld [vmem:[%s3689_s1 + $0x1b4] ss:$8 sps:$4 sm:$0xff]  }
  0x35   :  { %1856 = vmatprep.subr.bf16.mxu0 %v2485_v59  ;;  %v2572_v59 = vld [vmem:[%s3689_s1 + $0x5b4] ss:$8 sps:$4 sm:$0xff]  }
  0x37   :  { %1685 = vmatpush1.bf16.msra.mxu1 %v2487_v60  ;;  %v2567_v60 = vld [vmem:[%s3689_s1 + $0x1b0] ss:$8 sps:$4 sm:$0xff]  }
  0x38   :  { %1857 = vmatpush1.bf16.msra.mxu0 %v2488_v61  ;;  %1686 = vmatprep.subr.bf16.mxu1 %v2489_v62  ;;  %v2570_v61 = vld [vmem:[%s3689_s1 + $0x5b0] ss:$8 sps:$4 sm:$0xff]   ;;  %v2575_v62 = vld [vmem:[%s3689_s1 + $0x1c4] ss:$8 sps:$4 sm:$0xff]  }
  0x39   :  { %1858 = vmatprep.subr.bf16.mxu0 %v2491_v63  ;;  %v2578_v63 = vld [vmem:[%s3689_s1 + $0x5c4] ss:$8 sps:$4 sm:$0xff]  }
  0x3b   :  { %1687 = vmatpush1.bf16.msra.mxu1 %v2493_v0  ;;  %v2573_v0 = vld [vmem:[%s3689_s1 + $0x1c0] ss:$8 sps:$4 sm:$0xff]  }
  0x3c   :  { %1859 = vmatpush1.bf16.msra.mxu0 %v2494_v1  ;;  %1688 = vmatprep.subr.bf16.mxu1 %v2495_v2  ;;  %v2576_v1 = vld [vmem:[%s3689_s1 + $0x5c0] ss:$8 sps:$4 sm:$0xff]   ;;  %v2581_v2 = vld [vmem:[%s3689_s1 + $0x1d4] ss:$8 sps:$4 sm:$0xff]  }
  0x3d   :  { %1860 = vmatprep.subr.bf16.mxu0 %v2497_v3  ;;  %v2584_v3 = vld [vmem:[%s3689_s1 + $0x5d4] ss:$8 sps:$4 sm:$0xff]  }
  0x3f   :  { %1689 = vmatpush1.bf16.msra.mxu1 %v2499_v4  ;;  %v2579_v4 = vld [vmem:[%s3689_s1 + $0x1d0] ss:$8 sps:$4 sm:$0xff]  }
  0x40   :  { %1861 = vmatpush1.bf16.msra.mxu0 %v2500_v5  ;;  %1701 = vmatprep.subr.bf16.mxu1 %v2503_v6  ;;  %v2582_v5 = vld [vmem:[%s3689_s1 + $0x5d0] ss:$8 sps:$4 sm:$0xff]   ;;  %v2587_v6 = vld [vmem:[%s3689_s1 + $0x1e4] ss:$8 sps:$4 sm:$0xff]  }
  0x41   :  { %1873 = vmatprep.subr.bf16.mxu0 %v2506_v7  ;;  %v2590_v7 = vld [vmem:[%s3689_s1 + $0x5e4] ss:$8 sps:$4 sm:$0xff]  }
  0x42   :  { %1691 = vmatmul.mubr.bf16.vlgmr.msra.gmra.mrb[0].mxu1 %v2101_v8  ;;  %v2585_v8 = vld [vmem:[%s3689_s1 + $0x1e0] ss:$8 sps:$4 sm:$0xff]  }
  0x43   :  { %1863 = vmatmul.mubr.bf16.vlgmr.msra.gmra.mrb[0].mxu0 %v2109_v10  ;;  %1702 = vmatpush1.bf16.msra.mxu1 %v2501_v9  ;;  %v2588_v9 = vld [vmem:[%s3689_s1 + $0x5e0] ss:$8 sps:$4 sm:$0xff]   ;;  %v2593_v10 = vld [vmem:[%s3689_s1 + $0x1f4] ss:$8 sps:$4 sm:$0xff]  }
  0x44   :  { %1874 = vmatpush1.bf16.msra.mxu0 %v2504_v11  ;;  %1703 = vmatprep.subr.bf16.mxu1 %v2509_v12  ;;  %v2596_v11 = vld [vmem:[%s3689_s1 + $0x5f4] ss:$8 sps:$4 sm:$0xff]   ;;  %v2591_v12 = vld [vmem:[%s3689_s1 + $0x1f0] ss:$8 sps:$4 sm:$0xff]  }
  0x45   :  { %1875 = vmatprep.subr.bf16.mxu0 %v2512_v13  ;;  %1733 = vmatprep.mubr.bf16.mxu1 %v2104_v40  ;;  %v2594_v13 = vld [vmem:[%s3689_s1 + $0x5f0] ss:$8 sps:$4 sm:$0xff]   ;;  %v2621_v40 = vld [vmem:[%s3689_s1 + $0x240] ss:$8 sps:$4 sm:$0xff]  }
  0x46   :  { %1905 = vmatprep.mubr.bf16.mxu0 %v2112_v43  ;;  %v2632_v43 = vld [vmem:[%s3689_s1 + $0x654] ss:$8 sps:$4 sm:$0xff]  }
  0x47   :  { %1704 = vmatpush1.bf16.msra.mxu1 %v2507_v14  ;;  %v2599_v14 = vld [vmem:[%s3689_s1 + $0x204] ss:$8 sps:$4 sm:$0xff]  }
  0x48   :  { %1876 = vmatpush1.bf16.msra.mxu0 %v2510_v15  ;;  %1705 = vmatprep.subr.bf16.mxu1 %v2515_v16  ;;  %v2602_v15 = vld [vmem:[%s3689_s1 + $0x604] ss:$8 sps:$4 sm:$0xff]   ;;  %v2103_v16 = vcombine.low %v3104_v36, %v3109_v37  ;;  %v2615_v36 = vld [vmem:[%s3689_s1 + $0x230] ss:$8 sps:$4 sm:$0xff]  }
  0x49   :  { %1877 = vmatprep.subr.bf16.mxu0 %v2518_v17  ;;  %v2597_v17 = vld [vmem:[%s3689_s1 + $0x200] ss:$8 sps:$4 sm:$0xff]   ;;  %v2618_v37 = vld [vmem:[%s3689_s1 + $0x630] ss:$8 sps:$4 sm:$0xff]  }
  0x4b   :  { %1706 = vmatpush1.bf16.msra.mxu1 %v2513_v18  ;;  %v2111_v18 = vcombine.low %v3122_v41, %v3127_v42  ;;  %v2624_v41 = vld [vmem:[%s3689_s1 + $0x640] ss:$8 sps:$4 sm:$0xff]   ;;  %v2629_v42 = vld [vmem:[%s3689_s1 + $0x254] ss:$8 sps:$4 sm:$0xff]  }
  0x4c   :  { %1878 = vmatpush1.bf16.msra.mxu0 %v2516_v19  ;;  %1707 = vmatprep.subr.bf16.mxu1 %v2521_v20  ;;  %v2600_v19 = vld [vmem:[%s3689_s1 + $0x600] ss:$8 sps:$4 sm:$0xff]   ;;  %v2605_v20 = vld [vmem:[%s3689_s1 + $0x214] ss:$8 sps:$4 sm:$0xff]  }
  0x4d   :  { %1879 = vmatprep.subr.bf16.mxu0 %v2524_v21  ;;  %v2608_v21 = vld [vmem:[%s3689_s1 + $0x614] ss:$8 sps:$4 sm:$0xff]  }
  0x4f   :  { %1708 = vmatpush1.bf16.msra.mxu1 %v2519_v22  ;;  %v2603_v22 = vld [vmem:[%s3689_s1 + $0x210] ss:$8 sps:$4 sm:$0xff]  }
  0x50   :  { %1880 = vmatpush1.bf16.msra.mxu0 %v2522_v23  ;;  %1709 = vmatprep.subr.bf16.mxu1 %v2527_v24  ;;  %v2606_v23 = vld [vmem:[%s3689_s1 + $0x610] ss:$8 sps:$4 sm:$0xff]  }
  0x51   :  { %1881 = vmatprep.subr.bf16.mxu0 %v2530_v25  ;;  %v3264_v24 = vld [vmem:[%s3691_s0 + $0x10] sm:$0xff] }
  0x52   :  { %v3269_v25 = vld [vmem:[%s3691_s0 + $0x50] sm:$0xff] }
  0x53   :  { %1710 = vmatpush1.bf16.msra.mxu1 %v2525_v26  ;;  %v2611_v26 = vld [vmem:[%s3689_s1 + $0x224] ss:$8 sps:$4 sm:$0xff]  }
  0x54   :  { %1882 = vmatpush1.bf16.msra.mxu0 %v2528_v27  ;;  %1711 = vmatprep.subr.bf16.mxu1 %v2533_v28  ;;  %v2614_v27 = vld [vmem:[%s3689_s1 + $0x624] ss:$8 sps:$4 sm:$0xff]   ;;  %v2106_v28 = vcombine.high %v3264_v24, %v3269_v25 }
  0x55   :  { %1883 = vmatprep.subr.bf16.mxu0 %v2536_v29  ;;  %v3282_v29 = vld [vmem:[%s3691_s0 + $0x30] sm:$0xff] }
  0x57   :  { %1712 = vmatpush1.bf16.msra.mxu1 %v2531_v30  ;;  %v3287_v30 = vld [vmem:[%s3691_s0 + $0x70] sm:$0xff] }
  0x58   :  { %1884 = vmatpush1.bf16.msra.mxu0 %v2534_v31  ;;  %1713 = vmatprep.subr.bf16.mxu1 %v2539_v32  ;;  %v2114_v31 = vcombine.high %v3282_v29, %v3287_v30  ;;  %v2609_v32 = vld [vmem:[%s3689_s1 + $0x220] ss:$8 sps:$4 sm:$0xff]  }
  0x59   :  { %1885 = vmatprep.subr.bf16.mxu0 %v2542_v33  ;;  %v2612_v33 = vld [vmem:[%s3689_s1 + $0x620] ss:$8 sps:$4 sm:$0xff]  }
  0x5b   :  { %1714 = vmatpush1.bf16.msra.mxu1 %v2537_v34  ;;  %v2617_v34 = vld [vmem:[%s3689_s1 + $0x234] ss:$8 sps:$4 sm:$0xff]  }
  0x5c   :  { %1886 = vmatpush1.bf16.msra.mxu0 %v2540_v35  ;;  %1715 = vmatprep.subr.bf16.mxu1 %v2545_v38  ;;  %v2620_v35 = vld [vmem:[%s3689_s1 + $0x634] ss:$8 sps:$4 sm:$0xff]   ;;  %v2623_v38 = vld [vmem:[%s3689_s1 + $0x244] ss:$8 sps:$4 sm:$0xff]  }
  0x5d   :  { %1887 = vmatprep.subr.bf16.mxu0 %v2548_v39  ;;  %v2626_v39 = vld [vmem:[%s3689_s1 + $0x644] ss:$8 sps:$4 sm:$0xff]  }
  0x5f   :  { %1716 = vmatpush1.bf16.msra.mxu1 %v2543_v44  ;;  %v2627_v44 = vld [vmem:[%s3689_s1 + $0x250] ss:$8 sps:$4 sm:$0xff]  }
  0x60   :  { %1888 = vmatpush1.bf16.msra.mxu0 %v2546_v45  ;;  %1717 = vmatprep.subr.bf16.mxu1 %v2551_v46  ;;  %v2630_v45 = vld [vmem:[%s3689_s1 + $0x650] ss:$8 sps:$4 sm:$0xff]   ;;  %v2635_v46 = vld [vmem:[%s3689_s1 + $0x264] ss:$8 sps:$4 sm:$0xff]  }
  0x61   :  { %1889 = vmatprep.subr.bf16.mxu0 %v2554_v47  ;;  %v2638_v47 = vld [vmem:[%s3689_s1 + $0x664] ss:$8 sps:$4 sm:$0xff]  }
  0x63   :  { %1718 = vmatpush1.bf16.msra.mxu1 %v2549_v48  ;;  %v2633_v48 = vld [vmem:[%s3689_s1 + $0x260] ss:$8 sps:$4 sm:$0xff]  }
  0x64   :  { %1890 = vmatpush1.bf16.msra.mxu0 %v2552_v49  ;;  %1719 = vmatprep.subr.bf16.mxu1 %v2557_v50  ;;  %v2636_v49 = vld [vmem:[%s3689_s1 + $0x660] ss:$8 sps:$4 sm:$0xff]   ;;  %v2641_v50 = vld [vmem:[%s3689_s1 + $0x274] ss:$8 sps:$4 sm:$0xff]  }
  0x65   :  { %1891 = vmatprep.subr.bf16.mxu0 %v2560_v51  ;;  %v2644_v51 = vld [vmem:[%s3689_s1 + $0x674] ss:$8 sps:$4 sm:$0xff]  }
  0x67   :  { %1720 = vmatpush1.bf16.msra.mxu1 %v2555_v52  ;;  %v2639_v52 = vld [vmem:[%s3689_s1 + $0x270] ss:$8 sps:$4 sm:$0xff]  }
  0x68   :  { %1892 = vmatpush1.bf16.msra.mxu0 %v2558_v53  ;;  %1721 = vmatprep.subr.bf16.mxu1 %v2563_v54  ;;  %v2642_v53 = vld [vmem:[%s3689_s1 + $0x670] ss:$8 sps:$4 sm:$0xff]   ;;  %v2647_v54 = vld [vmem:[%s3689_s1 + $0x284] ss:$8 sps:$4 sm:$0xff]  }
  0x69   :  { %1893 = vmatprep.subr.bf16.mxu0 %v2566_v55  ;;  %v2650_v55 = vld [vmem:[%s3689_s1 + $0x684] ss:$8 sps:$4 sm:$0xff]  }
  0x6b   :  { %1722 = vmatpush1.bf16.msra.mxu1 %v2561_v56  ;;  %v2645_v56 = vld [vmem:[%s3689_s1 + $0x280] ss:$8 sps:$4 sm:$0xff]  }
  0x6c   :  { %1894 = vmatpush1.bf16.msra.mxu0 %v2564_v57  ;;  %1723 = vmatprep.subr.bf16.mxu1 %v2569_v58  ;;  %v2648_v57 = vld [vmem:[%s3689_s1 + $0x680] ss:$8 sps:$4 sm:$0xff]   ;;  %v2653_v58 = vld [vmem:[%s3689_s1 + $0x294] ss:$8 sps:$4 sm:$0xff]  }
  0x6d   :  { %1895 = vmatprep.subr.bf16.mxu0 %v2572_v59  ;;  %v2656_v59 = vld [vmem:[%s3689_s1 + $0x694] ss:$8 sps:$4 sm:$0xff]  }
  0x6f   :  { %1724 = vmatpush1.bf16.msra.mxu1 %v2567_v60  ;;  %v2651_v60 = vld [vmem:[%s3689_s1 + $0x290] ss:$8 sps:$4 sm:$0xff]  }
  0x70   :  { %1896 = vmatpush1.bf16.msra.mxu0 %v2570_v61  ;;  %1725 = vmatprep.subr.bf16.mxu1 %v2575_v62  ;;  %v2654_v61 = vld [vmem:[%s3689_s1 + $0x690] ss:$8 sps:$4 sm:$0xff]   ;;  %v2659_v62 = vld [vmem:[%s3689_s1 + $0x2a4] ss:$8 sps:$4 sm:$0xff]  }
  0x71   :  { %1897 = vmatprep.subr.bf16.mxu0 %v2578_v63  ;;  %v2662_v63 = vld [vmem:[%s3689_s1 + $0x6a4] ss:$8 sps:$4 sm:$0xff]  }
  0x73   :  { %1726 = vmatpush1.bf16.msra.mxu1 %v2573_v0  ;;  %v2657_v0 = vld [vmem:[%s3689_s1 + $0x2a0] ss:$8 sps:$4 sm:$0xff]  }
  0x74   :  { %1898 = vmatpush1.bf16.msra.mxu0 %v2576_v1  ;;  %1727 = vmatprep.subr.bf16.mxu1 %v2581_v2  ;;  %v2660_v1 = vld [vmem:[%s3689_s1 + $0x6a0] ss:$8 sps:$4 sm:$0xff]   ;;  %v2665_v2 = vld [vmem:[%s3689_s1 + $0x2b4] ss:$8 sps:$4 sm:$0xff]  }
  0x75   :  { %1899 = vmatprep.subr.bf16.mxu0 %v2584_v3  ;;  %v2668_v3 = vld [vmem:[%s3689_s1 + $0x6b4] ss:$8 sps:$4 sm:$0xff]  }
  0x77   :  { %1728 = vmatpush1.bf16.msra.mxu1 %v2579_v4  ;;  %v2663_v4 = vld [vmem:[%s3689_s1 + $0x2b0] ss:$8 sps:$4 sm:$0xff]  }
  0x78   :  { %1900 = vmatpush1.bf16.msra.mxu0 %v2582_v5  ;;  %1729 = vmatprep.subr.bf16.mxu1 %v2587_v6  ;;  %v2666_v5 = vld [vmem:[%s3689_s1 + $0x6b0] ss:$8 sps:$4 sm:$0xff]   ;;  %v2671_v6 = vld [vmem:[%s3689_s1 + $0x2c4] ss:$8 sps:$4 sm:$0xff]  }
  0x79   :  { %1901 = vmatprep.subr.bf16.mxu0 %v2590_v7  ;;  %v2674_v7 = vld [vmem:[%s3689_s1 + $0x6c4] ss:$8 sps:$4 sm:$0xff]  }
  0x7b   :  { %1730 = vmatpush1.bf16.msra.mxu1 %v2585_v8  ;;  %v2669_v8 = vld [vmem:[%s3689_s1 + $0x2c0] ss:$8 sps:$4 sm:$0xff]  }
  0x7c   :  { %1902 = vmatpush1.bf16.msra.mxu0 %v2588_v9  ;;  %1731 = vmatprep.subr.bf16.mxu1 %v2593_v10  ;;  %v2672_v9 = vld [vmem:[%s3689_s1 + $0x6c0] ss:$8 sps:$4 sm:$0xff]   ;;  %v2677_v10 = vld [vmem:[%s3689_s1 + $0x2d4] ss:$8 sps:$4 sm:$0xff]  }
  0x7d   :  { %1903 = vmatprep.subr.bf16.mxu0 %v2596_v11  ;;  %v2680_v11 = vld [vmem:[%s3689_s1 + $0x6d4] ss:$8 sps:$4 sm:$0xff]  }
  0x7f   :  { %1732 = vmatpush1.bf16.msra.mxu1 %v2591_v12  ;;  %v2675_v12 = vld [vmem:[%s3689_s1 + $0x2d0] ss:$8 sps:$4 sm:$0xff]  }
  0x80   :  { %1904 = vmatpush1.bf16.msra.mxu0 %v2594_v13  ;;  %1744 = vmatprep.subr.bf16.mxu1 %v2599_v14  ;;  %v2678_v13 = vld [vmem:[%s3689_s1 + $0x6d0] ss:$8 sps:$4 sm:$0xff]   ;;  %v2683_v14 = vld [vmem:[%s3689_s1 + $0x2e4] ss:$8 sps:$4 sm:$0xff]  }
  0x81   :  { %1916 = vmatprep.subr.bf16.mxu0 %v2602_v15  ;;  %v2686_v15 = vld [vmem:[%s3689_s1 + $0x6e4] ss:$8 sps:$4 sm:$0xff]  }
  0x82   :  { %1734 = vmatmul.mubr.bf16.vlgmr.msra.gmra.mrb[0].mxu1 %v2103_v16  ;;  %v2681_v16 = vld [vmem:[%s3689_s1 + $0x2e0] ss:$8 sps:$4 sm:$0xff]  }
  0x83   :  { %1906 = vmatmul.mubr.bf16.vlgmr.msra.gmra.mrb[0].mxu0 %v2111_v18  ;;  %1745 = vmatpush1.bf16.msra.mxu1 %v2597_v17  ;;  %v2684_v17 = vld [vmem:[%s3689_s1 + $0x6e0] ss:$8 sps:$4 sm:$0xff]   ;;  %v2689_v18 = vld [vmem:[%s3689_s1 + $0x2f4] ss:$8 sps:$4 sm:$0xff]  }
  0x84   :  { %1917 = vmatpush1.bf16.msra.mxu0 %v2600_v19  ;;  %1746 = vmatprep.subr.bf16.mxu1 %v2605_v20  ;;  %v2692_v19 = vld [vmem:[%s3689_s1 + $0x6f4] ss:$8 sps:$4 sm:$0xff]   ;;  %v2687_v20 = vld [vmem:[%s3689_s1 + $0x2f0] ss:$8 sps:$4 sm:$0xff]  }
  0x85   :  { %1918 = vmatprep.subr.bf16.mxu0 %v2608_v21  ;;  %1776 = vmatprep.mubr.bf16.mxu1 %v2106_v28  ;;  %v2690_v21 = vld [vmem:[%s3689_s1 + $0x6f0] ss:$8 sps:$4 sm:$0xff]   ;;  %v2113_v28 = vcombine.low %v3282_v29, %v3287_v30  ;;  %v2701_v29 = vld [vmem:[%s3689_s1 + $0x314] ss:$8 sps:$4 sm:$0xff]  }
  0x86   :  { %1948 = vmatprep.mubr.bf16.mxu0 %v2114_v31  ;;  %v3471_v31 = vld [vmem:[%s3691_s0 + $0x58] sm:$0xff] }
  0x87   :  { %1747 = vmatpush1.bf16.msra.mxu1 %v2603_v22  ;;  %v2695_v22 = vld [vmem:[%s3689_s1 + $0x304] ss:$8 sps:$4 sm:$0xff]   ;;  %v2704_v30 = vld [vmem:[%s3689_s1 + $0x714] ss:$8 sps:$4 sm:$0xff]  }
  0x88   :  { %1919 = vmatpush1.bf16.msra.mxu0 %v2606_v23  ;;  %1748 = vmatprep.subr.bf16.mxu1 %v2611_v26  ;;  %v2698_v23 = vld [vmem:[%s3689_s1 + $0x704] ss:$8 sps:$4 sm:$0xff]   ;;  %v3462_v26 = vld [vmem:[%s3691_s0 + $0x18] sm:$0xff] }
  0x89   :  { %1920 = vmatprep.subr.bf16.mxu0 %v2614_v27  ;;  %v2105_v27 = vcombine.low %v3264_v24, %v3269_v25  ;;  %v2693_v24 = vld [vmem:[%s3689_s1 + $0x300] ss:$8 sps:$4 sm:$0xff]  }
  0x8a   :  { %v2696_v25 = vld [vmem:[%s3689_s1 + $0x700] ss:$8 sps:$4 sm:$0xff]  }
  0x8b   :  { %1749 = vmatpush1.bf16.msra.mxu1 %v2609_v32  ;;  %v3476_v32 = vld [vmem:[%s3691_s0 + $0x38] sm:$0xff] }
  0x8c   :  { %1921 = vmatpush1.bf16.msra.mxu0 %v2612_v33  ;;  %1750 = vmatprep.subr.bf16.mxu1 %v2617_v34  ;;  %v3481_v33 = vld [vmem:[%s3691_s0 + $0x78] sm:$0xff]  ;;  %v2108_v34 = vcombine.high %v3462_v26, %v3471_v31 }
  0x8d   :  { %1922 = vmatprep.subr.bf16.mxu0 %v2620_v35  ;;  %v2116_v35 = vcombine.high %v3476_v32, %v3481_v33 }
  0x8f   :  { %1751 = vmatpush1.bf16.msra.mxu1 %v2615_v36  ;;  %v2699_v36 = vld [vmem:[%s3689_s1 + $0x310] ss:$8 sps:$4 sm:$0xff]  }
  0x90   :  { %1923 = vmatpush1.bf16.msra.mxu0 %v2618_v37  ;;  %1752 = vmatprep.subr.bf16.mxu1 %v2623_v38  ;;  %v2702_v37 = vld [vmem:[%s3689_s1 + $0x710] ss:$8 sps:$4 sm:$0xff]   ;;  %v2707_v38 = vld [vmem:[%s3689_s1 + $0x324] ss:$8 sps:$4 sm:$0xff]  }
  0x91   :  { %1924 = vmatprep.subr.bf16.mxu0 %v2626_v39  ;;  %v2710_v39 = vld [vmem:[%s3689_s1 + $0x724] ss:$8 sps:$4 sm:$0xff]  }
  0x93   :  { %1753 = vmatpush1.bf16.msra.mxu1 %v2621_v40  ;;  %v2705_v40 = vld [vmem:[%s3689_s1 + $0x320] ss:$8 sps:$4 sm:$0xff]  }
  0x94   :  { %1925 = vmatpush1.bf16.msra.mxu0 %v2624_v41  ;;  %1754 = vmatprep.subr.bf16.mxu1 %v2629_v42  ;;  %v2708_v41 = vld [vmem:[%s3689_s1 + $0x720] ss:$8 sps:$4 sm:$0xff]   ;;  %v2713_v42 = vld [vmem:[%s3689_s1 + $0x334] ss:$8 sps:$4 sm:$0xff]  }
  0x95   :  { %1926 = vmatprep.subr.bf16.mxu0 %v2632_v43  ;;  %v2716_v43 = vld [vmem:[%s3689_s1 + $0x734] ss:$8 sps:$4 sm:$0xff]  }
  0x97   :  { %1755 = vmatpush1.bf16.msra.mxu1 %v2627_v44  ;;  %v2711_v44 = vld [vmem:[%s3689_s1 + $0x330] ss:$8 sps:$4 sm:$0xff]  }
  0x98   :  { %1927 = vmatpush1.bf16.msra.mxu0 %v2630_v45  ;;  %1756 = vmatprep.subr.bf16.mxu1 %v2635_v46  ;;  %v2714_v45 = vld [vmem:[%s3689_s1 + $0x730] ss:$8 sps:$4 sm:$0xff]   ;;  %v2719_v46 = vld [vmem:[%s3689_s1 + $0x344] ss:$8 sps:$4 sm:$0xff]  }
  0x99   :  { %1928 = vmatprep.subr.bf16.mxu0 %v2638_v47  ;;  %v2722_v47 = vld [vmem:[%s3689_s1 + $0x744] ss:$8 sps:$4 sm:$0xff]  }
  0x9b   :  { %1757 = vmatpush1.bf16.msra.mxu1 %v2633_v48  ;;  %v2717_v48 = vld [vmem:[%s3689_s1 + $0x340] ss:$8 sps:$4 sm:$0xff]  }
  0x9c   :  { %1929 = vmatpush1.bf16.msra.mxu0 %v2636_v49  ;;  %1758 = vmatprep.subr.bf16.mxu1 %v2641_v50  ;;  %v2720_v49 = vld [vmem:[%s3689_s1 + $0x740] ss:$8 sps:$4 sm:$0xff]   ;;  %v2725_v50 = vld [vmem:[%s3689_s1 + $0x354] ss:$8 sps:$4 sm:$0xff]  }
  0x9d   :  { %1930 = vmatprep.subr.bf16.mxu0 %v2644_v51  ;;  %v2728_v51 = vld [vmem:[%s3689_s1 + $0x754] ss:$8 sps:$4 sm:$0xff]  }
  0x9f   :  { %1759 = vmatpush1.bf16.msra.mxu1 %v2639_v52  ;;  %v2723_v52 = vld [vmem:[%s3689_s1 + $0x350] ss:$8 sps:$4 sm:$0xff]  }
  0xa0   :  { %1931 = vmatpush1.bf16.msra.mxu0 %v2642_v53  ;;  %1760 = vmatprep.subr.bf16.mxu1 %v2647_v54  ;;  %v2726_v53 = vld [vmem:[%s3689_s1 + $0x750] ss:$8 sps:$4 sm:$0xff]   ;;  %v2731_v54 = vld [vmem:[%s3689_s1 + $0x364] ss:$8 sps:$4 sm:$0xff]  }
  0xa1   :  { %1932 = vmatprep.subr.bf16.mxu0 %v2650_v55  ;;  %v2734_v55 = vld [vmem:[%s3689_s1 + $0x764] ss:$8 sps:$4 sm:$0xff]  }
  0xa3   :  { %1761 = vmatpush1.bf16.msra.mxu1 %v2645_v56  ;;  %v2729_v56 = vld [vmem:[%s3689_s1 + $0x360] ss:$8 sps:$4 sm:$0xff]  }
  0xa4   :  { %1933 = vmatpush1.bf16.msra.mxu0 %v2648_v57  ;;  %1762 = vmatprep.subr.bf16.mxu1 %v2653_v58  ;;  %v2732_v57 = vld [vmem:[%s3689_s1 + $0x760] ss:$8 sps:$4 sm:$0xff]   ;;  %v2737_v58 = vld [vmem:[%s3689_s1 + $0x374] ss:$8 sps:$4 sm:$0xff]  }
  0xa5   :  { %1934 = vmatprep.subr.bf16.mxu0 %v2656_v59  ;;  %v2740_v59 = vld [vmem:[%s3689_s1 + $0x774] ss:$8 sps:$4 sm:$0xff]  }
  0xa7   :  { %1763 = vmatpush1.bf16.msra.mxu1 %v2651_v60  ;;  %v2735_v60 = vld [vmem:[%s3689_s1 + $0x370] ss:$8 sps:$4 sm:$0xff]  }
  0xa8   :  { %1935 = vmatpush1.bf16.msra.mxu0 %v2654_v61  ;;  %1764 = vmatprep.subr.bf16.mxu1 %v2659_v62  ;;  %v2738_v61 = vld [vmem:[%s3689_s1 + $0x770] ss:$8 sps:$4 sm:$0xff]   ;;  %v2743_v62 = vld [vmem:[%s3689_s1 + $0x384] ss:$8 sps:$4 sm:$0xff]  }
  0xa9   :  { %1936 = vmatprep.subr.bf16.mxu0 %v2662_v63  ;;  %v2746_v63 = vld [vmem:[%s3689_s1 + $0x784] ss:$8 sps:$4 sm:$0xff]  }
  0xab   :  { %1765 = vmatpush1.bf16.msra.mxu1 %v2657_v0  ;;  %v2741_v0 = vld [vmem:[%s3689_s1 + $0x380] ss:$8 sps:$4 sm:$0xff]  }
  0xac   :  { %1937 = vmatpush1.bf16.msra.mxu0 %v2660_v1  ;;  %1766 = vmatprep.subr.bf16.mxu1 %v2665_v2  ;;  %v2744_v1 = vld [vmem:[%s3689_s1 + $0x780] ss:$8 sps:$4 sm:$0xff]   ;;  %v2749_v2 = vld [vmem:[%s3689_s1 + $0x394] ss:$8 sps:$4 sm:$0xff]  }
  0xad   :  { %1938 = vmatprep.subr.bf16.mxu0 %v2668_v3  ;;  %v2752_v3 = vld [vmem:[%s3689_s1 + $0x794] ss:$8 sps:$4 sm:$0xff]  }
  0xaf   :  { %1767 = vmatpush1.bf16.msra.mxu1 %v2663_v4  ;;  %v2747_v4 = vld [vmem:[%s3689_s1 + $0x390] ss:$8 sps:$4 sm:$0xff]  }
  0xb0   :  { %1939 = vmatpush1.bf16.msra.mxu0 %v2666_v5  ;;  %1768 = vmatprep.subr.bf16.mxu1 %v2671_v6  ;;  %v2750_v5 = vld [vmem:[%s3689_s1 + $0x790] ss:$8 sps:$4 sm:$0xff]   ;;  %v2755_v6 = vld [vmem:[%s3689_s1 + $0x3a4] ss:$8 sps:$4 sm:$0xff]  }
  0xb1   :  { %1940 = vmatprep.subr.bf16.mxu0 %v2674_v7  ;;  %v2758_v7 = vld [vmem:[%s3689_s1 + $0x7a4] ss:$8 sps:$4 sm:$0xff]  }
  0xb3   :  { %1769 = vmatpush1.bf16.msra.mxu1 %v2669_v8  ;;  %v2753_v8 = vld [vmem:[%s3689_s1 + $0x3a0] ss:$8 sps:$4 sm:$0xff]  }
  0xb4   :  { %1941 = vmatpush1.bf16.msra.mxu0 %v2672_v9  ;;  %1770 = vmatprep.subr.bf16.mxu1 %v2677_v10  ;;  %v2756_v9 = vld [vmem:[%s3689_s1 + $0x7a0] ss:$8 sps:$4 sm:$0xff]   ;;  %v2761_v10 = vld [vmem:[%s3689_s1 + $0x3b4] ss:$8 sps:$4 sm:$0xff]  }
  0xb5   :  { %1942 = vmatprep.subr.bf16.mxu0 %v2680_v11  ;;  %v2764_v11 = vld [vmem:[%s3689_s1 + $0x7b4] ss:$8 sps:$4 sm:$0xff]  }
  0xb7   :  { %1771 = vmatpush1.bf16.msra.mxu1 %v2675_v12  ;;  %v2759_v12 = vld [vmem:[%s3689_s1 + $0x3b0] ss:$8 sps:$4 sm:$0xff]  }
  0xb8   :  { %1943 = vmatpush1.bf16.msra.mxu0 %v2678_v13  ;;  %1772 = vmatprep.subr.bf16.mxu1 %v2683_v14  ;;  %v2762_v13 = vld [vmem:[%s3689_s1 + $0x7b0] ss:$8 sps:$4 sm:$0xff]   ;;  %v2767_v14 = vld [vmem:[%s3689_s1 + $0x3c4] ss:$8 sps:$4 sm:$0xff]  }
  0xb9   :  { %1944 = vmatprep.subr.bf16.mxu0 %v2686_v15  ;;  %v2770_v15 = vld [vmem:[%s3689_s1 + $0x7c4] ss:$8 sps:$4 sm:$0xff]  }
  0xbb   :  { %1773 = vmatpush1.bf16.msra.mxu1 %v2681_v16  ;;  %v2765_v16 = vld [vmem:[%s3689_s1 + $0x3c0] ss:$8 sps:$4 sm:$0xff]  }
  0xbc   :  { %1945 = vmatpush1.bf16.msra.mxu0 %v2684_v17  ;;  %1774 = vmatprep.subr.bf16.mxu1 %v2689_v18  ;;  %v2768_v17 = vld [vmem:[%s3689_s1 + $0x7c0] ss:$8 sps:$4 sm:$0xff]   ;;  %v2773_v18 = vld [vmem:[%s3689_s1 + $0x3d4] ss:$8 sps:$4 sm:$0xff]  }
  0xbd   :  { %1946 = vmatprep.subr.bf16.mxu0 %v2692_v19  ;;  %v2776_v19 = vld [vmem:[%s3689_s1 + $0x7d4] ss:$8 sps:$4 sm:$0xff]  }
  0xbf   :  { %1775 = vmatpush1.bf16.msra.mxu1 %v2687_v20  ;;  %v2771_v20 = vld [vmem:[%s3689_s1 + $0x3d0] ss:$8 sps:$4 sm:$0xff]  }
  0xc0   :  { %1947 = vmatpush1.bf16.msra.mxu0 %v2690_v21  ;;  %1787 = vmatprep.subr.bf16.mxu1 %v2695_v22  ;;  %v2774_v21 = vld [vmem:[%s3689_s1 + $0x7d0] ss:$8 sps:$4 sm:$0xff]   ;;  %v2779_v22 = vld [vmem:[%s3689_s1 + $0x3e4] ss:$8 sps:$4 sm:$0xff]  }
  0xc1   :  { %1959 = vmatprep.subr.bf16.mxu0 %v2698_v23  ;;  %v2782_v23 = vld [vmem:[%s3689_s1 + $0x7e4] ss:$8 sps:$4 sm:$0xff]  }
  0xc2   :  { %1777 = vmatmul.mubr.bf16.vlgmr.msra.gmra.mrb[0].mxu1 %v2105_v27  ;;  %v2777_v27 = vld [vmem:[%s3689_s1 + $0x3e0] ss:$8 sps:$4 sm:$0xff]  }
  0xc3   :  { %1949 = vmatmul.mubr.bf16.vlgmr.msra.gmra.mrb[0].mxu0 %v2113_v28  ;;  %1788 = vmatpush1.bf16.msra.mxu1 %v2693_v24  ;;  %v2780_v28 = vld [vmem:[%s3689_s1 + $0x7e0] ss:$8 sps:$4 sm:$0xff]   ;;  %v2785_v24 = vld [vmem:[%s3689_s1 + $0x3f4] ss:$8 sps:$4 sm:$0xff]  }
  0xc4   :  { %1960 = vmatpush1.bf16.msra.mxu0 %v2696_v25  ;;  %1789 = vmatprep.subr.bf16.mxu1 %v2701_v29  ;;  %v2788_v25 = vld [vmem:[%s3689_s1 + $0x7f4] ss:$8 sps:$4 sm:$0xff]   ;;  %v2783_v29 = vld [vmem:[%s3689_s1 + $0x3f0] ss:$8 sps:$4 sm:$0xff]  }
  0xc5   :  { %1961 = vmatprep.subr.bf16.mxu0 %v2704_v30  ;;  %1819 = vmatprep.mubr.bf16.mxu1 %v2108_v34  ;;  %v2786_v30 = vld [vmem:[%s3689_s1 + $0x7f0] ss:$8 sps:$4 sm:$0xff]   ;;  %v2107_v34 = vcombine.low %v3462_v26, %v3471_v31 }
  0xc6   :  { %1991 = vmatprep.mubr.bf16.mxu0 %v2116_v35  ;;  %v2115_v35 = vcombine.low %v3476_v32, %v3481_v33 }
  0xc7   :  { %1790 = vmatpush1.bf16.msra.mxu1 %v2699_v36 }
  0xc8   :  { %1962 = vmatpush1.bf16.msra.mxu0 %v2702_v37  ;;  %1791 = vmatprep.subr.bf16.mxu1 %v2707_v38 }
  0xc9   :  { %1963 = vmatprep.subr.bf16.mxu0 %v2710_v39 }
  0xcb   :  { %1792 = vmatpush1.bf16.msra.mxu1 %v2705_v40 }
  0xcc   :  { %1964 = vmatpush1.bf16.msra.mxu0 %v2708_v41  ;;  %1793 = vmatprep.subr.bf16.mxu1 %v2713_v42 }
  0xcd   :  { %1965 = vmatprep.subr.bf16.mxu0 %v2716_v43 }
  0xcf   :  { %1794 = vmatpush1.bf16.msra.mxu1 %v2711_v44 }
  0xd0   :  { %1966 = vmatpush1.bf16.msra.mxu0 %v2714_v45  ;;  %1795 = vmatprep.subr.bf16.mxu1 %v2719_v46 }
  0xd1   :  { %1967 = vmatprep.subr.bf16.mxu0 %v2722_v47 }
  0xd3   :  { %1796 = vmatpush1.bf16.msra.mxu1 %v2717_v48 }
  0xd4   :  { %1968 = vmatpush1.bf16.msra.mxu0 %v2720_v49  ;;  %1797 = vmatprep.subr.bf16.mxu1 %v2725_v50 }
  0xd5   :  { %1969 = vmatprep.subr.bf16.mxu0 %v2728_v51 }
  0xd7   :  { %1798 = vmatpush1.bf16.msra.mxu1 %v2723_v52 }
  0xd8   :  { %1970 = vmatpush1.bf16.msra.mxu0 %v2726_v53  ;;  %1799 = vmatprep.subr.bf16.mxu1 %v2731_v54 }
  0xd9   :  { %1971 = vmatprep.subr.bf16.mxu0 %v2734_v55 }
  0xdb   :  { %1800 = vmatpush1.bf16.msra.mxu1 %v2729_v56 }
  0xdc   :  { %1972 = vmatpush1.bf16.msra.mxu0 %v2732_v57  ;;  %1801 = vmatprep.subr.bf16.mxu1 %v2737_v58 }
  0xdd   :  { %1973 = vmatprep.subr.bf16.mxu0 %v2740_v59 }
  0xdf   :  { %1802 = vmatpush1.bf16.msra.mxu1 %v2735_v60 }
  0xe0   :  { %1974 = vmatpush1.bf16.msra.mxu0 %v2738_v61  ;;  %1803 = vmatprep.subr.bf16.mxu1 %v2743_v62 }
  0xe1   :  { %1975 = vmatprep.subr.bf16.mxu0 %v2746_v63 }
  0xe3   :  { %1804 = vmatpush1.bf16.msra.mxu1 %v2741_v0 }
  0xe4   :  { %1976 = vmatpush1.bf16.msra.mxu0 %v2744_v1  ;;  %1805 = vmatprep.subr.bf16.mxu1 %v2749_v2 }
  0xe5   :  { %1977 = vmatprep.subr.bf16.mxu0 %v2752_v3 }
  0xe7   :  { %1806 = vmatpush1.bf16.msra.mxu1 %v2747_v4 }
  0xe8   :  { %1978 = vmatpush1.bf16.msra.mxu0 %v2750_v5  ;;  %1807 = vmatprep.subr.bf16.mxu1 %v2755_v6 }
  0xe9   :  { %1979 = vmatprep.subr.bf16.mxu0 %v2758_v7 }
  0xeb   :  { %1808 = vmatpush1.bf16.msra.mxu1 %v2753_v8 }
  0xec   :  { %1980 = vmatpush1.bf16.msra.mxu0 %v2756_v9  ;;  %1809 = vmatprep.subr.bf16.mxu1 %v2761_v10 }
  0xed   :  { %1981 = vmatprep.subr.bf16.mxu0 %v2764_v11 }
  0xef   :  { %1810 = vmatpush1.bf16.msra.mxu1 %v2759_v12 }
  0xf0   :  { %1982 = vmatpush1.bf16.msra.mxu0 %v2762_v13  ;;  %1811 = vmatprep.subr.bf16.mxu1 %v2767_v14 }
  0xf1   :  { %1983 = vmatprep.subr.bf16.mxu0 %v2770_v15 }
  0xf3   :  { %1812 = vmatpush1.bf16.msra.mxu1 %v2765_v16 }
  0xf4   :  { %1984 = vmatpush1.bf16.msra.mxu0 %v2768_v17  ;;  %1813 = vmatprep.subr.bf16.mxu1 %v2773_v18 }
  0xf5   :  { %1985 = vmatprep.subr.bf16.mxu0 %v2776_v19 }
  0xf7   :  { %1814 = vmatpush1.bf16.msra.mxu1 %v2771_v20 }
  0xf8   :  { %1986 = vmatpush1.bf16.msra.mxu0 %v2774_v21  ;;  %1815 = vmatprep.subr.bf16.mxu1 %v2779_v22 }
  0xf9   :  { %1987 = vmatprep.subr.bf16.mxu0 %v2782_v23 }
  0xfb   :  { %1816 = vmatpush1.bf16.msra.mxu1 %v2777_v27 }
  0xfc   :  { %1988 = vmatpush1.bf16.msra.mxu0 %v2780_v28  ;;  %1817 = vmatprep.subr.bf16.mxu1 %v2785_v24 }
  0xfd   :  { %1989 = vmatprep.subr.bf16.mxu0 %v2788_v25 }
  0xff   :  { %1818 = vmatpush1.bf16.msra.mxu1 %v2783_v29 }
 0x100   :  { %1990 = vmatpush1.bf16.msra.mxu0 %v2786_v30 }
 0x102   :  { %1820 = vmatmul.mubr.bf16.vlgmr.msra.gmra.mrb[0].mxu1 %v2107_v34 }
 0x103   :  { %1992 = vmatmul.mubr.bf16.vlgmr.msra.gmra.mrb[0].mxu0 %v2115_v35 }
 0x1d5   :  { %v1821_v36 = vpop.f32.mrb[0].mxu1 }
 0x1d6   :  { %v1993_v37 = vpop.f32.mrb[0].mxu0  ;;  %v1823_v39 = vpop.f32.mrb[1].mxu1 }
 0x1d7   :  { %v3677_v38 = vadd.f32 %v1993_v37, %v1821_v36  ;;  %v1995_v40 = vpop.f32.mrb[1].mxu0  ;;  %v1825_v42 = vpop.f32.mrb[2].mxu1 }
 0x1d8   :  { %v2378_v41 = vadd.f32 %v1995_v40, %v1823_v39  ;;  %v1997_v43 = vpop.f32.mrb[2].mxu0  ;;  %v1827_v45 = vpop.f32.mrb[3].mxu1 }
 0x1d9   :  { %v2379_v44 = vadd.f32 %v1997_v43, %v1825_v42  ;;  %v1999_v46 = vpop.f32.mrb[3].mxu0  ;;  %v2033_v31 = vmul.f32 %v3677_v38, %v3677_v38 }
 0x1da   :  { %v2380_v26 = vadd.f32 %v1999_v46, %v1827_v45  ;;  %v2034_v47 = vmul.f32 %v2378_v41, %v2378_v41 }
 0x1db   :  { %v2017_v32 = vadd.f32 %v2379_v44, %v3677_v38  ;;  %v2035_v33 = vmul.f32 %v2379_v44, %v2379_v44 }
 0x1dc   :  { %v2024_v48 = vadd.f32 %v2380_v26, %v2378_v41  ;;  %v2036_v49 = vmul.f32 %v2380_v26, %v2380_v26 }
 0x1dd   :  { %v2018_v50 = vrot.slane %v2017_v32, 4  ;;  %v2037_v51 = vadd.f32 %v2035_v33, %v2033_v31 }
 0x1de   :  { %v2025_v52 = vrot.slane %v2024_v48, 4  ;;  %v2044_v53 = vadd.f32 %v2036_v49, %v2034_v47 }
 0x1df   :  { %v2019_v54 = vadd.f32 %v2018_v50, %v2017_v32  ;;  %v2038_v55 = vrot.slane %v2037_v51, 4 }
 0x1e0   :  { %v2026_v56 = vadd.f32 %v2025_v52, %v2024_v48  ;;  %v2045_v57 = vrot.slane %v2044_v53, 4 }
 0x1e1   :  { %v2020_v58 = vrot.slane %v2019_v54, 2  ;;  %v2039_v59 = vadd.f32 %v2038_v55, %v2037_v51 }
 0x1e2   :  { %v2027_v60 = vrot.slane %v2026_v56, 2  ;;  %v2046_v61 = vadd.f32 %v2045_v57, %v2044_v53 }
 0x1e3   :  { %v2021_v62 = vadd.f32 %v2020_v58, %v2019_v54  ;;  %v2040_v63 = vrot.slane %v2039_v59, 2 }
 0x1e4   :  { %v2028_v0 = vadd.f32 %v2027_v60, %v2026_v56  ;;  %v2047_v1 = vrot.slane %v2046_v61, 2 }
 0x1e5   :  { %v2022_v2 = vrot.slane %v2021_v62, 1  ;;  %v2041_v3 = vadd.f32 %v2040_v63, %v2039_v59 }
 0x1e6   :  { %v2029_v4 = vrot.slane %v2028_v0, 1  ;;  %v2048_v5 = vadd.f32 %v2047_v1, %v2046_v61 }
 0x1e7   :  { %v2023_v6 = vadd.f32 %v2022_v2, %v2021_v62  ;;  %v2042_v7 = vrot.slane %v2041_v3, 1 }
 0x1e8   :  { %v2030_v8 = vadd.f32 %v2029_v4, %v2028_v0  ;;  %v2049_v9 = vrot.slane %v2048_v5, 1 }
 0x1e9   :  { %v2031_v10 = vmul.f32 0.125, %v2023_v6  ;;  %v2043_v11 = vadd.f32 %v2042_v7, %v2041_v3 }
 0x1ea   :  { %v2032_v12 = vmul.f32 0.125, %v2030_v8  ;;  %v2050_v13 = vadd.f32 %v2049_v9, %v2048_v5 }
 0x1eb   :  { %v2051_v14 = vmul.f32 0.125, %v2043_v11  ;;  %v2053_v15 = vmul.f32 %v2031_v10, %v2031_v10  ;;  %v2063_v16 = vsub.f32 %v3677_v38, %v2031_v10  ;;  %v2065_v17 = vsub.f32 %v2379_v44, %v2031_v10 }
 0x1ec   :  { %v2052_v18 = vmul.f32 0.125, %v2050_v13  ;;  %v2054_v19 = vmul.f32 %v2032_v12, %v2032_v12  ;;  %v2064_v20 = vsub.f32 %v2378_v41, %v2032_v12  ;;  %v2066_v21 = vsub.f32 %v2380_v26, %v2032_v12 }
 0x1ed   :  { %v2055_v22 = vsub.f32 %v2051_v14, %v2053_v15 }
 0x1ee   :  { %v2056_v23 = vsub.f32 %v2052_v18, %v2054_v19 }
 0x1ef   :  { %v2057_v27 = vmax.f32 %v2055_v22, 0.0 }
 0x1f0   :  { %v2058_v28 = vmax.f32 %v2056_v23, 0.0 }
 0x1f1   :  { %v2059_v24 = vadd.f32 1e-05, %v2057_v27 }
 0x1f2   :  { %v2060_v25 = vadd.f32 1e-05, %v2058_v28 }
 0x1f3   :  { %2789 = vrsqrt.f32 %v2059_v24 }
 0x1f4   :  { %2791 = vrsqrt.f32 %v2060_v25 }
 0x1fd   :  { %v2790_v29 = vpop.eup %2789 }
 0x1fe   :  { %v2792_v30 = vpop.eup %2791  ;;  %v2067_v34 = vmul.f32 %v2790_v29, %v2063_v16  ;;  %v2069_v35 = vmul.f32 %v2790_v29, %v2065_v17 }
 0x1ff   :  { %v2068_v36 = vmul.f32 %v2792_v30, %v2064_v20  ;;  %v2070_v37 = vmul.f32 %v2792_v30, %v2066_v21 }
 0x200   :  { %vm2071_vm0 = vcmp.gt.f32.partialorder %v2067_v34, 0.0  ;;  %vm2073_vm1 = vcmp.gt.f32.partialorder %v2069_v35, 0.0  ;;  %v2075_v38 = vmul.f32 0.2, %v2067_v34  ;;  %v2077_v39 = vmul.f32 0.2, %v2069_v35 }
 0x201   :  { %vm2072_vm2 = vcmp.gt.f32.partialorder %v2068_v36, 0.0  ;;  %vm2074_vm3 = vcmp.gt.f32.partialorder %v2070_v37, 0.0  ;;  %v2076_v40 = vmul.f32 0.2, %v2068_v36  ;;  %v2078_v41 = vmul.f32 0.2, %v2070_v37 }
 0x202   :  { %v2081_v42 = vsel %vm2073_vm1, %v2069_v35, %v2077_v39  ;;  %v2079_v43 = vsel %vm2071_vm0, %v2067_v34, %v2075_v38 }
 0x203   :  { %v2080_v44 = vsel %vm2072_vm2, %v2068_v36, %v2076_v40  ;;  %v2082_v45 = vsel %vm2074_vm3, %v2070_v37, %v2078_v41 }
 0x204   :  { %v2375_v46 = vpack.c.bf16 %v2080_v44, %v2079_v43  ;;  %v2376_v26 = vpack.c.bf16 %v2082_v45, %v2081_v42 }
 0x206   :  { %2095 = vst [vmem:[%s3692_s3] sm:$0xff] %v2375_v46  ;;  %2096 = vst [vmem:[%s3692_s3 + $0x8] sm:$0xff] %v2376_v26 }

// kernel: patchgan_forward.7
= control target key start
LH: loop header
LB: loop body
LE: loop exit
PB: predicated region body
PF: predicated region fallthrough
CT: control target
= control target key end

     0   :  { %s4753_s1 = inlined_call_operand.vmem [shape: bf16[4096,128], index: 1, kind: input, shape index: {}]   ;;  %s4754_s0 = inlined_call_operand.vmem [shape: bf16[16,4096], index: 0, kind: input, shape index: {}]   ;;  %s4755_s2 = inlined_call_operand.vmem [shape: f32[1,128], index: 2, kind: input, shape index: {}]   ;;  %s4756_s3 = inlined_call_operand.vmem [shape: f32[16,128], index: 3, kind: output, shape index: {}]  }
   0x1   :  { %v3596_v0 = vld [vmem:[%s4753_s1 + $0x40] sm:$0xff]   ;;  %v3600_v4 = vld [vmem:[%s4753_s1 + $0x48] sm:$0xff]   ;;  %v3604_v8 = vld [vmem:[%s4753_s1 + $0x50] sm:$0xff]  }
   0x2   :  { %v3597_v1 = vld [vmem:[%s4753_s1 + $0xc0] sm:$0xff]   ;;  %3244 = vmatprep.subr.bf16.mxu0 %v3596_v0  ;;  %v3601_v5 = vld [vmem:[%s4753_s1 + $0xc8] sm:$0xff]   ;;  %v3605_v9 = vld [vmem:[%s4753_s1 + $0xd0] sm:$0xff]  }
   0x3   :  { %v3598_v2 = vld [vmem:[%s4753_s1] sm:$0xff]   ;;  %3266 = vmatprep.subr.bf16.mxu1 %v3597_v1  ;;  %v3602_v6 = vld [vmem:[%s4753_s1 + $0x8] sm:$0xff]   ;;  %v3606_v10 = vld [vmem:[%s4753_s1 + $0x10] sm:$0xff]  }
   0x4   :  { %v3599_v3 = vld [vmem:[%s4753_s1 + $0x80] sm:$0xff]   ;;  %3245 = vmatpush3.bf16.msra.mxu0 %v3598_v2  ;;  %v3603_v7 = vld [vmem:[%s4753_s1 + $0x88] sm:$0xff]   ;;  %v3607_v11 = vld [vmem:[%s4753_s1 + $0x90] sm:$0xff]  }
   0x5   :  { %3267 = vmatpush3.bf16.msra.mxu1 %v3599_v3  ;;  %3246 = vmatprep.subr.bf16.mxu0 %v3600_v4  ;;  %v3608_v12 = vld [vmem:[%s4753_s1 + $0x58] sm:$0xff]   ;;  %v3612_v16 = vld [vmem:[%s4753_s1 + $0x60] sm:$0xff]   ;;  %v3616_v20 = vld [vmem:[%s4753_s1 + $0x68] sm:$0xff]  }
   0x6   :  { %3268 = vmatprep.subr.bf16.mxu1 %v3601_v5  ;;  %v3609_v13 = vld [vmem:[%s4753_s1 + $0xd8] sm:$0xff]   ;;  %v3613_v17 = vld [vmem:[%s4753_s1 + $0xe0] sm:$0xff]   ;;  %v3617_v21 = vld [vmem:[%s4753_s1 + $0xe8] sm:$0xff]  }
   0x7   :  { %v3610_v14 = vld [vmem:[%s4753_s1 + $0x18] sm:$0xff]   ;;  %v3614_v18 = vld [vmem:[%s4753_s1 + $0x20] sm:$0xff]   ;;  %v3618_v22 = vld [vmem:[%s4753_s1 + $0x28] sm:$0xff]  }
   0x8   :  { %3247 = vmatpush3.bf16.msra.mxu0 %v3602_v6  ;;  %v3611_v15 = vld [vmem:[%s4753_s1 + $0x98] sm:$0xff]   ;;  %v3615_v19 = vld [vmem:[%s4753_s1 + $0xa0] sm:$0xff]   ;;  %v3619_v23 = vld [vmem:[%s4753_s1 + $0xa8] sm:$0xff]  }
   0x9   :  { %3269 = vmatpush3.bf16.msra.mxu1 %v3603_v7  ;;  %3248 = vmatprep.subr.bf16.mxu0 %v3604_v8  ;;  %v3620_v24 = vld [vmem:[%s4753_s1 + $0x70] sm:$0xff]   ;;  %v3624_v28 = vld [vmem:[%s4753_s1 + $0x78] sm:$0xff]   ;;  %v30_v32 = vld [vmem:[%s4754_s0] sm:$0xff] }
   0xa   :  { %3270 = vmatprep.subr.bf16.mxu1 %v3605_v9  ;;  %v3621_v25 = vld [vmem:[%s4753_s1 + $0xf0] sm:$0xff]   ;;  %v3625_v29 = vld [vmem:[%s4753_s1 + $0xf8] sm:$0xff]   ;;  %v46_v33 = vld [vmem:[%s4754_s0 + $0x80] sm:$0xff] }
   0xb   :  { %v3622_v26 = vld [vmem:[%s4753_s1 + $0x30] sm:$0xff]   ;;  %v3626_v30 = vld [vmem:[%s4753_s1 + $0x38] sm:$0xff]   ;;  %v31_v34 = vld [vmem:[%s4754_s0 + $0x8] sm:$0xff]  ;;  %v2954_v35 = vcombine.low %v30_v32, %v46_v33  ;;  %v2955_v36 = vcombine.high %v30_v32, %v46_v33 }
   0xc   :  { %3249 = vmatpush3.bf16.msra.mxu0 %v3606_v10  ;;  %v3623_v27 = vld [vmem:[%s4753_s1 + $0xb0] sm:$0xff]   ;;  %v3627_v31 = vld [vmem:[%s4753_s1 + $0xb8] sm:$0xff]   ;;  %v47_v37 = vld [vmem:[%s4754_s0 + $0x88] sm:$0xff] }
   0xd   :  { %3271 = vmatpush3.bf16.msra.mxu1 %v3607_v11  ;;  %3250 = vmatprep.subr.bf16.mxu0 %v3608_v12  ;;  %v2956_v38 = vcombine.low %v31_v34, %v47_v37  ;;  %v2957_v39 = vcombine.high %v31_v34, %v47_v37  ;;  %v3628_v40 = vld [vmem:[%s4753_s1 + $0x140] sm:$0xff]   ;;  %v3632_v44 = vld [vmem:[%s4753_s1 + $0x148] sm:$0xff]   ;;  %v3636_v48 = vld [vmem:[%s4753_s1 + $0x150] sm:$0xff]  }
   0xe   :  { %3272 = vmatprep.subr.bf16.mxu1 %v3609_v13  ;;  %2302 = vmatprep.mubr.bf16.mxu0 %v2955_v36  ;;  %v3629_v41 = vld [vmem:[%s4753_s1 + $0x1c0] sm:$0xff]   ;;  %v3633_v45 = vld [vmem:[%s4753_s1 + $0x1c8] sm:$0xff]   ;;  %v3637_v49 = vld [vmem:[%s4753_s1 + $0x1d0] sm:$0xff]  }
   0xf   :  { %2343 = vmatprep.mubr.bf16.mxu1 %v2957_v39  ;;  %v3630_v42 = vld [vmem:[%s4753_s1 + $0x100] sm:$0xff]   ;;  %v3634_v46 = vld [vmem:[%s4753_s1 + $0x108] sm:$0xff]   ;;  %v3638_v50 = vld [vmem:[%s4753_s1 + $0x110] sm:$0xff]  }
  0x10   :  { %3251 = vmatpush3.bf16.msra.mxu0 %v3610_v14  ;;  %v3631_v43 = vld [vmem:[%s4753_s1 + $0x180] sm:$0xff]   ;;  %v3635_v47 = vld [vmem:[%s4753_s1 + $0x188] sm:$0xff]   ;;  %v3639_v51 = vld [vmem:[%s4753_s1 + $0x190] sm:$0xff]  }
  0x11   :  { %3273 = vmatpush3.bf16.msra.mxu1 %v3611_v15  ;;  %3252 = vmatprep.subr.bf16.mxu0 %v3612_v16  ;;  %v3640_v52 = vld [vmem:[%s4753_s1 + $0x158] sm:$0xff]   ;;  %v3644_v56 = vld [vmem:[%s4753_s1 + $0x160] sm:$0xff]   ;;  %v3648_v60 = vld [vmem:[%s4753_s1 + $0x168] sm:$0xff]  }
  0x12   :  { %3274 = vmatprep.subr.bf16.mxu1 %v3613_v17  ;;  %v3641_v53 = vld [vmem:[%s4753_s1 + $0x1d8] sm:$0xff]   ;;  %v3645_v57 = vld [vmem:[%s4753_s1 + $0x1e0] sm:$0xff]   ;;  %v3649_v61 = vld [vmem:[%s4753_s1 + $0x1e8] sm:$0xff]  }
  0x13   :  { %v3642_v54 = vld [vmem:[%s4753_s1 + $0x118] sm:$0xff]   ;;  %v3646_v58 = vld [vmem:[%s4753_s1 + $0x120] sm:$0xff]   ;;  %v3650_v62 = vld [vmem:[%s4753_s1 + $0x128] sm:$0xff]  }
  0x14   :  { %3253 = vmatpush3.bf16.msra.mxu0 %v3614_v18  ;;  %v3643_v55 = vld [vmem:[%s4753_s1 + $0x198] sm:$0xff]   ;;  %v3647_v59 = vld [vmem:[%s4753_s1 + $0x1a0] sm:$0xff]   ;;  %v3651_v63 = vld [vmem:[%s4753_s1 + $0x1a8] sm:$0xff]  }
  0x15   :  { %3275 = vmatpush3.bf16.msra.mxu1 %v3615_v19  ;;  %3254 = vmatprep.subr.bf16.mxu0 %v3616_v20  ;;  %v3652_v0 = vld [vmem:[%s4753_s1 + $0x170] sm:$0xff]   ;;  %v3656_v4 = vld [vmem:[%s4753_s1 + $0x178] sm:$0xff]   ;;  %v3660_v16 = vld [vmem:[%s4753_s1 + $0x240] sm:$0xff]  }
  0x16   :  { %3276 = vmatprep.subr.bf16.mxu1 %v3617_v21  ;;  %v3653_v1 = vld [vmem:[%s4753_s1 + $0x1f0] sm:$0xff]   ;;  %v3657_v5 = vld [vmem:[%s4753_s1 + $0x1f8] sm:$0xff]   ;;  %v3661_v17 = vld [vmem:[%s4753_s1 + $0x2c0] sm:$0xff]  }
  0x17   :  { %v3654_v2 = vld [vmem:[%s4753_s1 + $0x130] sm:$0xff]   ;;  %v3658_v6 = vld [vmem:[%s4753_s1 + $0x138] sm:$0xff]   ;;  %v3662_v18 = vld [vmem:[%s4753_s1 + $0x200] sm:$0xff]  }
  0x18   :  { %3255 = vmatpush3.bf16.msra.mxu0 %v3618_v22  ;;  %v3655_v3 = vld [vmem:[%s4753_s1 + $0x1b0] sm:$0xff]   ;;  %v3659_v7 = vld [vmem:[%s4753_s1 + $0x1b8] sm:$0xff]   ;;  %v3663_v19 = vld [vmem:[%s4753_s1 + $0x280] sm:$0xff]  }
  0x19   :  { %3277 = vmatpush3.bf16.msra.mxu1 %v3619_v23  ;;  %3256 = vmatprep.subr.bf16.mxu0 %v3620_v24  ;;  %v32_v8 = vld [vmem:[%s4754_s0 + $0x10] sm:$0xff]  ;;  %v33_v12 = vld [vmem:[%s4754_s0 + $0x18] sm:$0xff]  ;;  %v3664_v20 = vld [vmem:[%s4753_s1 + $0x248] sm:$0xff]  }
  0x1a   :  { %3278 = vmatprep.subr.bf16.mxu1 %v3621_v25  ;;  %v48_v9 = vld [vmem:[%s4754_s0 + $0x90] sm:$0xff]  ;;  %v49_v13 = vld [vmem:[%s4754_s0 + $0x98] sm:$0xff]  ;;  %v3665_v21 = vld [vmem:[%s4753_s1 + $0x2c8] sm:$0xff]  }
  0x1b   :  { %v2958_v10 = vcombine.low %v32_v8, %v48_v9  ;;  %v2959_v11 = vcombine.high %v32_v8, %v48_v9  ;;  %v2960_v14 = vcombine.low %v33_v12, %v49_v13  ;;  %v2961_v15 = vcombine.high %v33_v12, %v49_v13  ;;  %v3666_v22 = vld [vmem:[%s4753_s1 + $0x208] sm:$0xff]   ;;  %v3668_v24 = vld [vmem:[%s4753_s1 + $0x250] sm:$0xff]   ;;  %v3676_v32 = vld [vmem:[%s4753_s1 + $0x260] sm:$0xff]  }
  0x1c   :  { %3257 = vmatpush3.bf16.msra.mxu0 %v3622_v26  ;;  %v3667_v23 = vld [vmem:[%s4753_s1 + $0x288] sm:$0xff]   ;;  %v3669_v25 = vld [vmem:[%s4753_s1 + $0x2d0] sm:$0xff]   ;;  %v3677_v33 = vld [vmem:[%s4753_s1 + $0x2e0] sm:$0xff]  }
  0x1d   :  { %3279 = vmatpush3.bf16.msra.mxu1 %v3623_v27  ;;  %3258 = vmatprep.subr.bf16.mxu0 %v3624_v28  ;;  %v3670_v26 = vld [vmem:[%s4753_s1 + $0x210] sm:$0xff]   ;;  %v3672_v28 = vld [vmem:[%s4753_s1 + $0x258] sm:$0xff]   ;;  %v3678_v34 = vld [vmem:[%s4753_s1 + $0x220] sm:$0xff]  }
  0x1e   :  { %3280 = vmatprep.subr.bf16.mxu1 %v3625_v29  ;;  %v3671_v27 = vld [vmem:[%s4753_s1 + $0x290] sm:$0xff]   ;;  %v3673_v29 = vld [vmem:[%s4753_s1 + $0x2d8] sm:$0xff]   ;;  %v3680_v36 = vld [vmem:[%s4753_s1 + $0x268] sm:$0xff]  }
  0x1f   :  { %v3681_v37 = vld [vmem:[%s4753_s1 + $0x2e8] sm:$0xff]   ;;  %v3708_v8 = vld [vmem:[%s4753_s1 + $0x360] sm:$0xff]  }
  0x20   :  { %3259 = vmatpush3.bf16.msra.mxu0 %v3626_v30  ;;  %v3674_v30 = vld [vmem:[%s4753_s1 + $0x218] sm:$0xff]   ;;  %v3683_v39 = vld [vmem:[%s4753_s1 + $0x2a8] sm:$0xff]   ;;  %v3709_v9 = vld [vmem:[%s4753_s1 + $0x3e0] sm:$0xff]  }
  0x21   :  { %3281 = vmatpush3.bf16.msra.mxu1 %v3627_v31  ;;  %3288 = vmatprep.subr.bf16.mxu0 %v3628_v40  ;;  %v3675_v31 = vld [vmem:[%s4753_s1 + $0x298] sm:$0xff]   ;;  %v3684_v40 = vld [vmem:[%s4753_s1 + $0x270] sm:$0xff]   ;;  %v3712_v12 = vld [vmem:[%s4753_s1 + $0x368] sm:$0xff]  }
  0x22   :  { %3310 = vmatprep.subr.bf16.mxu1 %v3629_v41  ;;  %v3685_v41 = vld [vmem:[%s4753_s1 + $0x2f0] sm:$0xff]   ;;  %v3713_v13 = vld [vmem:[%s4753_s1 + $0x3e8] sm:$0xff]  }
  0x23   :  { %2303 = vmatmul.mubr.bf16.vlgmr.msra.gmra.mrb[0].mxu0 %v2954_v35  ;;  %v3679_v35 = vld [vmem:[%s4753_s1 + $0x2a0] sm:$0xff]  }
  0x24   :  { %2344 = vmatmul.mubr.bf16.vlgmr.msra.gmra.mrb[0].mxu1 %v2956_v38  ;;  %3289 = vmatpush3.bf16.msra.mxu0 %v3630_v42  ;;  %v3682_v38 = vld [vmem:[%s4753_s1 + $0x228] sm:$0xff]   ;;  %v3686_v42 = vld [vmem:[%s4753_s1 + $0x230] sm:$0xff]  }
  0x25   :  { %3311 = vmatpush3.bf16.msra.mxu1 %v3631_v43  ;;  %3290 = vmatprep.subr.bf16.mxu0 %v3632_v44  ;;  %v3687_v43 = vld [vmem:[%s4753_s1 + $0x2b0] sm:$0xff]   ;;  %v3688_v44 = vld [vmem:[%s4753_s1 + $0x278] sm:$0xff]  }
  0x26   :  { %3312 = vmatprep.subr.bf16.mxu1 %v3633_v45  ;;  %2384 = vmatprep.mubr.bf16.mxu0 %v2959_v11  ;;  %v3689_v45 = vld [vmem:[%s4753_s1 + $0x2f8] sm:$0xff]   ;;  %v3711_v11 = vld [vmem:[%s4753_s1 + $0x3a0] sm:$0xff]  }
  0x27   :  { %2425 = vmatprep.mubr.bf16.mxu1 %v2961_v15  ;;  %v3715_v15 = vld [vmem:[%s4753_s1 + $0x3a8] sm:$0xff]  }
  0x28   :  { %3291 = vmatpush3.bf16.msra.mxu0 %v3634_v46  ;;  %v3690_v46 = vld [vmem:[%s4753_s1 + $0x238] sm:$0xff]  }
  0x29   :  { %3313 = vmatpush3.bf16.msra.mxu1 %v3635_v47  ;;  %3292 = vmatprep.subr.bf16.mxu0 %v3636_v48  ;;  %v3691_v47 = vld [vmem:[%s4753_s1 + $0x2b8] sm:$0xff]   ;;  %v34_v48 = vld [vmem:[%s4754_s0 + $0x20] sm:$0xff] }
  0x2a   :  { %3314 = vmatprep.subr.bf16.mxu1 %v3637_v49  ;;  %v50_v49 = vld [vmem:[%s4754_s0 + $0xa0] sm:$0xff] }
  0x2c   :  { %3293 = vmatpush3.bf16.msra.mxu0 %v3638_v50  ;;  %v35_v50 = vld [vmem:[%s4754_s0 + $0x28] sm:$0xff] }
  0x2d   :  { %3315 = vmatpush3.bf16.msra.mxu1 %v3639_v51  ;;  %3294 = vmatprep.subr.bf16.mxu0 %v3640_v52  ;;  %v51_v51 = vld [vmem:[%s4754_s0 + $0xa8] sm:$0xff]  ;;  %v2962_v52 = vcombine.low %v34_v48, %v50_v49 }
  0x2e   :  { %3316 = vmatprep.subr.bf16.mxu1 %v3641_v53  ;;  %v2963_v53 = vcombine.high %v34_v48, %v50_v49  ;;  %v3740_v48 = vld [vmem:[%s4753_s1 + $0x460] sm:$0xff]  }
  0x2f   :  { %v3741_v49 = vld [vmem:[%s4753_s1 + $0x4e0] sm:$0xff]  }
  0x30   :  { %3295 = vmatpush3.bf16.msra.mxu0 %v3642_v54  ;;  %v2964_v54 = vcombine.low %v35_v50, %v51_v51 }
  0x31   :  { %3317 = vmatpush3.bf16.msra.mxu1 %v3643_v55  ;;  %3296 = vmatprep.subr.bf16.mxu0 %v3644_v56  ;;  %v2965_v55 = vcombine.high %v35_v50, %v51_v51  ;;  %v3692_v56 = vld [vmem:[%s4753_s1 + $0x340] sm:$0xff]  }
  0x32   :  { %3318 = vmatprep.subr.bf16.mxu1 %v3645_v57  ;;  %v3693_v57 = vld [vmem:[%s4753_s1 + $0x3c0] sm:$0xff]  }
  0x33   :  { %v3742_v50 = vld [vmem:[%s4753_s1 + $0x420] sm:$0xff]  }
  0x34   :  { %3297 = vmatpush3.bf16.msra.mxu0 %v3646_v58  ;;  %v3694_v58 = vld [vmem:[%s4753_s1 + $0x300] sm:$0xff]  }
  0x35   :  { %3319 = vmatpush3.bf16.msra.mxu1 %v3647_v59  ;;  %3298 = vmatprep.subr.bf16.mxu0 %v3648_v60  ;;  %v3695_v59 = vld [vmem:[%s4753_s1 + $0x380] sm:$0xff]   ;;  %v3696_v60 = vld [vmem:[%s4753_s1 + $0x348] sm:$0xff]  }
  0x36   :  { %3320 = vmatprep.subr.bf16.mxu1 %v3649_v61  ;;  %v3697_v61 = vld [vmem:[%s4753_s1 + $0x3c8] sm:$0xff]   ;;  %v3743_v51 = vld [vmem:[%s4753_s1 + $0x4a0] sm:$0xff]  }
  0x38   :  { %3299 = vmatpush3.bf16.msra.mxu0 %v3650_v62  ;;  %v3698_v62 = vld [vmem:[%s4753_s1 + $0x308] sm:$0xff]  }
  0x39   :  { %3321 = vmatpush3.bf16.msra.mxu1 %v3651_v63  ;;  %3300 = vmatprep.subr.bf16.mxu0 %v3652_v0  ;;  %v3699_v63 = vld [vmem:[%s4753_s1 + $0x388] sm:$0xff]   ;;  %v3700_v0 = vld [vmem:[%s4753_s1 + $0x350] sm:$0xff]  }
  0x3a   :  { %3322 = vmatprep.subr.bf16.mxu1 %v3653_v1  ;;  %v3701_v1 = vld [vmem:[%s4753_s1 + $0x3d0] sm:$0xff]  }
  0x3c   :  { %3301 = vmatpush3.bf16.msra.mxu0 %v3654_v2  ;;  %v3702_v2 = vld [vmem:[%s4753_s1 + $0x310] sm:$0xff]  }
  0x3d   :  { %3323 = vmatpush3.bf16.msra.mxu1 %v3655_v3  ;;  %3302 = vmatprep.subr.bf16.mxu0 %v3656_v4  ;;  %v3703_v3 = vld [vmem:[%s4753_s1 + $0x390] sm:$0xff]   ;;  %v3704_v4 = vld [vmem:[%s4753_s1 + $0x358] sm:$0xff]  }
  0x3e   :  { %3324 = vmatprep.subr.bf16.mxu1 %v3657_v5  ;;  %v3705_v5 = vld [vmem:[%s4753_s1 + $0x3d8] sm:$0xff]  }
  0x40   :  { %3303 = vmatpush3.bf16.msra.mxu0 %v3658_v6  ;;  %v3706_v6 = vld [vmem:[%s4753_s1 + $0x318] sm:$0xff]  }
  0x41   :  { %3325 = vmatpush3.bf16.msra.mxu1 %v3659_v7  ;;  %3332 = vmatprep.subr.bf16.mxu0 %v3660_v16  ;;  %v3707_v7 = vld [vmem:[%s4753_s1 + $0x398] sm:$0xff]   ;;  %v3716_v16 = vld [vmem:[%s4753_s1 + $0x370] sm:$0xff]  }
  0x42   :  { %3354 = vmatprep.subr.bf16.mxu1 %v3661_v17  ;;  %v3717_v17 = vld [vmem:[%s4753_s1 + $0x3f0] sm:$0xff]  }
  0x43   :  { %2385 = vmatmul.mubr.bf16.vlgmr.msra.gmra.mrb[4].mxu0 %v2958_v10  ;;  %v3710_v10 = vld [vmem:[%s4753_s1 + $0x320] sm:$0xff]  }
  0x44   :  { %2426 = vmatmul.mubr.bf16.vlgmr.msra.gmra.mrb[4].mxu1 %v2960_v14  ;;  %3333 = vmatpush3.bf16.msra.mxu0 %v3662_v18  ;;  %v3714_v14 = vld [vmem:[%s4753_s1 + $0x328] sm:$0xff]   ;;  %v3718_v18 = vld [vmem:[%s4753_s1 + $0x330] sm:$0xff]  }
  0x45   :  { %3355 = vmatpush3.bf16.msra.mxu1 %v3663_v19  ;;  %3334 = vmatprep.subr.bf16.mxu0 %v3664_v20  ;;  %v3719_v19 = vld [vmem:[%s4753_s1 + $0x3b0] sm:$0xff]   ;;  %v3720_v20 = vld [vmem:[%s4753_s1 + $0x378] sm:$0xff]  }
  0x46   :  { %3356 = vmatprep.subr.bf16.mxu1 %v3665_v21  ;;  %2466 = vmatprep.mubr.bf16.mxu0 %v2963_v53  ;;  %v3721_v21 = vld [vmem:[%s4753_s1 + $0x3f8] sm:$0xff]   ;;  %v3745_v53 = vld [vmem:[%s4753_s1 + $0x4e8] sm:$0xff]  }
  0x47   :  { %2507 = vmatprep.mubr.bf16.mxu1 %v2965_v55  ;;  %v3747_v55 = vld [vmem:[%s4753_s1 + $0x4a8] sm:$0xff]  }
  0x48   :  { %3335 = vmatpush3.bf16.msra.mxu0 %v3666_v22  ;;  %v3722_v22 = vld [vmem:[%s4753_s1 + $0x338] sm:$0xff]  }
  0x49   :  { %3357 = vmatpush3.bf16.msra.mxu1 %v3667_v23  ;;  %3336 = vmatprep.subr.bf16.mxu0 %v3668_v24  ;;  %v3723_v23 = vld [vmem:[%s4753_s1 + $0x3b8] sm:$0xff]   ;;  %v36_v24 = vld [vmem:[%s4754_s0 + $0x30] sm:$0xff] }
  0x4a   :  { %3358 = vmatprep.subr.bf16.mxu1 %v3669_v25  ;;  %v52_v25 = vld [vmem:[%s4754_s0 + $0xb0] sm:$0xff] }
  0x4c   :  { %3337 = vmatpush3.bf16.msra.mxu0 %v3670_v26  ;;  %v37_v26 = vld [vmem:[%s4754_s0 + $0x38] sm:$0xff] }
  0x4d   :  { %3359 = vmatpush3.bf16.msra.mxu1 %v3671_v27  ;;  %3338 = vmatprep.subr.bf16.mxu0 %v3672_v28  ;;  %v2966_v27 = vcombine.low %v36_v24, %v52_v25  ;;  %v2967_v28 = vcombine.high %v36_v24, %v52_v25  ;;  %v3772_v24 = vld [vmem:[%s4753_s1 + $0x560] sm:$0xff]  }
  0x4e   :  { %3360 = vmatprep.subr.bf16.mxu1 %v3673_v29  ;;  %v53_v29 = vld [vmem:[%s4754_s0 + $0xb8] sm:$0xff]  ;;  %v3773_v25 = vld [vmem:[%s4753_s1 + $0x5e0] sm:$0xff]  }
  0x50   :  { %3339 = vmatpush3.bf16.msra.mxu0 %v3674_v30  ;;  %v2968_v30 = vcombine.low %v37_v26, %v53_v29 }
  0x51   :  { %3361 = vmatpush3.bf16.msra.mxu1 %v3675_v31  ;;  %3340 = vmatprep.subr.bf16.mxu0 %v3676_v32  ;;  %v2969_v31 = vcombine.high %v37_v26, %v53_v29  ;;  %v3724_v32 = vld [vmem:[%s4753_s1 + $0x440] sm:$0xff]   ;;  %v3777_v29 = vld [vmem:[%s4753_s1 + $0x5e8] sm:$0xff]  }
  0x52   :  { %3362 = vmatprep.subr.bf16.mxu1 %v3677_v33  ;;  %v3725_v33 = vld [vmem:[%s4753_s1 + $0x4c0] sm:$0xff]  }
  0x53   :  { %v3774_v26 = vld [vmem:[%s4753_s1 + $0x520] sm:$0xff]  }
  0x54   :  { %3341 = vmatpush3.bf16.msra.mxu0 %v3678_v34  ;;  %v3726_v34 = vld [vmem:[%s4753_s1 + $0x400] sm:$0xff]  }
  0x55   :  { %3363 = vmatpush3.bf16.msra.mxu1 %v3679_v35  ;;  %3342 = vmatprep.subr.bf16.mxu0 %v3680_v36  ;;  %v3727_v35 = vld [vmem:[%s4753_s1 + $0x480] sm:$0xff]   ;;  %v3728_v36 = vld [vmem:[%s4753_s1 + $0x448] sm:$0xff]  }
  0x56   :  { %3364 = vmatprep.subr.bf16.mxu1 %v3681_v37  ;;  %v3729_v37 = vld [vmem:[%s4753_s1 + $0x4c8] sm:$0xff]  }
  0x58   :  { %3343 = vmatpush3.bf16.msra.mxu0 %v3682_v38  ;;  %v3730_v38 = vld [vmem:[%s4753_s1 + $0x408] sm:$0xff]  }
  0x59   :  { %3365 = vmatpush3.bf16.msra.mxu1 %v3683_v39  ;;  %3344 = vmatprep.subr.bf16.mxu0 %v3684_v40  ;;  %v3731_v39 = vld [vmem:[%s4753_s1 + $0x488] sm:$0xff]   ;;  %v3732_v40 = vld [vmem:[%s4753_s1 + $0x450] sm:$0xff]  }
  0x5a   :  { %3366 = vmatprep.subr.bf16.mxu1 %v3685_v41  ;;  %v3733_v41 = vld [vmem:[%s4753_s1 + $0x4d0] sm:$0xff]  }
  0x5c   :  { %3345 = vmatpush3.bf16.msra.mxu0 %v3686_v42  ;;  %v3734_v42 = vld [vmem:[%s4753_s1 + $0x410] sm:$0xff]  }
  0x5d   :  { %3367 = vmatpush3.bf16.msra.mxu1 %v3687_v43  ;;  %3346 = vmatprep.subr.bf16.mxu0 %v3688_v44  ;;  %v3735_v43 = vld [vmem:[%s4753_s1 + $0x490] sm:$0xff]   ;;  %v3736_v44 = vld [vmem:[%s4753_s1 + $0x458] sm:$0xff]  }
  0x5e   :  { %3368 = vmatprep.subr.bf16.mxu1 %v3689_v45  ;;  %v3737_v45 = vld [vmem:[%s4753_s1 + $0x4d8] sm:$0xff]  }
  0x60   :  { %3347 = vmatpush3.bf16.msra.mxu0 %v3690_v46  ;;  %v3738_v46 = vld [vmem:[%s4753_s1 + $0x418] sm:$0xff]  }
  0x61   :  { %3369 = vmatpush3.bf16.msra.mxu1 %v3691_v47  ;;  %3376 = vmatprep.subr.bf16.mxu0 %v3692_v56  ;;  %v3739_v47 = vld [vmem:[%s4753_s1 + $0x498] sm:$0xff]   ;;  %v3748_v56 = vld [vmem:[%s4753_s1 + $0x470] sm:$0xff]  }
  0x62   :  { %3398 = vmatprep.subr.bf16.mxu1 %v3693_v57  ;;  %v3749_v57 = vld [vmem:[%s4753_s1 + $0x4f0] sm:$0xff]  }
  0x63   :  { %2467 = vmatmul.mubr.bf16.vlgmr.msra.gmra.mrb[8].mxu0 %v2962_v52  ;;  %v3744_v52 = vld [vmem:[%s4753_s1 + $0x468] sm:$0xff]  }
  0x64   :  { %2508 = vmatmul.mubr.bf16.vlgmr.msra.gmra.mrb[8].mxu1 %v2964_v54  ;;  %3377 = vmatpush3.bf16.msra.mxu0 %v3694_v58  ;;  %v3746_v54 = vld [vmem:[%s4753_s1 + $0x428] sm:$0xff]   ;;  %v3750_v58 = vld [vmem:[%s4753_s1 + $0x430] sm:$0xff]  }
  0x65   :  { %3399 = vmatpush3.bf16.msra.mxu1 %v3695_v59  ;;  %3378 = vmatprep.subr.bf16.mxu0 %v3696_v60  ;;  %v3751_v59 = vld [vmem:[%s4753_s1 + $0x4b0] sm:$0xff]   ;;  %v3752_v60 = vld [vmem:[%s4753_s1 + $0x478] sm:$0xff]  }
  0x66   :  { %3400 = vmatprep.subr.bf16.mxu1 %v3697_v61  ;;  %2548 = vmatprep.mubr.bf16.mxu0 %v2967_v28  ;;  %v3753_v61 = vld [vmem:[%s4753_s1 + $0x4f8] sm:$0xff]   ;;  %v3776_v28 = vld [vmem:[%s4753_s1 + $0x568] sm:$0xff]  }
  0x67   :  { %2589 = vmatprep.mubr.bf16.mxu1 %v2969_v31  ;;  %v3779_v31 = vld [vmem:[%s4753_s1 + $0x5a8] sm:$0xff]  }
  0x68   :  { %3379 = vmatpush3.bf16.msra.mxu0 %v3698_v62  ;;  %v3754_v62 = vld [vmem:[%s4753_s1 + $0x438] sm:$0xff]  }
  0x69   :  { %3401 = vmatpush3.bf16.msra.mxu1 %v3699_v63  ;;  %3380 = vmatprep.subr.bf16.mxu0 %v3700_v0  ;;  %v3755_v63 = vld [vmem:[%s4753_s1 + $0x4b8] sm:$0xff]   ;;  %v38_v0 = vld [vmem:[%s4754_s0 + $0x40] sm:$0xff] }
  0x6a   :  { %3402 = vmatprep.subr.bf16.mxu1 %v3701_v1  ;;  %v54_v1 = vld [vmem:[%s4754_s0 + $0xc0] sm:$0xff] }
  0x6c   :  { %3381 = vmatpush3.bf16.msra.mxu0 %v3702_v2  ;;  %v2970_v2 = vcombine.low %v38_v0, %v54_v1 }
  0x6d   :  { %3403 = vmatpush3.bf16.msra.mxu1 %v3703_v3  ;;  %3382 = vmatprep.subr.bf16.mxu0 %v3704_v4  ;;  %v2971_v3 = vcombine.high %v38_v0, %v54_v1  ;;  %v39_v4 = vld [vmem:[%s4754_s0 + $0x48] sm:$0xff]  ;;  %v3804_v0 = vld [vmem:[%s4753_s1 + $0x660] sm:$0xff]  }
  0x6e   :  { %3404 = vmatprep.subr.bf16.mxu1 %v3705_v5  ;;  %v55_v5 = vld [vmem:[%s4754_s0 + $0xc8] sm:$0xff]  ;;  %v3805_v1 = vld [vmem:[%s4753_s1 + $0x6e0] sm:$0xff]  }
  0x70   :  { %3383 = vmatpush3.bf16.msra.mxu0 %v3706_v6  ;;  %v2972_v6 = vcombine.low %v39_v4, %v55_v5 }
  0x71   :  { %3405 = vmatpush3.bf16.msra.mxu1 %v3707_v7  ;;  %3384 = vmatprep.subr.bf16.mxu0 %v3708_v8  ;;  %v2973_v7 = vcombine.high %v39_v4, %v55_v5  ;;  %v3756_v8 = vld [vmem:[%s4753_s1 + $0x540] sm:$0xff]   ;;  %v3808_v4 = vld [vmem:[%s4753_s1 + $0x668] sm:$0xff]  }
  0x72   :  { %3406 = vmatprep.subr.bf16.mxu1 %v3709_v9  ;;  %v3757_v9 = vld [vmem:[%s4753_s1 + $0x5c0] sm:$0xff]   ;;  %v3809_v5 = vld [vmem:[%s4753_s1 + $0x6e8] sm:$0xff]  }
  0x74   :  { %3385 = vmatpush3.bf16.msra.mxu0 %v3710_v10  ;;  %v3758_v10 = vld [vmem:[%s4753_s1 + $0x500] sm:$0xff]  }
  0x75   :  { %3407 = vmatpush3.bf16.msra.mxu1 %v3711_v11  ;;  %3386 = vmatprep.subr.bf16.mxu0 %v3712_v12  ;;  %v3759_v11 = vld [vmem:[%s4753_s1 + $0x580] sm:$0xff]   ;;  %v3760_v12 = vld [vmem:[%s4753_s1 + $0x548] sm:$0xff]  }
  0x76   :  { %3408 = vmatprep.subr.bf16.mxu1 %v3713_v13  ;;  %v3761_v13 = vld [vmem:[%s4753_s1 + $0x5c8] sm:$0xff]  }
  0x78   :  { %3387 = vmatpush3.bf16.msra.mxu0 %v3714_v14  ;;  %v3762_v14 = vld [vmem:[%s4753_s1 + $0x508] sm:$0xff]  }
  0x79   :  { %3409 = vmatpush3.bf16.msra.mxu1 %v3715_v15  ;;  %3388 = vmatprep.subr.bf16.mxu0 %v3716_v16  ;;  %v3763_v15 = vld [vmem:[%s4753_s1 + $0x588] sm:$0xff]   ;;  %v3764_v16 = vld [vmem:[%s4753_s1 + $0x550] sm:$0xff]  }
  0x7a   :  { %3410 = vmatprep.subr.bf16.mxu1 %v3717_v17  ;;  %v3765_v17 = vld [vmem:[%s4753_s1 + $0x5d0] sm:$0xff]  }
  0x7c   :  { %3389 = vmatpush3.bf16.msra.mxu0 %v3718_v18  ;;  %v3766_v18 = vld [vmem:[%s4753_s1 + $0x510] sm:$0xff]  }
  0x7d   :  { %3411 = vmatpush3.bf16.msra.mxu1 %v3719_v19  ;;  %3390 = vmatprep.subr.bf16.mxu0 %v3720_v20  ;;  %v3767_v19 = vld [vmem:[%s4753_s1 + $0x590] sm:$0xff]   ;;  %v3768_v20 = vld [vmem:[%s4753_s1 + $0x558] sm:$0xff]  }
  0x7e   :  { %3412 = vmatprep.subr.bf16.mxu1 %v3721_v21  ;;  %v3769_v21 = vld [vmem:[%s4753_s1 + $0x5d8] sm:$0xff]  }
  0x80   :  { %3391 = vmatpush3.bf16.msra.mxu0 %v3722_v22  ;;  %v3770_v22 = vld [vmem:[%s4753_s1 + $0x518] sm:$0xff]  }
  0x81   :  { %3413 = vmatpush3.bf16.msra.mxu1 %v3723_v23  ;;  %3420 = vmatprep.subr.bf16.mxu0 %v3724_v32  ;;  %v3771_v23 = vld [vmem:[%s4753_s1 + $0x598] sm:$0xff]   ;;  %v3780_v32 = vld [vmem:[%s4753_s1 + $0x570] sm:$0xff]  }
  0x82   :  { %3442 = vmatprep.subr.bf16.mxu1 %v3725_v33  ;;  %v3781_v33 = vld [vmem:[%s4753_s1 + $0x5f0] sm:$0xff]  }
  0x83   :  { %2549 = vmatmul.mubr.bf16.vlgmr.msra.gmra.mrb[12].mxu0 %v2966_v27  ;;  %v3775_v27 = vld [vmem:[%s4753_s1 + $0x5a0] sm:$0xff]  }
  0x84   :  { %2590 = vmatmul.mubr.bf16.vlgmr.msra.gmra.mrb[12].mxu1 %v2968_v30  ;;  %3421 = vmatpush3.bf16.msra.mxu0 %v3726_v34  ;;  %v3778_v30 = vld [vmem:[%s4753_s1 + $0x528] sm:$0xff]   ;;  %v3782_v34 = vld [vmem:[%s4753_s1 + $0x530] sm:$0xff]  }
  0x85   :  { %3443 = vmatpush3.bf16.msra.mxu1 %v3727_v35  ;;  %3422 = vmatprep.subr.bf16.mxu0 %v3728_v36  ;;  %v3783_v35 = vld [vmem:[%s4753_s1 + $0x5b0] sm:$0xff]   ;;  %v3784_v36 = vld [vmem:[%s4753_s1 + $0x578] sm:$0xff]  }
  0x86   :  { %3444 = vmatprep.subr.bf16.mxu1 %v3729_v37  ;;  %2630 = vmatprep.mubr.bf16.mxu0 %v2971_v3  ;;  %v3785_v37 = vld [vmem:[%s4753_s1 + $0x5f8] sm:$0xff]   ;;  %v3807_v3 = vld [vmem:[%s4753_s1 + $0x6a0] sm:$0xff]  }
  0x87   :  { %2671 = vmatprep.mubr.bf16.mxu1 %v2973_v7  ;;  %v3811_v7 = vld [vmem:[%s4753_s1 + $0x6a8] sm:$0xff]  }
  0x88   :  { %3423 = vmatpush3.bf16.msra.mxu0 %v3730_v38  ;;  %v3786_v38 = vld [vmem:[%s4753_s1 + $0x538] sm:$0xff]  }
  0x89   :  { %3445 = vmatpush3.bf16.msra.mxu1 %v3731_v39  ;;  %3424 = vmatprep.subr.bf16.mxu0 %v3732_v40  ;;  %v3787_v39 = vld [vmem:[%s4753_s1 + $0x5b8] sm:$0xff]   ;;  %v40_v40 = vld [vmem:[%s4754_s0 + $0x50] sm:$0xff] }
  0x8a   :  { %3446 = vmatprep.subr.bf16.mxu1 %v3733_v41  ;;  %v56_v41 = vld [vmem:[%s4754_s0 + $0xd0] sm:$0xff] }
  0x8c   :  { %3425 = vmatpush3.bf16.msra.mxu0 %v3734_v42  ;;  %v41_v42 = vld [vmem:[%s4754_s0 + $0x58] sm:$0xff] }
  0x8d   :  { %3447 = vmatpush3.bf16.msra.mxu1 %v3735_v43  ;;  %3426 = vmatprep.subr.bf16.mxu0 %v3736_v44  ;;  %v57_v43 = vld [vmem:[%s4754_s0 + $0xd8] sm:$0xff]  ;;  %v2974_v44 = vcombine.low %v40_v40, %v56_v41 }
  0x8e   :  { %3448 = vmatprep.subr.bf16.mxu1 %v3737_v45  ;;  %v2975_v45 = vcombine.high %v40_v40, %v56_v41  ;;  %v3835_v41 = vld [vmem:[%s4753_s1 + $0x798] sm:$0xff]  }
  0x90   :  { %3427 = vmatpush3.bf16.msra.mxu0 %v3738_v46  ;;  %v2976_v46 = vcombine.low %v41_v42, %v57_v43 }
  0x91   :  { %3449 = vmatpush3.bf16.msra.mxu1 %v3739_v47  ;;  %3428 = vmatprep.subr.bf16.mxu0 %v3740_v48  ;;  %v2977_v47 = vcombine.high %v41_v42, %v57_v43  ;;  %v3788_v48 = vld [vmem:[%s4753_s1 + $0x640] sm:$0xff]  }
  0x92   :  { %3450 = vmatprep.subr.bf16.mxu1 %v3741_v49  ;;  %v3789_v49 = vld [vmem:[%s4753_s1 + $0x6c0] sm:$0xff]  }
  0x93   :  { %v3836_v43 = vld [vmem:[%s4753_s1 + $0x760] sm:$0xff]  }
  0x94   :  { %3429 = vmatpush3.bf16.msra.mxu0 %v3742_v50  ;;  %v3790_v50 = vld [vmem:[%s4753_s1 + $0x600] sm:$0xff]  }
  0x95   :  { %3451 = vmatpush3.bf16.msra.mxu1 %v3743_v51  ;;  %3430 = vmatprep.subr.bf16.mxu0 %v3744_v52  ;;  %v3791_v51 = vld [vmem:[%s4753_s1 + $0x680] sm:$0xff]   ;;  %v3792_v52 = vld [vmem:[%s4753_s1 + $0x648] sm:$0xff]  }
  0x96   :  { %3452 = vmatprep.subr.bf16.mxu1 %v3745_v53  ;;  %v3793_v53 = vld [vmem:[%s4753_s1 + $0x6c8] sm:$0xff]  }
  0x98   :  { %3431 = vmatpush3.bf16.msra.mxu0 %v3746_v54  ;;  %v3794_v54 = vld [vmem:[%s4753_s1 + $0x608] sm:$0xff]  }
  0x99   :  { %3453 = vmatpush3.bf16.msra.mxu1 %v3747_v55  ;;  %3432 = vmatprep.subr.bf16.mxu0 %v3748_v56  ;;  %v3795_v55 = vld [vmem:[%s4753_s1 + $0x688] sm:$0xff]   ;;  %v3796_v56 = vld [vmem:[%s4753_s1 + $0x650] sm:$0xff]  }
  0x9a   :  { %3454 = vmatprep.subr.bf16.mxu1 %v3749_v57  ;;  %v3797_v57 = vld [vmem:[%s4753_s1 + $0x6d0] sm:$0xff]  }
  0x9c   :  { %3433 = vmatpush3.bf16.msra.mxu0 %v3750_v58  ;;  %v3798_v58 = vld [vmem:[%s4753_s1 + $0x610] sm:$0xff]  }
  0x9d   :  { %3455 = vmatpush3.bf16.msra.mxu1 %v3751_v59  ;;  %3434 = vmatprep.subr.bf16.mxu0 %v3752_v60  ;;  %v3799_v59 = vld [vmem:[%s4753_s1 + $0x690] sm:$0xff]   ;;  %v3800_v60 = vld [vmem:[%s4753_s1 + $0x658] sm:$0xff]  }
  0x9e   :  { %3456 = vmatprep.subr.bf16.mxu1 %v3753_v61  ;;  %v3801_v61 = vld [vmem:[%s4753_s1 + $0x6d8] sm:$0xff]  }
  0xa0   :  { %3435 = vmatpush3.bf16.msra.mxu0 %v3754_v62  ;;  %v3802_v62 = vld [vmem:[%s4753_s1 + $0x618] sm:$0xff]  }
  0xa1   :  { %3457 = vmatpush3.bf16.msra.mxu1 %v3755_v63  ;;  %3464 = vmatprep.subr.bf16.mxu0 %v3756_v8  ;;  %v3803_v63 = vld [vmem:[%s4753_s1 + $0x698] sm:$0xff]   ;;  %v3812_v8 = vld [vmem:[%s4753_s1 + $0x670] sm:$0xff]  }
  0xa2   :  { %3486 = vmatprep.subr.bf16.mxu1 %v3757_v9  ;;  %v3813_v9 = vld [vmem:[%s4753_s1 + $0x6f0] sm:$0xff]  }
  0xa3   :  { %2631 = vmatmul.mubr.bf16.vlgmr.msra.gmra.mrb[16].mxu0 %v2970_v2  ;;  %v3806_v2 = vld [vmem:[%s4753_s1 + $0x620] sm:$0xff]  }
  0xa4   :  { %2672 = vmatmul.mubr.bf16.vlgmr.msra.gmra.mrb[16].mxu1 %v2972_v6  ;;  %3465 = vmatpush3.bf16.msra.mxu0 %v3758_v10  ;;  %v3810_v6 = vld [vmem:[%s4753_s1 + $0x628] sm:$0xff]   ;;  %v3814_v10 = vld [vmem:[%s4753_s1 + $0x630] sm:$0xff]  }
  0xa5   :  { %3487 = vmatpush3.bf16.msra.mxu1 %v3759_v11  ;;  %3466 = vmatprep.subr.bf16.mxu0 %v3760_v12  ;;  %v3815_v11 = vld [vmem:[%s4753_s1 + $0x6b0] sm:$0xff]   ;;  %v3816_v12 = vld [vmem:[%s4753_s1 + $0x678] sm:$0xff]  }
  0xa6   :  { %3488 = vmatprep.subr.bf16.mxu1 %v3761_v13  ;;  %2712 = vmatprep.mubr.bf16.mxu0 %v2975_v45  ;;  %v3817_v13 = vld [vmem:[%s4753_s1 + $0x6f8] sm:$0xff]  }
  0xa7   :  { %2753 = vmatprep.mubr.bf16.mxu1 %v2977_v47 }
  0xa8   :  { %3467 = vmatpush3.bf16.msra.mxu0 %v3762_v14  ;;  %v3818_v14 = vld [vmem:[%s4753_s1 + $0x638] sm:$0xff]  }
  0xa9   :  { %3489 = vmatpush3.bf16.msra.mxu1 %v3763_v15  ;;  %3468 = vmatprep.subr.bf16.mxu0 %v3764_v16  ;;  %v3819_v15 = vld [vmem:[%s4753_s1 + $0x6b8] sm:$0xff]   ;;  %v42_v16 = vld [vmem:[%s4754_s0 + $0x60] sm:$0xff] }
  0xaa   :  { %3490 = vmatprep.subr.bf16.mxu1 %v3765_v17  ;;  %v58_v17 = vld [vmem:[%s4754_s0 + $0xe0] sm:$0xff] }
  0xac   :  { %3469 = vmatpush3.bf16.msra.mxu0 %v3766_v18  ;;  %v43_v18 = vld [vmem:[%s4754_s0 + $0x68] sm:$0xff] }
  0xad   :  { %3491 = vmatpush3.bf16.msra.mxu1 %v3767_v19  ;;  %3470 = vmatprep.subr.bf16.mxu0 %v3768_v20  ;;  %v2978_v19 = vcombine.low %v42_v16, %v58_v17  ;;  %v2979_v20 = vcombine.high %v42_v16, %v58_v17 }
  0xae   :  { %3492 = vmatprep.subr.bf16.mxu1 %v3769_v21  ;;  %v59_v21 = vld [vmem:[%s4754_s0 + $0xe8] sm:$0xff] }
  0xb0   :  { %3471 = vmatpush3.bf16.msra.mxu0 %v3770_v22  ;;  %v2980_v22 = vcombine.low %v43_v18, %v59_v21 }
  0xb1   :  { %3493 = vmatpush3.bf16.msra.mxu1 %v3771_v23  ;;  %3472 = vmatprep.subr.bf16.mxu0 %v3772_v24  ;;  %v2981_v23 = vcombine.high %v43_v18, %v59_v21  ;;  %v3820_v24 = vld [vmem:[%s4753_s1 + $0x740] sm:$0xff]  }
  0xb2   :  { %3494 = vmatprep.subr.bf16.mxu1 %v3773_v25  ;;  %v3821_v25 = vld [vmem:[%s4753_s1 + $0x7c0] sm:$0xff]  }
  0xb4   :  { %3473 = vmatpush3.bf16.msra.mxu0 %v3774_v26  ;;  %v3822_v26 = vld [vmem:[%s4753_s1 + $0x700] sm:$0xff]  }
  0xb5   :  { %3495 = vmatpush3.bf16.msra.mxu1 %v3775_v27  ;;  %3474 = vmatprep.subr.bf16.mxu0 %v3776_v28  ;;  %v3823_v27 = vld [vmem:[%s4753_s1 + $0x780] sm:$0xff]   ;;  %v3824_v28 = vld [vmem:[%s4753_s1 + $0x748] sm:$0xff]  }
  0xb6   :  { %3496 = vmatprep.subr.bf16.mxu1 %v3777_v29  ;;  %v3825_v29 = vld [vmem:[%s4753_s1 + $0x7c8] sm:$0xff]  }
  0xb8   :  { %3475 = vmatpush3.bf16.msra.mxu0 %v3778_v30  ;;  %v3826_v30 = vld [vmem:[%s4753_s1 + $0x708] sm:$0xff]  }
  0xb9   :  { %3497 = vmatpush3.bf16.msra.mxu1 %v3779_v31  ;;  %3476 = vmatprep.subr.bf16.mxu0 %v3780_v32  ;;  %v3827_v31 = vld [vmem:[%s4753_s1 + $0x788] sm:$0xff]   ;;  %v3828_v32 = vld [vmem:[%s4753_s1 + $0x750] sm:$0xff]  }
  0xba   :  { %3498 = vmatprep.subr.bf16.mxu1 %v3781_v33  ;;  %v3829_v33 = vld [vmem:[%s4753_s1 + $0x7d0] sm:$0xff]  }
  0xbc   :  { %3477 = vmatpush3.bf16.msra.mxu0 %v3782_v34  ;;  %v3830_v34 = vld [vmem:[%s4753_s1 + $0x710] sm:$0xff]  }
  0xbd   :  { %3499 = vmatpush3.bf16.msra.mxu1 %v3783_v35  ;;  %3478 = vmatprep.subr.bf16.mxu0 %v3784_v36  ;;  %v3831_v35 = vld [vmem:[%s4753_s1 + $0x790] sm:$0xff]   ;;  %v3832_v36 = vld [vmem:[%s4753_s1 + $0x758] sm:$0xff]  }
  0xbe   :  { %3500 = vmatprep.subr.bf16.mxu1 %v3785_v37  ;;  %v3833_v37 = vld [vmem:[%s4753_s1 + $0x7d8] sm:$0xff]  }
  0xc0   :  { %3479 = vmatpush3.bf16.msra.mxu0 %v3786_v38 }
  0xc1   :  { %3501 = vmatpush3.bf16.msra.mxu1 %v3787_v39  ;;  %3508 = vmatprep.subr.bf16.mxu0 %v3788_v48  ;;  %v3834_v39 = vld [vmem:[%s4753_s1 + $0x718] sm:$0xff]  }
  0xc2   :  { %3530 = vmatprep.subr.bf16.mxu1 %v3789_v49  ;;  %v3838_v49 = vld [vmem:[%s4753_s1 + $0x720] sm:$0xff]  }
  0xc3   :  { %2713 = vmatmul.mubr.bf16.vlgmr.msra.gmra.mrb[20].mxu0 %v2974_v44 }
  0xc4   :  { %2754 = vmatmul.mubr.bf16.vlgmr.msra.gmra.mrb[20].mxu1 %v2976_v46  ;;  %3509 = vmatpush3.bf16.msra.mxu0 %v3790_v50  ;;  %v3837_v46 = vld [vmem:[%s4753_s1 + $0x7e0] sm:$0xff]  }
  0xc5   :  { %3531 = vmatpush3.bf16.msra.mxu1 %v3791_v51  ;;  %3510 = vmatprep.subr.bf16.mxu0 %v3792_v52  ;;  %v3839_v51 = vld [vmem:[%s4753_s1 + $0x7a0] sm:$0xff]  }
  0xc6   :  { %3532 = vmatprep.subr.bf16.mxu1 %v3793_v53  ;;  %2794 = vmatprep.mubr.bf16.mxu0 %v2979_v20 }
  0xc7   :  { %2835 = vmatprep.mubr.bf16.mxu1 %v2981_v23 }
  0xc8   :  { %3511 = vmatpush3.bf16.msra.mxu0 %v3794_v54  ;;  %v3840_v54 = vld [vmem:[%s4753_s1 + $0x768] sm:$0xff]  }
  0xc9   :  { %3533 = vmatpush3.bf16.msra.mxu1 %v3795_v55  ;;  %3512 = vmatprep.subr.bf16.mxu0 %v3796_v56 }
  0xca   :  { %3534 = vmatprep.subr.bf16.mxu1 %v3797_v57  ;;  %v3841_v57 = vld [vmem:[%s4753_s1 + $0x7e8] sm:$0xff]  }
  0xcc   :  { %3513 = vmatpush3.bf16.msra.mxu0 %v3798_v58 }
  0xcd   :  { %3535 = vmatpush3.bf16.msra.mxu1 %v3799_v59  ;;  %3514 = vmatprep.subr.bf16.mxu0 %v3800_v60  ;;  %v3842_v59 = vld [vmem:[%s4753_s1 + $0x728] sm:$0xff]  }
  0xce   :  { %3536 = vmatprep.subr.bf16.mxu1 %v3801_v61  ;;  %v3843_v60 = vld [vmem:[%s4753_s1 + $0x7a8] sm:$0xff]  }
  0xd0   :  { %3515 = vmatpush3.bf16.msra.mxu0 %v3802_v62  ;;  %v3844_v62 = vld [vmem:[%s4753_s1 + $0x770] sm:$0xff]  }
  0xd1   :  { %3537 = vmatpush3.bf16.msra.mxu1 %v3803_v63  ;;  %3516 = vmatprep.subr.bf16.mxu0 %v3804_v0  ;;  %v3845_v63 = vld [vmem:[%s4753_s1 + $0x7f0] sm:$0xff]  }
  0xd2   :  { %3538 = vmatprep.subr.bf16.mxu1 %v3805_v1  ;;  %v3846_v0 = vld [vmem:[%s4753_s1 + $0x730] sm:$0xff]  }
  0xd3   :  { %v3847_v1 = vld [vmem:[%s4753_s1 + $0x7b0] sm:$0xff]  }
  0xd4   :  { %3517 = vmatpush3.bf16.msra.mxu0 %v3806_v2  ;;  %v3848_v2 = vld [vmem:[%s4753_s1 + $0x778] sm:$0xff]  }
  0xd5   :  { %3539 = vmatpush3.bf16.msra.mxu1 %v3807_v3  ;;  %3518 = vmatprep.subr.bf16.mxu0 %v3808_v4  ;;  %v3849_v3 = vld [vmem:[%s4753_s1 + $0x7f8] sm:$0xff]  }
  0xd6   :  { %3540 = vmatprep.subr.bf16.mxu1 %v3809_v5  ;;  %v3850_v4 = vld [vmem:[%s4753_s1 + $0x738] sm:$0xff]  }
  0xd7   :  { %v3851_v5 = vld [vmem:[%s4753_s1 + $0x7b8] sm:$0xff]  }
  0xd8   :  { %3519 = vmatpush3.bf16.msra.mxu0 %v3810_v6  ;;  %v44_v6 = vld [vmem:[%s4754_s0 + $0x70] sm:$0xff] }
  0xd9   :  { %3541 = vmatpush3.bf16.msra.mxu1 %v3811_v7  ;;  %3520 = vmatprep.subr.bf16.mxu0 %v3812_v8  ;;  %v60_v7 = vld [vmem:[%s4754_s0 + $0xf0] sm:$0xff] }
  0xda   :  { %3542 = vmatprep.subr.bf16.mxu1 %v3813_v9  ;;  %v2982_v8 = vcombine.low %v44_v6, %v60_v7  ;;  %v2983_v9 = vcombine.high %v44_v6, %v60_v7 }
  0xdc   :  { %3521 = vmatpush3.bf16.msra.mxu0 %v3814_v10  ;;  %v45_v10 = vld [vmem:[%s4754_s0 + $0x78] sm:$0xff] }
  0xdd   :  { %3543 = vmatpush3.bf16.msra.mxu1 %v3815_v11  ;;  %3522 = vmatprep.subr.bf16.mxu0 %v3816_v12  ;;  %v61_v11 = vld [vmem:[%s4754_s0 + $0xf8] sm:$0xff] }
  0xde   :  { %3544 = vmatprep.subr.bf16.mxu1 %v3817_v13  ;;  %v2984_v12 = vcombine.low %v45_v10, %v61_v11  ;;  %v2985_v13 = vcombine.high %v45_v10, %v61_v11 }
  0xe0   :  { %3523 = vmatpush3.bf16.msra.mxu0 %v3818_v14 }
  0xe1   :  { %3545 = vmatpush3.bf16.msra.mxu1 %v3819_v15  ;;  %3552 = vmatprep.subr.bf16.mxu0 %v3820_v24 }
  0xe2   :  { %3574 = vmatprep.subr.bf16.mxu1 %v3821_v25 }
  0xe3   :  { %2795 = vmatmul.mubr.bf16.vlgmr.msra.gmra.mrb[24].mxu0 %v2978_v19 }
  0xe4   :  { %2836 = vmatmul.mubr.bf16.vlgmr.msra.gmra.mrb[24].mxu1 %v2980_v22  ;;  %3553 = vmatpush3.bf16.msra.mxu0 %v3822_v26 }
  0xe5   :  { %3575 = vmatpush3.bf16.msra.mxu1 %v3823_v27  ;;  %3554 = vmatprep.subr.bf16.mxu0 %v3824_v28 }
  0xe6   :  { %3576 = vmatprep.subr.bf16.mxu1 %v3825_v29  ;;  %2876 = vmatprep.mubr.bf16.mxu0 %v2983_v9 }
  0xe7   :  { %2917 = vmatprep.mubr.bf16.mxu1 %v2985_v13 }
  0xe8   :  { %3555 = vmatpush3.bf16.msra.mxu0 %v3826_v30 }
  0xe9   :  { %3577 = vmatpush3.bf16.msra.mxu1 %v3827_v31  ;;  %3556 = vmatprep.subr.bf16.mxu0 %v3828_v32 }
  0xea   :  { %3578 = vmatprep.subr.bf16.mxu1 %v3829_v33 }
  0xec   :  { %3557 = vmatpush3.bf16.msra.mxu0 %v3830_v34 }
  0xed   :  { %3579 = vmatpush3.bf16.msra.mxu1 %v3831_v35  ;;  %3558 = vmatprep.subr.bf16.mxu0 %v3832_v36 }
  0xee   :  { %3580 = vmatprep.subr.bf16.mxu1 %v3833_v37 }
  0xf0   :  { %3559 = vmatpush3.bf16.msra.mxu0 %v3834_v39 }
  0xf1   :  { %3581 = vmatpush3.bf16.msra.mxu1 %v3835_v41  ;;  %3560 = vmatprep.subr.bf16.mxu0 %v3836_v43 }
  0xf2   :  { %3582 = vmatprep.subr.bf16.mxu1 %v3837_v46 }
  0xf4   :  { %3561 = vmatpush3.bf16.msra.mxu0 %v3838_v49 }
  0xf5   :  { %3583 = vmatpush3.bf16.msra.mxu1 %v3839_v51  ;;  %3562 = vmatprep.subr.bf16.mxu0 %v3840_v54 }
  0xf6   :  { %v3260_v38 = vpop.f32.mrb[0].mxu0  ;;  %3584 = vmatprep.subr.bf16.mxu1 %v3841_v57 }
  0xf7   :  { %v3282_v40 = vpop.f32.mrb[0].mxu1  ;;  %v3261_v42 = vpop.f32.mrb[1].mxu0 }
  0xf8   :  { %v3262_v44 = vadd.f32 %v3261_v42, %v3260_v38  ;;  %v3283_v45 = vpop.f32.mrb[1].mxu1  ;;  %v3263_v48 = vpop.f32.mrb[2].mxu0  ;;  %3563 = vmatpush3.bf16.msra.mxu0 %v3842_v59 }
  0xf9   :  { %v3284_v47 = vadd.f32 %v3283_v45, %v3282_v40  ;;  %v3285_v50 = vpop.f32.mrb[2].mxu1  ;;  %v3264_v53 = vpop.f32.mrb[3].mxu0  ;;  %3585 = vmatpush3.bf16.msra.mxu1 %v3843_v60  ;;  %3564 = vmatprep.subr.bf16.mxu0 %v3844_v62 }
  0xfa   :  { %v3265_v55 = vadd.f32 %v3264_v53, %v3263_v48  ;;  %v3286_v56 = vpop.f32.mrb[3].mxu1  ;;  %3586 = vmatprep.subr.bf16.mxu1 %v3845_v63 }
  0xfb   :  { %v2346_v52 = vadd.f32 %v3284_v47, %v3262_v44  ;;  %v3287_v58 = vadd.f32 %v3286_v56, %v3285_v50 }
  0xfc   :  { %3565 = vmatpush3.bf16.msra.mxu0 %v3846_v0 }
  0xfd   :  { %v2349_v61 = vadd.f32 %v3287_v58, %v3265_v55  ;;  %3587 = vmatpush3.bf16.msra.mxu1 %v3847_v1  ;;  %3566 = vmatprep.subr.bf16.mxu0 %v3848_v2 }
  0xfe   :  { %3588 = vmatprep.subr.bf16.mxu1 %v3849_v3 }
 0x100   :  { %3567 = vmatpush3.bf16.msra.mxu0 %v3850_v4 }
 0x101   :  { %3589 = vmatpush3.bf16.msra.mxu1 %v3851_v5 }
 0x103   :  { %2877 = vmatmul.mubr.bf16.vlgmr.msra.gmra.mrb[28].mxu0 %v2982_v8 }
 0x104   :  { %2918 = vmatmul.mubr.bf16.vlgmr.msra.gmra.mrb[28].mxu1 %v2984_v12 }
 0x116   :  { %v3304_v14 = vpop.f32.mrb[4].mxu0 }
 0x117   :  { %v3326_v15 = vpop.f32.mrb[4].mxu1  ;;  %v3305_v16 = vpop.f32.mrb[5].mxu0 }
 0x118   :  { %v3306_v17 = vadd.f32 %v3305_v16, %v3304_v14  ;;  %v3327_v18 = vpop.f32.mrb[5].mxu1  ;;  %v3307_v19 = vpop.f32.mrb[6].mxu0 }
 0x119   :  { %v3328_v20 = vadd.f32 %v3327_v18, %v3326_v15  ;;  %v3329_v21 = vpop.f32.mrb[6].mxu1  ;;  %v3308_v22 = vpop.f32.mrb[7].mxu0 }
 0x11a   :  { %v2387_v23 = vadd.f32 %v3306_v17, %v2346_v52  ;;  %v3309_v24 = vadd.f32 %v3308_v22, %v3307_v19  ;;  %v3330_v25 = vpop.f32.mrb[7].mxu1 }
 0x11b   :  { %v3331_v26 = vadd.f32 %v3330_v25, %v3329_v21 }
 0x11c   :  { %v2428_v27 = vadd.f32 %v3328_v20, %v2387_v23  ;;  %v2390_v28 = vadd.f32 %v3309_v24, %v2349_v61 }
 0x11e   :  { %v2431_v29 = vadd.f32 %v3331_v26, %v2390_v28 }
 0x136   :  { %v3348_v30 = vpop.f32.mrb[8].mxu0 }
 0x137   :  { %v3370_v31 = vpop.f32.mrb[8].mxu1  ;;  %v3349_v32 = vpop.f32.mrb[9].mxu0 }
 0x138   :  { %v3371_v33 = vpop.f32.mrb[9].mxu1  ;;  %v3350_v34 = vadd.f32 %v3349_v32, %v3348_v30  ;;  %v3351_v36 = vpop.f32.mrb[10].mxu0 }
 0x139   :  { %v3372_v35 = vadd.f32 %v3371_v33, %v3370_v31  ;;  %v3373_v37 = vpop.f32.mrb[10].mxu1  ;;  %v3352_v38 = vpop.f32.mrb[11].mxu0 }
 0x13a   :  { %v3374_v39 = vpop.f32.mrb[11].mxu1  ;;  %v2469_v40 = vadd.f32 %v3350_v34, %v2428_v27  ;;  %v3353_v41 = vadd.f32 %v3352_v38, %v3351_v36 }
 0x13b   :  { %v3375_v42 = vadd.f32 %v3374_v39, %v3373_v37 }
 0x13c   :  { %v2510_v43 = vadd.f32 %v3372_v35, %v2469_v40  ;;  %v2472_v44 = vadd.f32 %v3353_v41, %v2431_v29 }
 0x13e   :  { %v2513_v45 = vadd.f32 %v3375_v42, %v2472_v44 }
 0x156   :  { %v3392_v46 = vpop.f32.mrb[12].mxu0 }
 0x157   :  { %v3414_v47 = vpop.f32.mrb[12].mxu1  ;;  %v3393_v48 = vpop.f32.mrb[13].mxu0 }
 0x158   :  { %v3394_v49 = vadd.f32 %v3393_v48, %v3392_v46  ;;  %v3415_v50 = vpop.f32.mrb[13].mxu1  ;;  %v3395_v51 = vpop.f32.mrb[14].mxu0 }
 0x159   :  { %v3416_v52 = vadd.f32 %v3415_v50, %v3414_v47  ;;  %v3417_v53 = vpop.f32.mrb[14].mxu1  ;;  %v3396_v54 = vpop.f32.mrb[15].mxu0 }
 0x15a   :  { %v2551_v55 = vadd.f32 %v3394_v49, %v2510_v43  ;;  %v3397_v56 = vadd.f32 %v3396_v54, %v3395_v51  ;;  %v3418_v57 = vpop.f32.mrb[15].mxu1 }
 0x15b   :  { %v3419_v58 = vadd.f32 %v3418_v57, %v3417_v53 }
 0x15c   :  { %v2592_v59 = vadd.f32 %v3416_v52, %v2551_v55  ;;  %v2554_v60 = vadd.f32 %v3397_v56, %v2513_v45 }
 0x15e   :  { %v2595_v61 = vadd.f32 %v3419_v58, %v2554_v60  ;;  %v2953_v58 = vld [vmem:[%s4755_s2] ss:$0 sm:$0xff] }
 0x176   :  { %v3436_v62 = vpop.f32.mrb[16].mxu0 }
 0x177   :  { %v3458_v63 = vpop.f32.mrb[16].mxu1  ;;  %v3437_v0 = vpop.f32.mrb[17].mxu0 }
 0x178   :  { %v3438_v1 = vadd.f32 %v3437_v0, %v3436_v62  ;;  %v3459_v2 = vpop.f32.mrb[17].mxu1  ;;  %v3439_v3 = vpop.f32.mrb[18].mxu0 }
 0x179   :  { %v3460_v4 = vadd.f32 %v3459_v2, %v3458_v63  ;;  %v3461_v5 = vpop.f32.mrb[18].mxu1  ;;  %v3440_v6 = vpop.f32.mrb[19].mxu0 }
 0x17a   :  { %v2633_v7 = vadd.f32 %v3438_v1, %v2592_v59  ;;  %v3441_v8 = vadd.f32 %v3440_v6, %v3439_v3  ;;  %v3462_v9 = vpop.f32.mrb[19].mxu1 }
 0x17b   :  { %v3463_v10 = vadd.f32 %v3462_v9, %v3461_v5 }
 0x17c   :  { %v2674_v11 = vadd.f32 %v3460_v4, %v2633_v7  ;;  %v2636_v12 = vadd.f32 %v3441_v8, %v2595_v61 }
 0x17e   :  { %v2677_v13 = vadd.f32 %v3463_v10, %v2636_v12 }
 0x196   :  { %v3480_v14 = vpop.f32.mrb[20].mxu0 }
 0x197   :  { %v3502_v15 = vpop.f32.mrb[20].mxu1  ;;  %v3481_v16 = vpop.f32.mrb[21].mxu0 }
 0x198   :  { %v3503_v17 = vpop.f32.mrb[21].mxu1  ;;  %v3482_v18 = vadd.f32 %v3481_v16, %v3480_v14  ;;  %v3483_v20 = vpop.f32.mrb[22].mxu0 }
 0x199   :  { %v3504_v19 = vadd.f32 %v3503_v17, %v3502_v15  ;;  %v3505_v21 = vpop.f32.mrb[22].mxu1  ;;  %v3484_v22 = vpop.f32.mrb[23].mxu0 }
 0x19a   :  { %v3506_v23 = vpop.f32.mrb[23].mxu1  ;;  %v2715_v24 = vadd.f32 %v3482_v18, %v2674_v11  ;;  %v3485_v25 = vadd.f32 %v3484_v22, %v3483_v20 }
 0x19b   :  { %v3507_v26 = vadd.f32 %v3506_v23, %v3505_v21 }
 0x19c   :  { %v2756_v27 = vadd.f32 %v3504_v19, %v2715_v24  ;;  %v2718_v28 = vadd.f32 %v3485_v25, %v2677_v13 }
 0x19e   :  { %v2759_v29 = vadd.f32 %v3507_v26, %v2718_v28 }
 0x1b6   :  { %v3524_v30 = vpop.f32.mrb[24].mxu0 }
 0x1b7   :  { %v3546_v31 = vpop.f32.mrb[24].mxu1  ;;  %v3525_v32 = vpop.f32.mrb[25].mxu0 }
 0x1b8   :  { %v3526_v33 = vadd.f32 %v3525_v32, %v3524_v30  ;;  %v3547_v34 = vpop.f32.mrb[25].mxu1  ;;  %v3527_v35 = vpop.f32.mrb[26].mxu0 }
 0x1b9   :  { %v3548_v36 = vadd.f32 %v3547_v34, %v3546_v31  ;;  %v3549_v37 = vpop.f32.mrb[26].mxu1  ;;  %v3528_v38 = vpop.f32.mrb[27].mxu0 }
 0x1ba   :  { %v2797_v39 = vadd.f32 %v3526_v33, %v2756_v27  ;;  %v3529_v40 = vadd.f32 %v3528_v38, %v3527_v35  ;;  %v3550_v41 = vpop.f32.mrb[27].mxu1 }
 0x1bb   :  { %v3551_v42 = vadd.f32 %v3550_v41, %v3549_v37 }
 0x1bc   :  { %v2838_v43 = vadd.f32 %v3548_v36, %v2797_v39  ;;  %v2800_v44 = vadd.f32 %v3529_v40, %v2759_v29 }
 0x1be   :  { %v2841_v45 = vadd.f32 %v3551_v42, %v2800_v44 }
 0x1d6   :  { %v3568_v46 = vpop.f32.mrb[28].mxu0 }
 0x1d7   :  { %v3590_v47 = vpop.f32.mrb[28].mxu1  ;;  %v3569_v48 = vpop.f32.mrb[29].mxu0 }
 0x1d8   :  { %v3570_v49 = vadd.f32 %v3569_v48, %v3568_v46  ;;  %v3591_v50 = vpop.f32.mrb[29].mxu1  ;;  %v3571_v51 = vpop.f32.mrb[30].mxu0 }
 0x1d9   :  { %v3592_v52 = vadd.f32 %v3591_v50, %v3590_v47  ;;  %v3593_v53 = vpop.f32.mrb[30].mxu1  ;;  %v3572_v54 = vpop.f32.mrb[31].mxu0 }
 0x1da   :  { %v2879_v55 = vadd.f32 %v3570_v49, %v2838_v43  ;;  %v3573_v56 = vadd.f32 %v3572_v54, %v3571_v51  ;;  %v3594_v57 = vpop.f32.mrb[31].mxu1 }
 0x1db   :  { %v3595_v59 = vadd.f32 %v3594_v57, %v3593_v53 }
 0x1dc   :  { %v2920_v60 = vadd.f32 %v3592_v52, %v2879_v55  ;;  %v2882_v61 = vadd.f32 %v3573_v56, %v2841_v45 }
 0x1de   :  { %v2926_v62 = vadd.f32 %v2953_v58, %v2920_v60  ;;  %v2923_v63 = vadd.f32 %v3595_v59, %v2882_v61 }
 0x1e0   :  { %v3242_v0 = vmul.f32 -1.442695, %v2926_v62  ;;  %v2927_v1 = vadd.f32 %v2953_v58, %v2923_v63 }
 0x1e2   :  { %3852 = vpow2.f32 %v3242_v0  ;;  %v3243_v2 = vmul.f32 -1.442695, %v2927_v1 }
 0x1e4   :  { %3854 = vpow2.f32 %v3243_v2 }
 0x1ec   :  { %v3853_v3 = vpop.eup %3852 }
 0x1ed   :  { %v2941_v4 = vadd.f32 1.0, %v3853_v3 }
 0x1ee   :  { %v3855_v5 = vpop.eup %3854 }
 0x1ef   :  { %3856 = vrcp.f32 %v2941_v4  ;;  %v2942_v6 = vadd.f32 1.0, %v3855_v5 }
 0x1f1   :  { %3858 = vrcp.f32 %v2942_v6 }
 0x1f9   :  { %v3857_v7 = vpop.eup %3856 }
 0x1fa   :  { %2947 = vst [vmem:[%s4756_s3] sm:$0xff] %v3857_v7 }
 0x1fb   :  { %v3859_v8 = vpop.eup %3858 }
 0x1fc   :  { %2948 = vst [vmem:[%s4756_s3 + $0x8] sm:$0xff] %v3859_v8 }

</bundles_post_ra>
